<compile_context>
chip_gen: v7x
topology: tpu7x:2x2x1
jax: 0.10.0
libtpu: 0.0.40
codegen_flags: <defaults>
</compile_context>

<pallas_src>
import functools

import jax
import jax.numpy as jnp
from jax import lax
from jax.experimental import pallas as pl
from jax.experimental.pallas import tpu as pltpu


def _make_divisible(v, divisor, min_value=None):
    if min_value is None:
        min_value = divisor
    new_v = max(min_value, int(v + divisor / 2) // divisor * divisor)
    if new_v < 0.9 * v:
        new_v += divisor
    return new_v


def _silu(x):
    return x * (1.0 / (1.0 + jnp.exp(-x)))


# ----------------------------- Pallas kernels ------------------------------ #

def _mbconv_se_kernel(x_ref, w1_ref, b1_ref, wd_ref, bd_ref,
                      wse1_ref, bse1_ref, wse2_ref, bse2_ref,
                      w3_ref, b3_ref, o_ref, hpad_ref,
                      *, stride, identity):
    """use_se=True branch, one batch element per grid step, fully VMEM-resident."""
    _, H, W, Cin = x_ref.shape
    Chid = w1_ref.shape[1]
    Cout = w3_ref.shape[1]
    _, Ho, Wo, _ = o_ref.shape

    x = x_ref[...].reshape(H * W, Cin)                        # f32

    # 1) pointwise expansion (MXU, bf16 operands, f32 acc) + folded BN + SiLU
    h1 = jnp.dot(x.astype(jnp.bfloat16), w1_ref[...],
                 preferred_element_type=jnp.float32) + b1_ref[...]
    h1 = _silu(h1)                                            # (H*W, Chid)

    # 2) zero-padded copy into VMEM scratch for the 3x3 depthwise window reads
    hpad_ref[...] = jnp.zeros_like(hpad_ref)
    hpad_ref[1:H + 1, 1:W + 1, :] = h1.reshape(H, W, Chid)

    # 3) depthwise 3x3 conv (VPU: 9 shifted FMAs; BN folded into the weights)
    wd = wd_ref[...]                                          # (9, Chid)
    acc = jnp.zeros((Ho, Wo, Chid), jnp.float32)
    for t in range(9):
        u, v = t // 3, t % 3
        if stride == 1:
            win = hpad_ref[u:u + Ho, v:v + Wo, :]
        else:
            # TODO(synk): stride=2 path (strided window reads) is implemented
            # but not exercised by the shapes tested in __main__.
            win = hpad_ref[pl.ds(u, Ho, stride), pl.ds(v, Wo, stride), :]
        acc = acc + win * wd[t:t + 1, :].reshape(1, 1, Chid)
    h2 = _silu(acc + bd_ref[...].reshape(1, 1, Chid))         # (Ho, Wo, Chid)
    h2 = h2.reshape(Ho * Wo, Chid)

    # 4) squeeze-excite (tiny f32 matmuls, EUP exp for SiLU / sigmoid)
    pooled = jnp.mean(h2, axis=0, keepdims=True)              # (1, Chid)
    z = jnp.dot(pooled, wse1_ref[...],
                preferred_element_type=jnp.float32) + bse1_ref[...]
    z = _silu(z)                                              # (1, Sq)
    gate = jnp.dot(z, wse2_ref[...],
                   preferred_element_type=jnp.float32) + bse2_ref[...]
    gate = 1.0 / (1.0 + jnp.exp(-gate))                       # sigmoid, (1, Chid)
    h2 = h2 * gate

    # 5) pointwise projection (MXU, bf16) + folded BN (+ residual)
    out = jnp.dot(h2.astype(jnp.bfloat16), w3_ref[...],
                  preferred_element_type=jnp.float32) + b3_ref[...]
    if identity:
        out = out + x
    o_ref[...] = out.reshape(1, Ho, Wo, Cout).astype(o_ref.dtype)


def _mbconv_plain_kernel(x_ref, w1_ref, b1_ref, w3_ref, b3_ref,
                         o_ref, xpad_ref, *, stride, identity):
    """use_se=False branch: 3x3 conv(stride) -> BN -> SiLU -> 1x1 -> BN (+res)."""
    _, H, W, Cin = x_ref.shape
    Chid = w1_ref.shape[2]
    Cout = w3_ref.shape[1]
    _, Ho, Wo, _ = o_ref.shape

    x = x_ref[...].reshape(H, W, Cin)

    xpad_ref[...] = jnp.zeros_like(xpad_ref)
    xpad_ref[1:H + 1, 1:W + 1, :] = x

    # 3x3 conv as 9 shifted (Ho*Wo, Cin) x (Cin, Chid) MXU matmuls
    # (im2col never materialized in HBM).
    acc = jnp.zeros((Ho * Wo, Chid), jnp.float32)
    for t in range(9):
        u, v = t // 3, t % 3
        if stride == 1:
            win = xpad_ref[u:u + Ho, v:v + Wo, :]
        else:
            win = xpad_ref[pl.ds(u, Ho, stride), pl.ds(v, Wo, stride), :]
        acc = acc + jnp.dot(win.reshape(Ho * Wo, Cin).astype(jnp.bfloat16),
                            w1_ref[t], preferred_element_type=jnp.float32)
    h1 = _silu(acc + b1_ref[...])

    out = jnp.dot(h1.astype(jnp.bfloat16), w3_ref[...],
                  preferred_element_type=jnp.float32) + b3_ref[...]
    if identity:
        out = out + x.reshape(H * W, Cin)
    o_ref[...] = out.reshape(1, Ho, Wo, Cout).astype(o_ref.dtype)


# ------------------------------ pallas wrappers ----------------------------- #

def _conv_out_dim(n, stride):
    return (n + 2 - 3) // stride + 1


def _mbconv_se_pallas(x, w1, b1, wd, bd, wse1, bse1, wse2, bse2, w3, b3,
                      *, stride, identity):
    B, H, W, Cin = x.shape
    Chid = w1.shape[1]
    Sq = wse1.shape[1]
    Cout = w3.shape[1]
    Ho, Wo = _conv_out_dim(H, stride), _conv_out_dim(W, stride)

    args = (x, w1, b1, wd, bd, wse1, bse1, wse2, bse2, w3, b3)
    flops = B * (2 * H * W * Cin * Chid + 18 * Ho * Wo * Chid
                 + 4 * Chid * Sq + 2 * Ho * Wo * Chid * Cout)
    trans = B * (H * W * Chid + Ho * Wo * Chid + Chid + Sq)
    bytes_accessed = (sum(int(a.size) * a.dtype.itemsize for a in args)
                      + B * Ho * Wo * Cout * 4)

    kernel = functools.partial(_mbconv_se_kernel, stride=stride,
                               identity=identity)
    return pl.pallas_call(
        kernel,
        out_shape=jax.ShapeDtypeStruct((B, Ho, Wo, Cout), jnp.float32),
        grid=(B,),
        in_specs=[
            pl.BlockSpec((1, H, W, Cin), lambda b: (b, 0, 0, 0)),
            pl.BlockSpec((Cin, Chid), lambda b: (0, 0)),
            pl.BlockSpec((1, Chid), lambda b: (0, 0)),
            pl.BlockSpec((9, Chid), lambda b: (0, 0)),
            pl.BlockSpec((1, Chid), lambda b: (0, 0)),
            pl.BlockSpec((Chid, Sq), lambda b: (0, 0)),
            pl.BlockSpec((1, Sq), lambda b: (0, 0)),
            pl.BlockSpec((Sq, Chid), lambda b: (0, 0)),
            pl.BlockSpec((1, Chid), lambda b: (0, 0)),
            pl.BlockSpec((Chid, Cout), lambda b: (0, 0)),
            pl.BlockSpec((1, Cout), lambda b: (0, 0)),
        ],
        out_specs=pl.BlockSpec((1, Ho, Wo, Cout), lambda b: (b, 0, 0, 0)),
        scratch_shapes=[pltpu.VMEM((H + 2, W + 2, Chid), jnp.float32)],
        compiler_params=pltpu.CompilerParams(
            dimension_semantics=("parallel",),
            vmem_limit_bytes=32 * 1024 * 1024),
        cost_estimate=pl.CostEstimate(flops=int(flops),
                                      transcendentals=int(trans),
                                      bytes_accessed=int(bytes_accessed)),
    )(*args)


def _mbconv_plain_pallas(x, w1, b1, w3, b3, *, stride, identity):
    B, H, W, Cin = x.shape
    Chid = w1.shape[2]
    Cout = w3.shape[1]
    Ho, Wo = _conv_out_dim(H, stride), _conv_out_dim(W, stride)

    args = (x, w1, b1, w3, b3)
    flops = B * (18 * Ho * Wo * Cin * Chid + 2 * Ho * Wo * Chid * Cout)
    trans = B * Ho * Wo * Chid
    bytes_accessed = (sum(int(a.size) * a.dtype.itemsize for a in args)
                      + B * Ho * Wo * Cout * 4)

    kernel = functools.partial(_mbconv_plain_kernel, stride=stride,
                               identity=identity)
    return pl.pallas_call(
        kernel,
        out_shape=jax.ShapeDtypeStruct((B, Ho, Wo, Cout), jnp.float32),
        grid=(B,),
        in_specs=[
            pl.BlockSpec((1, H, W, Cin), lambda b: (b, 0, 0, 0)),
            pl.BlockSpec((9, Cin, Chid), lambda b: (0, 0, 0)),
            pl.BlockSpec((1, Chid), lambda b: (0, 0)),
            pl.BlockSpec((Chid, Cout), lambda b: (0, 0)),
            pl.BlockSpec((1, Cout), lambda b: (0, 0)),
        ],
        out_specs=pl.BlockSpec((1, Ho, Wo, Cout), lambda b: (b, 0, 0, 0)),
        scratch_shapes=[pltpu.VMEM((H + 2, W + 2, Cin), jnp.float32)],
        compiler_params=pltpu.CompilerParams(
            dimension_semantics=("parallel",),
            vmem_limit_bytes=32 * 1024 * 1024),
        cost_estimate=pl.CostEstimate(flops=int(flops),
                                      transcendentals=int(trans),
                                      bytes_accessed=int(bytes_accessed)),
    )(*args)


# -------------------------- forward (weight folding) ------------------------ #

def _fold_bn(w_oihw, bn, eps=1e-5):
    gamma, beta, mean, var = bn
    s = gamma / jnp.sqrt(var + eps)
    return w_oihw * s[:, None, None, None], beta - mean * s


def mbconv_forward(params, x_nchw, *, inp, oup, stride, expand_ratio, use_se):
    """Pallas MBConv forward; NCHW in / NCHW out (matches the PyTorch module)."""
    hidden = int(round(inp * expand_ratio))
    identity = (stride == 1 and inp == oup)
    x = jnp.transpose(x_nchw, (0, 2, 3, 1)).astype(jnp.float32)   # NHWC

    if use_se:
        w1, b1 = _fold_bn(params["w_exp"], params["bn1"])     # (hid, inp, 1, 1)
        wd, bd = _fold_bn(params["w_dw"], params["bn2"])      # (hid, 1, 3, 3)
        w3, b3 = _fold_bn(params["w_proj"], params["bn3"])    # (oup, hid, 1, 1)
        w1 = w1[:, :, 0, 0].T                                  # (inp, hid)
        wd = jnp.transpose(wd[:, 0], (1, 2, 0)).reshape(9, hidden)
        w3 = w3[:, :, 0, 0].T                                  # (hid, oup)
        out = _mbconv_se_pallas(
            x,
            w1.astype(jnp.bfloat16), b1.reshape(1, -1),
            wd, bd.reshape(1, -1),
            params["w_se1"].T, params["b_se1"].reshape(1, -1),
            params["w_se2"].T, params["b_se2"].reshape(1, -1),
            w3.astype(jnp.bfloat16), b3.reshape(1, -1),
            stride=stride, identity=identity)
    else:
        w1, b1 = _fold_bn(params["w_exp"], params["bn1"])     # (hid, inp, 3, 3)
        w3, b3 = _fold_bn(params["w_proj"], params["bn2"])    # (oup, hid, 1, 1)
        w1 = jnp.transpose(w1, (2, 3, 1, 0)).reshape(9, inp, hidden)
        w3 = w3[:, :, 0, 0].T
        out = _mbconv_plain_pallas(
            x,
            w1.astype(jnp.bfloat16), b1.reshape(1, -1),
            w3.astype(jnp.bfloat16), b3.reshape(1, -1),
            stride=stride, identity=identity)
    return jnp.transpose(out, (0, 3, 1, 2))                   # back to NCHW


# ------------------------------ pure-JAX reference -------------------------- #

def _bn_nchw(x, bn, eps=1e-5):
    gamma, beta, mean, var = bn
    s = gamma / jnp.sqrt(var + eps)
    return x * s[None, :, None, None] + (beta - mean * s)[None, :, None, None]


def mbconv_reference(params, x, *, inp, oup, stride, expand_ratio, use_se):
    hidden = int(round(inp * expand_ratio))
    dn = ("NCHW", "OIHW", "NCHW")
    if use_se:
        h = lax.conv_general_dilated(x, params["w_exp"], (1, 1), "VALID",
                                     dimension_numbers=dn)
        h = _bn_nchw(h, params["bn1"]); h = h * jax.nn.sigmoid(h)
        h = lax.conv_general_dilated(h, params["w_dw"], (stride, stride),
                                     ((1, 1), (1, 1)), dimension_numbers=dn,
                                     feature_group_count=hidden)
        h = _bn_nchw(h, params["bn2"]); h = h * jax.nn.sigmoid(h)
        y = jnp.mean(h, axis=(2, 3))
        y = y @ params["w_se1"].T + params["b_se1"]
        y = y * jax.nn.sigmoid(y)
        y = y @ params["w_se2"].T + params["b_se2"]
        y = jax.nn.sigmoid(y)
        h = h * y[:, :, None, None]
        h = lax.conv_general_dilated(h, params["w_proj"], (1, 1), "VALID",
                                     dimension_numbers=dn)
        h = _bn_nchw(h, params["bn3"])
    else:
        h = lax.conv_general_dilated(x, params["w_exp"], (stride, stride),
                                     ((1, 1), (1, 1)), dimension_numbers=dn)
        h = _bn_nchw(h, params["bn1"]); h = h * jax.nn.sigmoid(h)
        h = lax.conv_general_dilated(h, params["w_proj"], (1, 1), "VALID",
                                     dimension_numbers=dn)
        h = _bn_nchw(h, params["bn2"])
    if stride == 1 and inp == oup:
        h = h + x
    return h


# --------------------------------- params ----------------------------------- #

def init_mbconv_params(key, *, inp, oup, stride, expand_ratio, use_se):
    hidden = int(round(inp * expand_ratio))
    keys = iter(jax.random.split(key, 24))

    def conv_w(shape):
        fan_in = shape[1] * shape[2] * shape[3]
        return jax.random.normal(next(keys), shape, jnp.float32) / jnp.sqrt(fan_in)

    def bn(c):
        return (1.0 + 0.1 * jax.random.normal(next(keys), (c,), jnp.float32),
                0.1 * jax.random.normal(next(keys), (c,), jnp.float32),
                0.1 * jax.random.normal(next(keys), (c,), jnp.float32),
                0.5 + 0.2 * jnp.abs(jax.random.normal(next(keys), (c,), jnp.float32)))

    p = {}
    if use_se:
        sq = _make_divisible(inp // 4, 8)
        p["w_exp"] = conv_w((hidden, inp, 1, 1)); p["bn1"] = bn(hidden)
        p["w_dw"] = conv_w((hidden, 1, 3, 3)); p["bn2"] = bn(hidden)
        p["w_se1"] = jax.random.normal(next(keys), (sq, hidden), jnp.float32) / jnp.sqrt(hidden)
        p["b_se1"] = 0.05 * jax.random.normal(next(keys), (sq,), jnp.float32)
        p["w_se2"] = jax.random.normal(next(keys), (hidden, sq), jnp.float32) / jnp.sqrt(sq)
        p["b_se2"] = 0.05 * jax.random.normal(next(keys), (hidden,), jnp.float32)
        p["w_proj"] = conv_w((oup, hidden, 1, 1)); p["bn3"] = bn(oup)
    else:
        p["w_exp"] = conv_w((hidden, inp, 3, 3)); p["bn1"] = bn(hidden)
        p["w_proj"] = conv_w((oup, hidden, 1, 1)); p["bn2"] = bn(oup)
    return p


if __name__ == "__main__":
    key = jax.random.PRNGKey(0)
    B, C_IN, H, W = 2, 32, 16, 16

    # Config A: identity MBConv with SE (stride=1, inp==oup, hidden=128).
    cfg_se = dict(inp=C_IN, oup=32, stride=1, expand_ratio=4, use_se=True)
    # Config B: plain MBConv without SE, channel-changing (no residual).
    cfg_plain = dict(inp=C_IN, oup=48, stride=1, expand_ratio=4, use_se=False)

    key, kse, kpl, kx = jax.random.split(key, 4)
    p_se = init_mbconv_params(kse, **cfg_se)
    p_pl = init_mbconv_params(kpl, **cfg_plain)
    x = jax.random.normal(kx, (B, C_IN, H, W), jnp.float32)

    fwd_se = jax.jit(functools.partial(mbconv_forward, **cfg_se))
    fwd_pl = jax.jit(functools.partial(mbconv_forward, **cfg_plain))

    out_se = jax.block_until_ready(fwd_se(p_se, x))
    out_pl = jax.block_until_ready(fwd_pl(p_pl, x))

    ref_se = mbconv_reference(p_se, x, **cfg_se)
    ref_pl = mbconv_reference(p_pl, x, **cfg_plain)

    assert out_se.shape == (B, 32, H, W)
    assert out_pl.shape == (B, 48, H, W)
    for o, r in ((out_se, ref_se), (out_pl, ref_pl)):
        assert bool(jnp.all(jnp.isfinite(o)))
        err = float(jnp.max(jnp.abs(o - r)))
        assert bool(jnp.allclose(o, r, rtol=5e-2, atol=5e-2)), err

    print("KERNEL_OK")
</pallas_src>

<mosaic_0001>
module attributes {stable_mosaic.version = 11 : i64} {
  func.func @_mbconv_se_kernel(%arg0: i32, %arg1: memref<1x16x16x32xf32, #tpu.memory_space<vmem>>, %arg2: memref<32x128xbf16, #tpu.memory_space<vmem>>, %arg3: memref<1x128xf32, #tpu.memory_space<vmem>>, %arg4: memref<9x128xf32, #tpu.memory_space<vmem>>, %arg5: memref<1x128xf32, #tpu.memory_space<vmem>>, %arg6: memref<128x8xf32, #tpu.memory_space<vmem>>, %arg7: memref<1x8xf32, #tpu.memory_space<vmem>>, %arg8: memref<8x128xf32, #tpu.memory_space<vmem>>, %arg9: memref<1x128xf32, #tpu.memory_space<vmem>>, %arg10: memref<128x32xbf16, #tpu.memory_space<vmem>>, %arg11: memref<1x32xf32, #tpu.memory_space<vmem>>, %arg12: memref<1x16x16x32xf32, #tpu.memory_space<vmem>>, %arg13: memref<18x18x128xf32, #tpu.memory_space<vmem>>) attributes {dimension_semantics = [#tpu.dimension_semantics<parallel>], iteration_bounds = array<i64: 2>, scalar_prefetch = 0 : i64, scratch_operands = 1 : i64, tpu.core_type = #tpu.core_type<tc>, window_params = [{transform_indices = @transform_0, window_bounds = array<i64: 1, 16, 16, 32>}, {pipeline_mode = #tpu.pipeline_mode<synchronous>, transform_indices = @transform_1, window_bounds = array<i64: 32, 128>}, {pipeline_mode = #tpu.pipeline_mode<synchronous>, transform_indices = @transform_2, window_bounds = array<i64: 1, 128>}, {pipeline_mode = #tpu.pipeline_mode<synchronous>, transform_indices = @transform_3, window_bounds = array<i64: 9, 128>}, {pipeline_mode = #tpu.pipeline_mode<synchronous>, transform_indices = @transform_4, window_bounds = array<i64: 1, 128>}, {pipeline_mode = #tpu.pipeline_mode<synchronous>, transform_indices = @transform_5, window_bounds = array<i64: 128, 8>}, {pipeline_mode = #tpu.pipeline_mode<synchronous>, transform_indices = @transform_6, window_bounds = array<i64: 1, 8>}, {pipeline_mode = #tpu.pipeline_mode<synchronous>, transform_indices = @transform_7, window_bounds = array<i64: 8, 128>}, {pipeline_mode = #tpu.pipeline_mode<synchronous>, transform_indices = @transform_8, window_bounds = array<i64: 1, 128>}, {pipeline_mode = #tpu.pipeline_mode<synchronous>, transform_indices = @transform_9, window_bounds = array<i64: 128, 32>}, {pipeline_mode = #tpu.pipeline_mode<synchronous>, transform_indices = @transform_10, window_bounds = array<i64: 1, 32>}, {transform_indices = @transform_11, window_bounds = array<i64: 1, 16, 16, 32>}]} {
    %c0 = arith.constant 0 : index
    %c0_0 = arith.constant 0 : index
    %c0_1 = arith.constant 0 : index
    %c0_2 = arith.constant 0 : index
    %0 = vector.load %arg1[%c0, %c0_0, %c0_1, %c0_2] : memref<1x16x16x32xf32, #tpu.memory_space<vmem>>, vector<1x16x16x32xf32>
    %1 = vector.shape_cast %0 : vector<1x16x16x32xf32> to vector<256x32xf32>
    %2 = arith.truncf %1 : vector<256x32xf32> to vector<256x32xbf16>
    %c0_3 = arith.constant 0 : index
    %c0_4 = arith.constant 0 : index
    %3 = vector.load %arg2[%c0_3, %c0_4] : memref<32x128xbf16, #tpu.memory_space<vmem>>, vector<32x128xbf16>
    %cst = arith.constant dense<0.000000e+00> : vector<256x128xf32>
    %4 = tpu.matmul %2, %3, %cst {dimension_numbers = #tpu.dot_dimension_numbers<[1], [0], [0], [1], [0, 0, 1, 1], [], []>} : vector<256x32xbf16>, vector<32x128xbf16>, vector<256x128xf32> -> vector<256x128xf32>
    %c0_5 = arith.constant 0 : index
    %c0_6 = arith.constant 0 : index
    %5 = vector.load %arg3[%c0_5, %c0_6] : memref<1x128xf32, #tpu.memory_space<vmem>>, vector<1x128xf32>
    %6 = vector.broadcast %5 : vector<1x128xf32> to vector<256x128xf32>
    %7 = arith.addf %4, %6 : vector<256x128xf32>
    %cst_7 = arith.constant 0.000000e+00 : f32
    %8 = vector.broadcast %cst_7 : f32 to vector<256x128xf32>
    %9 = arith.subf %8, %7 : vector<256x128xf32>
    %10 = math.exp %9 : vector<256x128xf32>
    %cst_8 = arith.constant 1.000000e+00 : f32
    %11 = vector.broadcast %cst_8 : f32 to vector<256x128xf32>
    %12 = arith.addf %11, %10 : vector<256x128xf32>
    %cst_9 = arith.constant 1.000000e+00 : f32
    %13 = vector.broadcast %cst_9 : f32 to vector<256x128xf32>
    %14 = arith.divf %13, %12 : vector<256x128xf32>
    %15 = arith.mulf %7, %14 : vector<256x128xf32>
    %cst_10 = arith.constant 0.000000e+00 : f32
    %16 = vector.broadcast %cst_10 : f32 to vector<18x18x128xf32>
    %c0_11 = arith.constant 0 : index
    %c0_12 = arith.constant 0 : index
    %c0_13 = arith.constant 0 : index
    %17 = vector.load %arg13[%c0_11, %c0_12, %c0_13] : memref<18x18x128xf32, #tpu.memory_space<vmem>>, vector<18x18x128xf32>
    tpu.vector_store %arg13[%c0_11, %c0_12, %c0_13], %16 {strides = array<i32>} : memref<18x18x128xf32, #tpu.memory_space<vmem>>, vector<18x18x128xf32>,
    %18 = vector.shape_cast %15 : vector<256x128xf32> to vector<16x16x128xf32>
    %c1 = arith.constant 1 : index
    %c1_14 = arith.constant 1 : index
    %c0_15 = arith.constant 0 : index
    %19 = vector.load %arg13[%c1, %c1_14, %c0_15] : memref<18x18x128xf32, #tpu.memory_space<vmem>>, vector<16x16x128xf32>
    tpu.vector_store %arg13[%c1, %c1_14, %c0_15], %18 {strides = array<i32>} : memref<18x18x128xf32, #tpu.memory_space<vmem>>, vector<16x16x128xf32>,
    %c0_16 = arith.constant 0 : index
    %c0_17 = arith.constant 0 : index
    %20 = vector.load %arg4[%c0_16, %c0_17] : memref<9x128xf32, #tpu.memory_space<vmem>>, vector<9x128xf32>
    %cst_18 = arith.constant 0.000000e+00 : f32
    %21 = vector.broadcast %cst_18 : f32 to vector<16x16x128xf32>
    %c0_19 = arith.constant 0 : index
    %c0_20 = arith.constant 0 : index
    %c0_21 = arith.constant 0 : index
    %22 = vector.load %arg13[%c0_19, %c0_20, %c0_21] : memref<18x18x128xf32, #tpu.memory_space<vmem>>, vector<16x16x128xf32>
    %23 = vector.extract_strided_slice %20 {offsets = [0, 0], sizes = [1, 128], strides = [1, 1]} : vector<9x128xf32> to vector<1x128xf32>
    %24 = vector.shape_cast %23 : vector<1x128xf32> to vector<1x1x128xf32>
    %25 = vector.broadcast %24 : vector<1x1x128xf32> to vector<16x16x128xf32>
    %26 = arith.mulf %22, %25 : vector<16x16x128xf32>
    %27 = arith.addf %21, %26 : vector<16x16x128xf32>
    %c0_22 = arith.constant 0 : index
    %c1_23 = arith.constant 1 : index
    %c0_24 = arith.constant 0 : index
    %28 = vector.load %arg13[%c0_22, %c1_23, %c0_24] : memref<18x18x128xf32, #tpu.memory_space<vmem>>, vector<16x16x128xf32>
    %29 = vector.extract_strided_slice %20 {offsets = [1, 0], sizes = [1, 128], strides = [1, 1]} : vector<9x128xf32> to vector<1x128xf32>
    %30 = vector.shape_cast %29 : vector<1x128xf32> to vector<1x1x128xf32>
    %31 = vector.broadcast %30 : vector<1x1x128xf32> to vector<16x16x128xf32>
    %32 = arith.mulf %28, %31 : vector<16x16x128xf32>
    %33 = arith.addf %27, %32 : vector<16x16x128xf32>
    %c0_25 = arith.constant 0 : index
    %c2 = arith.constant 2 : index
    %c0_26 = arith.constant 0 : index
    %34 = vector.load %arg13[%c0_25, %c2, %c0_26] : memref<18x18x128xf32, #tpu.memory_space<vmem>>, vector<16x16x128xf32>
    %35 = vector.extract_strided_slice %20 {offsets = [2, 0], sizes = [1, 128], strides = [1, 1]} : vector<9x128xf32> to vector<1x128xf32>
    %36 = vector.shape_cast %35 : vector<1x128xf32> to vector<1x1x128xf32>
    %37 = vector.broadcast %36 : vector<1x1x128xf32> to vector<16x16x128xf32>
    %38 = arith.mulf %34, %37 : vector<16x16x128xf32>
    %39 = arith.addf %33, %38 : vector<16x16x128xf32>
    %c1_27 = arith.constant 1 : index
    %c0_28 = arith.constant 0 : index
    %c0_29 = arith.constant 0 : index
    %40 = vector.load %arg13[%c1_27, %c0_28, %c0_29] : memref<18x18x128xf32, #tpu.memory_space<vmem>>, vector<16x16x128xf32>
    %41 = vector.extract_strided_slice %20 {offsets = [3, 0], sizes = [1, 128], strides = [1, 1]} : vector<9x128xf32> to vector<1x128xf32>
    %42 = vector.shape_cast %41 : vector<1x128xf32> to vector<1x1x128xf32>
    %43 = vector.broadcast %42 : vector<1x1x128xf32> to vector<16x16x128xf32>
    %44 = arith.mulf %40, %43 : vector<16x16x128xf32>
    %45 = arith.addf %39, %44 : vector<16x16x128xf32>
    %c1_30 = arith.constant 1 : index
    %c1_31 = arith.constant 1 : index
    %c0_32 = arith.constant 0 : index
    %46 = vector.load %arg13[%c1_30, %c1_31, %c0_32] : memref<18x18x128xf32, #tpu.memory_space<vmem>>, vector<16x16x128xf32>
    %47 = vector.extract_strided_slice %20 {offsets = [4, 0], sizes = [1, 128], strides = [1, 1]} : vector<9x128xf32> to vector<1x128xf32>
    %48 = vector.shape_cast %47 : vector<1x128xf32> to vector<1x1x128xf32>
    %49 = vector.broadcast %48 : vector<1x1x128xf32> to vector<16x16x128xf32>
    %50 = arith.mulf %46, %49 : vector<16x16x128xf32>
    %51 = arith.addf %45, %50 : vector<16x16x128xf32>
    %c1_33 = arith.constant 1 : index
    %c2_34 = arith.constant 2 : index
    %c0_35 = arith.constant 0 : index
    %52 = vector.load %arg13[%c1_33, %c2_34, %c0_35] : memref<18x18x128xf32, #tpu.memory_space<vmem>>, vector<16x16x128xf32>
    %53 = vector.extract_strided_slice %20 {offsets = [5, 0], sizes = [1, 128], strides = [1, 1]} : vector<9x128xf32> to vector<1x128xf32>
    %54 = vector.shape_cast %53 : vector<1x128xf32> to vector<1x1x128xf32>
    %55 = vector.broadcast %54 : vector<1x1x128xf32> to vector<16x16x128xf32>
    %56 = arith.mulf %52, %55 : vector<16x16x128xf32>
    %57 = arith.addf %51, %56 : vector<16x16x128xf32>
    %c2_36 = arith.constant 2 : index
    %c0_37 = arith.constant 0 : index
    %c0_38 = arith.constant 0 : index
    %58 = vector.load %arg13[%c2_36, %c0_37, %c0_38] : memref<18x18x128xf32, #tpu.memory_space<vmem>>, vector<16x16x128xf32>
    %59 = vector.extract_strided_slice %20 {offsets = [6, 0], sizes = [1, 128], strides = [1, 1]} : vector<9x128xf32> to vector<1x128xf32>
    %60 = vector.shape_cast %59 : vector<1x128xf32> to vector<1x1x128xf32>
    %61 = vector.broadcast %60 : vector<1x1x128xf32> to vector<16x16x128xf32>
    %62 = arith.mulf %58, %61 : vector<16x16x128xf32>
    %63 = arith.addf %57, %62 : vector<16x16x128xf32>
    %c2_39 = arith.constant 2 : index
    %c1_40 = arith.constant 1 : index
    %c0_41 = arith.constant 0 : index
    %64 = vector.load %arg13[%c2_39, %c1_40, %c0_41] : memref<18x18x128xf32, #tpu.memory_space<vmem>>, vector<16x16x128xf32>
    %65 = vector.extract_strided_slice %20 {offsets = [7, 0], sizes = [1, 128], strides = [1, 1]} : vector<9x128xf32> to vector<1x128xf32>
    %66 = vector.shape_cast %65 : vector<1x128xf32> to vector<1x1x128xf32>
    %67 = vector.broadcast %66 : vector<1x1x128xf32> to vector<16x16x128xf32>
    %68 = arith.mulf %64, %67 : vector<16x16x128xf32>
    %69 = arith.addf %63, %68 : vector<16x16x128xf32>
    %c2_42 = arith.constant 2 : index
    %c2_43 = arith.constant 2 : index
    %c0_44 = arith.constant 0 : index
    %70 = vector.load %arg13[%c2_42, %c2_43, %c0_44] : memref<18x18x128xf32, #tpu.memory_space<vmem>>, vector<16x16x128xf32>
    %71 = vector.extract_strided_slice %20 {offsets = [8, 0], sizes = [1, 128], strides = [1, 1]} : vector<9x128xf32> to vector<1x128xf32>
    %72 = vector.shape_cast %71 : vector<1x128xf32> to vector<1x1x128xf32>
    %73 = vector.broadcast %72 : vector<1x1x128xf32> to vector<16x16x128xf32>
    %74 = arith.mulf %70, %73 : vector<16x16x128xf32>
    %75 = arith.addf %69, %74 : vector<16x16x128xf32>
    %c0_45 = arith.constant 0 : index
    %c0_46 = arith.constant 0 : index
    %76 = vector.load %arg5[%c0_45, %c0_46] : memref<1x128xf32, #tpu.memory_space<vmem>>, vector<1x128xf32>
    %77 = vector.shape_cast %76 : vector<1x128xf32> to vector<1x1x128xf32>
    %78 = vector.broadcast %77 : vector<1x1x128xf32> to vector<16x16x128xf32>
    %79 = arith.addf %75, %78 : vector<16x16x128xf32>
    %cst_47 = arith.constant 0.000000e+00 : f32
    %80 = vector.broadcast %cst_47 : f32 to vector<16x16x128xf32>
    %81 = arith.subf %80, %79 : vector<16x16x128xf32>
    %82 = math.exp %81 : vector<16x16x128xf32>
    %cst_48 = arith.constant 1.000000e+00 : f32
    %83 = vector.broadcast %cst_48 : f32 to vector<16x16x128xf32>
    %84 = arith.addf %83, %82 : vector<16x16x128xf32>
    %cst_49 = arith.constant 1.000000e+00 : f32
    %85 = vector.broadcast %cst_49 : f32 to vector<16x16x128xf32>
    %86 = arith.divf %85, %84 : vector<16x16x128xf32>
    %87 = arith.mulf %79, %86 : vector<16x16x128xf32>
    %88 = vector.shape_cast %87 : vector<16x16x128xf32> to vector<256x128xf32>
    %cst_50 = arith.constant dense<0.000000e+00> : vector<128xf32>
    %89 = vector.multi_reduction <add>, %88, %cst_50 [0] : vector<256x128xf32> to vector<128xf32>
    %90 = vector.shape_cast %89 : vector<128xf32> to vector<1x128xf32>
    %cst_51 = arith.constant 2.560000e+02 : f32
    %91 = vector.broadcast %cst_51 : f32 to vector<1x128xf32>
    %92 = arith.divf %90, %91 : vector<1x128xf32>
    %c0_52 = arith.constant 0 : index
    %c0_53 = arith.constant 0 : index
    %93 = vector.load %arg6[%c0_52, %c0_53] : memref<128x8xf32, #tpu.memory_space<vmem>>, vector<128x8xf32>
    %cst_54 = arith.constant dense<0.000000e+00> : vector<1x8xf32>
    %94 = tpu.matmul %92, %93, %cst_54 {dimension_numbers = #tpu.dot_dimension_numbers<[1], [0], [0], [1], [0, 0, 1, 1], [], []>} : vector<1x128xf32>, vector<128x8xf32>, vector<1x8xf32> -> vector<1x8xf32>
    %c0_55 = arith.constant 0 : index
    %c0_56 = arith.constant 0 : index
    %95 = vector.load %arg7[%c0_55, %c0_56] : memref<1x8xf32, #tpu.memory_space<vmem>>, vector<1x8xf32>
    %96 = arith.addf %94, %95 : vector<1x8xf32>
    %cst_57 = arith.constant 0.000000e+00 : f32
    %97 = vector.broadcast %cst_57 : f32 to vector<1x8xf32>
    %98 = arith.subf %97, %96 : vector<1x8xf32>
    %99 = math.exp %98 : vector<1x8xf32>
    %cst_58 = arith.constant 1.000000e+00 : f32
    %100 = vector.broadcast %cst_58 : f32 to vector<1x8xf32>
    %101 = arith.addf %100, %99 : vector<1x8xf32>
    %cst_59 = arith.constant 1.000000e+00 : f32
    %102 = vector.broadcast %cst_59 : f32 to vector<1x8xf32>
    %103 = arith.divf %102, %101 : vector<1x8xf32>
    %104 = arith.mulf %96, %103 : vector<1x8xf32>
    %c0_60 = arith.constant 0 : index
    %c0_61 = arith.constant 0 : index
    %105 = vector.load %arg8[%c0_60, %c0_61] : memref<8x128xf32, #tpu.memory_space<vmem>>, vector<8x128xf32>
    %cst_62 = arith.constant dense<0.000000e+00> : vector<1x128xf32>
    %106 = tpu.matmul %104, %105, %cst_62 {dimension_numbers = #tpu.dot_dimension_numbers<[1], [0], [0], [1], [0, 0, 1, 1], [], []>} : vector<1x8xf32>, vector<8x128xf32>, vector<1x128xf32> -> vector<1x128xf32>
    %c0_63 = arith.constant 0 : index
    %c0_64 = arith.constant 0 : index
    %107 = vector.load %arg9[%c0_63, %c0_64] : memref<1x128xf32, #tpu.memory_space<vmem>>, vector<1x128xf32>
    %108 = arith.addf %106, %107 : vector<1x128xf32>
    %cst_65 = arith.constant 0.000000e+00 : f32
    %109 = vector.broadcast %cst_65 : f32 to vector<1x128xf32>
    %110 = arith.subf %109, %108 : vector<1x128xf32>
    %111 = math.exp %110 : vector<1x128xf32>
    %cst_66 = arith.constant 1.000000e+00 : f32
    %112 = vector.broadcast %cst_66 : f32 to vector<1x128xf32>
    %113 = arith.addf %112, %111 : vector<1x128xf32>
    %cst_67 = arith.constant 1.000000e+00 : f32
    %114 = vector.broadcast %cst_67 : f32 to vector<1x128xf32>
    %115 = arith.divf %114, %113 : vector<1x128xf32>
    %116 = vector.broadcast %115 : vector<1x128xf32> to vector<256x128xf32>
    %117 = arith.mulf %88, %116 : vector<256x128xf32>
    %118 = arith.truncf %117 : vector<256x128xf32> to vector<256x128xbf16>
    %c0_68 = arith.constant 0 : index
    %c0_69 = arith.constant 0 : index
    %119 = vector.load %arg10[%c0_68, %c0_69] : memref<128x32xbf16, #tpu.memory_space<vmem>>, vector<128x32xbf16>
    %cst_70 = arith.constant dense<0.000000e+00> : vector<256x32xf32>
    %120 = tpu.matmul %118, %119, %cst_70 {dimension_numbers = #tpu.dot_dimension_numbers<[1], [0], [0], [1], [0, 0, 1, 1], [], []>} : vector<256x128xbf16>, vector<128x32xbf16>, vector<256x32xf32> -> vector<256x32xf32>
    %c0_71 = arith.constant 0 : index
    %c0_72 = arith.constant 0 : index
    %121 = vector.load %arg11[%c0_71, %c0_72] : memref<1x32xf32, #tpu.memory_space<vmem>>, vector<1x32xf32>
    %122 = vector.broadcast %121 : vector<1x32xf32> to vector<256x32xf32>
    %123 = arith.addf %120, %122 : vector<256x32xf32>
    %124 = arith.addf %123, %1 : vector<256x32xf32>
    %125 = vector.shape_cast %124 : vector<256x32xf32> to vector<1x16x16x32xf32>
    %c0_73 = arith.constant 0 : index
    %c0_74 = arith.constant 0 : index
    %c0_75 = arith.constant 0 : index
    %c0_76 = arith.constant 0 : index
    %126 = vector.load %arg12[%c0_73, %c0_74, %c0_75, %c0_76] : memref<1x16x16x32xf32, #tpu.memory_space<vmem>>, vector<1x16x16x32xf32>
    tpu.vector_store %arg12[%c0_73, %c0_74, %c0_75, %c0_76], %125 {strides = array<i32>} : memref<1x16x16x32xf32, #tpu.memory_space<vmem>>, vector<1x16x16x32xf32>,
    return
  }
  func.func @transform_0(%arg0: i32) -> (i32, i32, i32, i32) {
    %c0_i32 = arith.constant 0 : i32
    %c0_i32_0 = arith.constant 0 : i32
    %c0_i32_1 = arith.constant 0 : i32
    %c0_i32_2 = arith.constant 0 : i32
    return %arg0, %c0_i32, %c0_i32_0, %c0_i32_1 : i32, i32, i32, i32
  }
  func.func @transform_1(%arg0: i32) -> (i32, i32) {
    %c0_i32 = arith.constant 0 : i32
    %c0_i32_0 = arith.constant 0 : i32
    %c0_i32_1 = arith.constant 0 : i32
    return %c0_i32, %c0_i32_0 : i32, i32
  }
  func.func @transform_2(%arg0: i32) -> (i32, i32) {
    %c0_i32 = arith.constant 0 : i32
    %c0_i32_0 = arith.constant 0 : i32
    %c0_i32_1 = arith.constant 0 : i32
    return %c0_i32, %c0_i32_0 : i32, i32
  }
  func.func @transform_3(%arg0: i32) -> (i32, i32) {
    %c0_i32 = arith.constant 0 : i32
    %c0_i32_0 = arith.constant 0 : i32
    %c0_i32_1 = arith.constant 0 : i32
    return %c0_i32, %c0_i32_0 : i32, i32
  }
  func.func @transform_4(%arg0: i32) -> (i32, i32) {
    %c0_i32 = arith.constant 0 : i32
    %c0_i32_0 = arith.constant 0 : i32
    %c0_i32_1 = arith.constant 0 : i32
    return %c0_i32, %c0_i32_0 : i32, i32
  }
  func.func @transform_5(%arg0: i32) -> (i32, i32) {
    %c0_i32 = arith.constant 0 : i32
    %c0_i32_0 = arith.constant 0 : i32
    %c0_i32_1 = arith.constant 0 : i32
    return %c0_i32, %c0_i32_0 : i32, i32
  }
  func.func @transform_6(%arg0: i32) -> (i32, i32) {
    %c0_i32 = arith.constant 0 : i32
    %c0_i32_0 = arith.constant 0 : i32
    %c0_i32_1 = arith.constant 0 : i32
    return %c0_i32, %c0_i32_0 : i32, i32
  }
  func.func @transform_7(%arg0: i32) -> (i32, i32) {
    %c0_i32 = arith.constant 0 : i32
    %c0_i32_0 = arith.constant 0 : i32
    %c0_i32_1 = arith.constant 0 : i32
    return %c0_i32, %c0_i32_0 : i32, i32
  }
  func.func @transform_8(%arg0: i32) -> (i32, i32) {
    %c0_i32 = arith.constant 0 : i32
    %c0_i32_0 = arith.constant 0 : i32
    %c0_i32_1 = arith.constant 0 : i32
    return %c0_i32, %c0_i32_0 : i32, i32
  }
  func.func @transform_9(%arg0: i32) -> (i32, i32) {
    %c0_i32 = arith.constant 0 : i32
    %c0_i32_0 = arith.constant 0 : i32
    %c0_i32_1 = arith.constant 0 : i32
    return %c0_i32, %c0_i32_0 : i32, i32
  }
  func.func @transform_10(%arg0: i32) -> (i32, i32) {
    %c0_i32 = arith.constant 0 : i32
    %c0_i32_0 = arith.constant 0 : i32
    %c0_i32_1 = arith.constant 0 : i32
    return %c0_i32, %c0_i32_0 : i32, i32
  }
  func.func @transform_11(%arg0: i32) -> (i32, i32, i32, i32) {
    %c0_i32 = arith.constant 0 : i32
    %c0_i32_0 = arith.constant 0 : i32
    %c0_i32_1 = arith.constant 0 : i32
    %c0_i32_2 = arith.constant 0 : i32
    return %arg0, %c0_i32, %c0_i32_0, %c0_i32_1 : i32, i32, i32, i32
  }
}

</mosaic_0001>

<bundles_post_ra>
// kernel: mbconv_forward.1
= control target key start
LH: loop header
LB: loop body
LE: loop exit
PB: predicated region body
PF: predicated region fallthrough
CT: control target
= control target key end

     0   :  { %16 = vsyncpa [#allocation4], 0  ;;  %s5246_s0 = inlined_call_operand.vmem [shape: f32[2,16,16,32], index: 0, kind: input, shape index: {}]   ;;  %s5247_s1 = inlined_call_operand.vmem [shape: bf16[32,128], index: 1, kind: input, shape index: {}]   ;;  %s5248_s2 = inlined_call_operand.vmem [shape: f32[1,128], index: 2, kind: input, shape index: {}]   ;;  %s5249_s3 = inlined_call_operand.vmem [shape: f32[9,128], index: 3, kind: input, shape index: {}]   ;;  %s5250_s4 = inlined_call_operand.vmem [shape: f32[1,128], index: 4, kind: input, shape index: {}]   ;;  %s5251_s5 = inlined_call_operand.vmem [shape: f32[128,8], index: 5, kind: input, shape index: {}]   ;;  %s5252_s6 = inlined_call_operand.vmem [shape: f32[1,8], index: 6, kind: input, shape index: {}]   ;;  %s5253_s7 = inlined_call_operand.vmem [shape: f32[8,128], index: 7, kind: input, shape index: {}]   ;;  %s5254_s8 = inlined_call_operand.vmem [shape: f32[1,128], index: 8, kind: input, shape index: {}]   ;;  %s5255_s9 = inlined_call_operand.vmem [shape: bf16[128,32], index: 9, kind: input, shape index: {}]   ;;  %s5256_s10 = inlined_call_operand.vmem [shape: f32[1,32], index: 10, kind: input, shape index: {}]   ;;  %s5257_s11 = inlined_call_operand.hbm [shape: f32[2,16,16,32], index: 11, kind: output, shape index: {}]  }
   0x1   :  { %18 = vsyncpa [#allocation4 + $0x1], 0  ;;  %s3522_s17 = smov 0   ;;  %s3524_s18 = smov 0  }
   0x2   :  { %s3526_s19 = smov 0   ;;  %s3528_s20 = smov 0  }
   0x3 LB: > { %s3543_s21 = sadd.s32 4294967295, %s3454_s20   ;;  %s2783_s22 = sadd.s32 4294967294, %s3454_s20   ;;  %s3454_s20 = sphi %s3528_s20, %s5415_s20   ;;  %s3450_s19 = sphi %s3526_s19, %s5414_s19   ;;  %s3446_s18 = sphi %s3524_s18, %s5413_s18   ;;  %s3442_s17 = sphi %s3522_s17, %s5412_s17  }
   0x4   : > { %s3547_s23 = sadd.s32 1, %s3454_s20   ;;  %s267_s24 = sadd.s32 1, %s3450_s19 }
   0x5   : > { %s264_s25 = ssub.s32 %s3454_s20, %s3547_s23  ;;  %p277_p0 = scmp.ne.s32.totalorder %s3450_s19, %s3446_s18 }
   0x6   : > { %p265_p1 = scmp.eq.s32.totalorder %s264_s25, 0  ;;  %p278_p2 = scmp.eq.s32.totalorder %s3543_s21, 1 }
   0x7   : > { %p283_p3 = scmp.ne.s32.totalorder %s3446_s18, %s3442_s17  ;;  %p284_p4 = scmp.eq.s32.totalorder %s2783_s22, 1 }
   0x8   : > { %s3558_s26 = scalar_select %p265_p1, %s3450_s19, %s267_s24  }
   0x9   : > { %p3560_p5 = por %p278_p2, %p277_p0  ;;  %p3564_p6 = por %p284_p4, %p283_p3 }
   0xa   : > { %p2786_p7 = scmp.ge.s32.totalorder %s3454_s20, 1  ;;  %p340_p8 = scmp.lt.s32.totalorder %s3454_s20, 3 }
   0xc   : > { %p341_p9 = pnand %p2786_p7, %p340_p8 }
   0xe   : > { %344 = sbr.rel (%p341_p9) target bundleno = 1342 (0x53e), region = 64 }
  0x15   : > { %v3081_v0 = vld [vmem:[%s5247_s1] sm:$0xff]   ;;  %p380_p10 = scmp.lt.s32.totalorder %s3543_s21, 1  ;;  %v3082_v1 = vld [vmem:[%s5247_s1 + $0x8] sm:$0xff]   ;;  %vm457_vm0 = vcmask 261120   ;;  %v3456_v50 = vmov 0.0   ;;  %vm3458_vm1 = vmmov 0  }
  0x16   : > { %2889 = vmatprep.subr.bf16.mxu0 %v3081_v0  ;;  %897 = vst [vmem:[#allocation2 + $0x30] sm:$0xff] %v3456_v50  ;;  %898 = vst [vmem:[#allocation2 + $0x38] sm:$0xff] %v3456_v50  ;;  %v3634_v51 = vld [vmem:[%s5248_s2] ss:$0 sm:$0xff]  ;;  %vm2279_vm2 = vcmask 64512   ;;  %s377_s16 = sand.u32 1, %s3446_s18  }
  0x17   : > { %s381_s14 = scalar_select %p380_p10, %s3543_s21, 1  ;;  %2890 = vmatpush3.bf16.msra.mxu0 %v3081_v0  ;;  %891 = vst [vmem:[#allocation2] sm:$0xff] %v3456_v50  ;;  %892 = vst [vmem:[#allocation2 + $0x8] sm:$0xff] %v3456_v50 }
  0x18   : > { %2891 = vmatprep.subr.bf16.mxu0 %v3082_v1  ;;  %893 = vst [vmem:[#allocation2 + $0x10] sm:$0x3] %v3456_v50  ;;  %894 = vst [vmem:[#allocation2 + $0x18] sm:$0xff] %v3456_v50  ;;  %s2787_s29 = sshll.u32 %s377_s16, 8  ;;  %s2827_s12 = sshll.u32 %s3543_s21, 12 }
  0x19   : > { %s2826_s15 = sshll.u32 %s381_s14, 8  ;;  %895 = vst [vmem:[#allocation2 + $0x20] sm:$0xff] %v3456_v50  ;;  %896 = vst [vmem:[#allocation2 + $0x28] sm:$0x3] %v3456_v50  ;;  %s5070_s30 = scalar_lea.vmem [#allocation3], %s2787_s29 }
  0x1a   : > { %s3581_s24 = scalar_lea.vmem %s5246_s0, %s2826_s15  ;;  %899 = vst [vmem:[#allocation2 + $0x40] sm:$0x3] %v3456_v50  ;;  %900 = vst [vmem:[#allocation2 + $0x48] sm:$0xff] %v3456_v50  ;;  %s2721_s13 = sshll.u32 %s5070_s30, 4  ;;  %s5194_s13 = int_to_ptr.vmem [resolvable:$true] %s2721_s13 }
  0x1b   : > { %v386_v2 = vld [vmem:[%s3581_s24] sm:$0xff]  ;;  %v387_v3 = vld [vmem:[%s3581_s24 + $0x8] sm:$0xff]  ;;  %v388_v4 = vld [vmem:[%s3581_s24 + $0x10] sm:$0xff]  ;;  %2892 = vmatpush3.bf16.msra.mxu0 %v3082_v1  ;;  %901 = vst [vmem:[#allocation2 + $0x50] sm:$0xff] %v3456_v50  ;;  %s5192_s15 = scalar_lea.hbm %s5257_s11, %s2827_s12  ;;  %s5205_s22 = scalar_lea.sflag [#allocation4], %s377_s16 }
  0x1c   : > { %v418_v5 = vpack.c.bf16 %v387_v3, %v386_v2  ;;  %v389_v6 = vld [vmem:[%s3581_s24 + $0x18] sm:$0xff]  ;;  %v390_v7 = vld [vmem:[%s3581_s24 + $0x20] sm:$0xff]  ;;  %v391_v8 = vld [vmem:[%s3581_s24 + $0x28] sm:$0xff]  ;;  %902 = vst [vmem:[#allocation2 + $0x58] sm:$0x3] %v3456_v50  ;;  %s3392_s25 = scalar_lea.vmem %s5194_s13, 4096 }
  0x1d   : > { %v419_v9 = vpack.c.bf16 %v389_v6, %v388_v4  ;;  %v420_v10 = vpack.c.bf16 %v391_v8, %v390_v7  ;;  %v392_v11 = vld [vmem:[%s3581_s24 + $0x30] sm:$0xff]  ;;  %v393_v12 = vld [vmem:[%s3581_s24 + $0x38] sm:$0xff]  ;;  %v394_v13 = vld [vmem:[%s3581_s24 + $0x40] sm:$0xff]  ;;  %903 = vst [vmem:[#allocation2 + $0x60] sm:$0xff] %v3456_v50  ;;  %p3393_p11 = scmp.ne.s32.totalorder %s5194_s13, %s3392_s25  ;;  %s3459_s29 = smov [#allocation3]  }
  0x1e   : > { %2893 = vmatprep.mubr.msk.bf16.mxu0 %vm457_vm0, %v418_v5  ;;  %v395_v14 = vld [vmem:[%s3581_s24 + $0x48] sm:$0xff]  ;;  %v421_v15 = vpack.c.bf16 %v393_v12, %v392_v11  ;;  %v396_v17 = vld [vmem:[%s3581_s24 + $0x50] sm:$0xff]  ;;  %v397_v18 = vld [vmem:[%s3581_s24 + $0x58] sm:$0xff]  ;;  %904 = vst [vmem:[#allocation2 + $0x68] sm:$0xff] %v3456_v50  ;;  %v1012_v12 = vlaneseq  ;;  %s3396_s12 = sshll.u32 %s3459_s29, 4  ;;  %s3397_s12 = int_to_ptr.vmem [resolvable:$false] %s3396_s12 }
  0x1f   : > { %2894 = vmatmul.mubr.msk.bf16.vlgmr.msra.gmra.mrb[0].mxu0 %vm457_vm0, %v419_v9  ;;  %v422_v16 = vpack.c.bf16 %v395_v14, %v394_v13  ;;  %v398_v19 = vld [vmem:[%s3581_s24 + $0x60] sm:$0xff]  ;;  %v399_v20 = vld [vmem:[%s3581_s24 + $0x68] sm:$0xff]  ;;  %v423_v21 = vpack.c.bf16 %v397_v18, %v396_v17  ;;  %v400_v23 = vld [vmem:[%s3581_s24 + $0x70] sm:$0xff]  ;;  %905 = vst [vmem:[#allocation2 + $0x70] sm:$0x3] %v3456_v50  ;;  %p3394_p12 = pnand %p3393_p11, %p3560_p5  ;;  %s3398_s14 = scalar_lea.vmem %s3397_s12, 8192 }
  0x20   : > { %2897 = vmatprep.mubr.msk.bf16.mxu0 %vm457_vm0, %v420_v10  ;;  %v424_v22 = vpack.c.bf16 %v399_v20, %v398_v19  ;;  %v401_v24 = vld [vmem:[%s3581_s24 + $0x78] sm:$0xff]  ;;  %v402_v25 = vld [vmem:[%s3581_s24 + $0x80] sm:$0xff]  ;;  %v403_v26 = vld [vmem:[%s3581_s24 + $0x88] sm:$0xff]  ;;  %906 = vst [vmem:[#allocation2 + $0x78] sm:$0xff] %v3456_v50  ;;  %v3668_v20 = vshrl.u32 %v1012_v12, 7  ;;  %p3399_p0 = scmp.lt.s32.totalorder %s5194_s13, %s3397_s12  ;;  %p3400_p1 = scmp.lt.s32.totalorder %s3398_s14, %s3392_s25 }
  0x21   : > { %v425_v27 = vpack.c.bf16 %v401_v24, %v400_v23  ;;  %v426_v28 = vpack.c.bf16 %v403_v26, %v402_v25  ;;  %v404_v29 = vld [vmem:[%s3581_s24 + $0x90] sm:$0xff]  ;;  %v405_v30 = vld [vmem:[%s3581_s24 + $0x98] sm:$0xff]  ;;  %v406_v31 = vld [vmem:[%s3581_s24 + $0xa0] sm:$0xff]  ;;  %907 = vst [vmem:[#allocation2 + $0x80] sm:$0xff] %v3456_v50  ;;  %p3395_p13 = pneg %p3394_p12 }
  0x22   : > { %v407_v32 = vld [vmem:[%s3581_s24 + $0xa8] sm:$0xff]  ;;  %v427_v33 = vpack.c.bf16 %v405_v30, %v404_v29  ;;  %v408_v35 = vld [vmem:[%s3581_s24 + $0xb0] sm:$0xff]  ;;  %v409_v36 = vld [vmem:[%s3581_s24 + $0xb8] sm:$0xff]  ;;  %908 = vst [vmem:[#allocation2 + $0x88] sm:$0x3] %v3456_v50  ;;  %p3401_p2 = por %p3400_p1, %p3399_p0 }
  0x23   : > { %v428_v34 = vpack.c.bf16 %v407_v32, %v406_v31  ;;  %v410_v37 = vld [vmem:[%s3581_s24 + $0xc0] sm:$0xff]  ;;  %v411_v38 = vld [vmem:[%s3581_s24 + $0xc8] sm:$0xff]  ;;  %v429_v39 = vpack.c.bf16 %v409_v36, %v408_v35  ;;  %v412_v41 = vld [vmem:[%s3581_s24 + $0xd0] sm:$0xff]  ;;  %909 = vst [vmem:[#allocation2 + $0x90] sm:$0xff] %v3456_v50 }
  0x24   : > { %v430_v40 = vpack.c.bf16 %v411_v38, %v410_v37  ;;  %v413_v42 = vld [vmem:[%s3581_s24 + $0xd8] sm:$0xff]  ;;  %v414_v43 = vld [vmem:[%s3581_s24 + $0xe0] sm:$0xff]  ;;  %v415_v44 = vld [vmem:[%s3581_s24 + $0xe8] sm:$0xff]  ;;  %910 = vst [vmem:[#allocation2 + $0x98] sm:$0xff] %v3456_v50  ;;  %p3402_p3 = pnand %p3401_p2, %p3395_p13 }
  0x25   : > { %v431_v45 = vpack.c.bf16 %v413_v42, %v412_v41  ;;  %v432_v46 = vpack.c.bf16 %v415_v44, %v414_v43  ;;  %v416_v47 = vld [vmem:[%s3581_s24 + $0xf0] sm:$0xff]  ;;  %v417_v48 = vld [vmem:[%s3581_s24 + $0xf8] sm:$0xff]  ;;  %911 = vst [vmem:[#allocation2 + $0xa0] sm:$0x3] %v3456_v50  ;;  %912 = vst [vmem:[#allocation2 + $0xa8] sm:$0xff] %v3456_v50  ;;  %v1114_v43 = vsub.s32 1, %v3668_v20 }
  0x26   : > { %v433_v49 = vpack.c.bf16 %v417_v48, %v416_v47  ;;  %913 = vst [vmem:[#allocation2 + $0xb0] sm:$0xff] %v3456_v50  ;;  %914 = vst [vmem:[#allocation2 + $0xb8] sm:$0x3] %v3456_v50 }
  0x27   : > { %2898 = vmatmul.mubr.msk.bf16.gmra.mrb[4].mxu0 %vm457_vm0, %v421_v15  ;;  %915 = vst [vmem:[#allocation2 + $0xc0] sm:$0xff] %v3456_v50  ;;  %916 = vst [vmem:[#allocation2 + $0xc8] sm:$0xff] %v3456_v50 }
  0x28   : > { %2901 = vmatprep.mubr.msk.bf16.mxu0 %vm457_vm0, %v422_v16  ;;  %917 = vst [vmem:[#allocation2 + $0xd0] sm:$0x3] %v3456_v50  ;;  %918 = vst [vmem:[#allocation2 + $0xd8] sm:$0xff] %v3456_v50 }
  0x29   : > { %919 = vst [vmem:[#allocation2 + $0xe0] sm:$0xff] %v3456_v50  ;;  %920 = vst [vmem:[#allocation2 + $0xe8] sm:$0x3] %v3456_v50 }
  0x2a   : > { %921 = vst [vmem:[#allocation2 + $0xf0] sm:$0xff] %v3456_v50  ;;  %922 = vst [vmem:[#allocation2 + $0xf8] sm:$0xff] %v3456_v50 }
  0x2b   : > { %923 = vst [vmem:[#allocation2 + $0x100] sm:$0x3] %v3456_v50  ;;  %924 = vst [vmem:[#allocation2 + $0x108] sm:$0xff] %v3456_v50 }
  0x2c   : > { %925 = vst [vmem:[#allocation2 + $0x110] sm:$0xff] %v3456_v50  ;;  %926 = vst [vmem:[#allocation2 + $0x118] sm:$0x3] %v3456_v50 }
  0x2d   : > { %927 = vst [vmem:[#allocation2 + $0x120] sm:$0xff] %v3456_v50  ;;  %928 = vst [vmem:[#allocation2 + $0x128] sm:$0xff] %v3456_v50 }
  0x2e   : > { %929 = vst [vmem:[#allocation2 + $0x130] sm:$0x3] %v3456_v50  ;;  %930 = vst [vmem:[#allocation2 + $0x138] sm:$0xff] %v3456_v50 }
  0x2f   : > { %2902 = vmatmul.mubr.msk.bf16.gmra.mrb[8].mxu0 %vm457_vm0, %v423_v21  ;;  %931 = vst [vmem:[#allocation2 + $0x140] sm:$0xff] %v3456_v50  ;;  %932 = vst [vmem:[#allocation2 + $0x148] sm:$0x3] %v3456_v50 }
  0x30   : > { %2905 = vmatprep.mubr.msk.bf16.mxu0 %vm457_vm0, %v424_v22  ;;  %933 = vst [vmem:[#allocation2 + $0x150] sm:$0xff] %v3456_v50  ;;  %934 = vst [vmem:[#allocation2 + $0x158] sm:$0xff] %v3456_v50 }
  0x31   : > { %935 = vst [vmem:[#allocation2 + $0x160] sm:$0x3] %v3456_v50  ;;  %936 = vst [vmem:[#allocation2 + $0x168] sm:$0xff] %v3456_v50 }
  0x32   : > { %937 = vst [vmem:[#allocation2 + $0x170] sm:$0xff] %v3456_v50  ;;  %938 = vst [vmem:[#allocation2 + $0x178] sm:$0x3] %v3456_v50 }
  0x33   : > { %939 = vst [vmem:[#allocation2 + $0x180] sm:$0xff] %v3456_v50  ;;  %940 = vst [vmem:[#allocation2 + $0x188] sm:$0xff] %v3456_v50 }
  0x34   : > { %941 = vst [vmem:[#allocation2 + $0x190] sm:$0x3] %v3456_v50  ;;  %942 = vst [vmem:[#allocation2 + $0x198] sm:$0xff] %v3456_v50 }
  0x35   : > { %943 = vst [vmem:[#allocation2 + $0x1a0] sm:$0xff] %v3456_v50  ;;  %944 = vst [vmem:[#allocation2 + $0x1a8] sm:$0x3] %v3456_v50 }
  0x36   : > { %5303 = vst [vmem:[#allocation6_spill] sm:$0xff] %v3668_v20 }
  0x37   : > { %2906 = vmatmul.mubr.msk.bf16.gmra.mrb[12].mxu0 %vm457_vm0, %v425_v27 }
  0x38   : > { %2909 = vmatprep.mubr.msk.bf16.mxu0 %vm457_vm0, %v426_v28  ;;  %v5258_v28 = vsub.s32 0, %v3668_v20 }
  0x3f   : > { %2910 = vmatmul.mubr.msk.bf16.gmra.mrb[16].mxu0 %vm457_vm0, %v427_v33 }
  0x40   : > { %2913 = vmatprep.mubr.msk.bf16.mxu0 %vm457_vm0, %v428_v34 }
  0x47   : > { %2914 = vmatmul.mubr.msk.bf16.gmra.mrb[20].mxu0 %vm457_vm0, %v429_v39 }
  0x48   : > { %2917 = vmatprep.mubr.msk.bf16.mxu0 %vm457_vm0, %v430_v40 }
  0x4f   : > { %2918 = vmatmul.mubr.msk.bf16.gmra.mrb[24].mxu0 %vm457_vm0, %v431_v45 }
  0x50   : > { %2921 = vmatprep.mubr.msk.bf16.mxu0 %vm457_vm0, %v432_v46  ;;  %v3691_v46 = vld [vmem:[%s5249_s3] sm:$0xff] }
  0x51   : > { %v3696_v48 = vrot.slane %v3691_v46, %v5258_v28 }
  0x57   : > { %2922 = vmatmul.mubr.msk.bf16.gmra.mrb[28].mxu0 %vm457_vm0, %v433_v49 }
  0xf2   : > { %v2895_v52 = vpop.f32.mrb[0].mxu0 }
  0xf3   : > { %v3637_v53 = vadd.f32 %v2895_v52, %v3634_v51  ;;  %v540_v54 = vpop.f32.mrb[1].mxu0  ;;  %v1080_v52 = vld [vmem:[#allocation2 + $0x1] sm:$0xff] }
  0xf4   : > { %v3640_v55 = vadd.f32 %v3634_v51, %v540_v54  ;;  %v2896_v56 = vpop.f32.mrb[2].mxu0  ;;  %v1214_v54 = vsub.s32 2, %v3668_v20 }
  0xf5   : > { %v669_v57 = vsub.f32 0.0, %v3637_v53  ;;  %v3644_v58 = vadd.f32 %v2896_v56, %v3634_v51  ;;  %v543_v59 = vpop.f32.mrb[3].mxu0 }
  0xf6   : > { %v667_v60 = vsub.f32 0.0, %v3640_v55  ;;  %v3648_v61 = vadd.f32 %v3634_v51, %v543_v59  ;;  %v3700_v59 = vrot.slane %v3691_v46, %v1114_v43 }
  0xf7   : > { %v703_v62 = vmul.f32 1.442695, %v669_v57  ;;  %v670_v63 = vsub.f32 0.0, %v3644_v58 }
  0xf8   : > { %v699_v0 = vmul.f32 1.442695, %v667_v60  ;;  %v668_v1 = vsub.f32 0.0, %v3648_v61  ;;  %v1081_v60 = vld [vmem:[#allocation2 + $0x9] sm:$0xff] }
  0xf9   : > { %3091 = vpow2.f32 %v703_v62  ;;  %v705_v2 = vmul.f32 1.442695, %v670_v63  ;;  %v1117_v12 = vmul.f32 %v3700_v59, %v1081_v60 }
  0xfa   : > { %3093 = vpow2.f32 %v699_v0  ;;  %v701_v3 = vmul.f32 1.442695, %v668_v1  ;;  %v2899_v4 = vpop.f32.mrb[4].mxu0 }
  0xfb   : > { %3095 = vpow2.f32 %v705_v2  ;;  %v3653_v5 = vadd.f32 %v2899_v4, %v3634_v51  ;;  %v556_v6 = vpop.f32.mrb[5].mxu0  ;;  %v1016_v4 = vmul.f32 0.0, %v3696_v48 }
  0xfc   : > { %3097 = vpow2.f32 %v701_v3  ;;  %v3656_v7 = vadd.f32 %v3634_v51, %v556_v6  ;;  %v2900_v8 = vpop.f32.mrb[6].mxu0  ;;  %v1116_v6 = vmul.f32 %v3700_v59, %v1080_v52 }
  0xfd   : > { %v673_v9 = vsub.f32 0.0, %v3653_v5  ;;  %v3660_v10 = vadd.f32 %v2900_v8, %v3634_v51  ;;  %v559_v11 = vpop.f32.mrb[7].mxu0 }
  0xfe   : > { %v671_v13 = vsub.f32 0.0, %v3656_v7  ;;  %v3664_v14 = vadd.f32 %v3634_v51, %v559_v11  ;;  %v3708_v11 = vrot.slane %v3691_v46, %v1214_v54 }
  0xff   : > { %v711_v15 = vmul.f32 1.442695, %v673_v9  ;;  %v674_v16 = vsub.f32 0.0, %v3660_v10 }
 0x100   : > { %v707_v17 = vmul.f32 1.442695, %v671_v13  ;;  %v672_v18 = vsub.f32 0.0, %v3664_v14 }
 0x101   : > { %3099 = vpow2.f32 %v711_v15  ;;  %v713_v19 = vmul.f32 1.442695, %v674_v16  ;;  %v1414_v15 = vsub.s32 4, %v3668_v20  ;;  %v1180_v16 = vld [vmem:[#allocation2 + $0x2] sm:$0xff] }
 0x102   : > { %3101 = vpow2.f32 %v707_v17  ;;  %v709_v21 = vmul.f32 1.442695, %v672_v18  ;;  %v2903_v22 = vpop.f32.mrb[8].mxu0 }
 0x103   : > { %v3092_v23 = vpop.eup %3091  ;;  %v3671_v24 = vadd.f32 %v2903_v22, %v3634_v51  ;;  %v572_v25 = vpop.f32.mrb[9].mxu0  ;;  %3103 = vpow2.f32 %v713_v19  ;;  %v1615_v22 = vsub.s32 6, %v3668_v20 }
 0x104   : > { %v3094_v26 = vpop.eup %3093  ;;  %v765_v27 = vadd.f32 1.0, %v3092_v23  ;;  %v3675_v29 = vadd.f32 %v3634_v51, %v572_v25  ;;  %v2904_v30 = vpop.f32.mrb[10].mxu0  ;;  %3105 = vpow2.f32 %v709_v21  ;;  %v1314_v21 = vsub.s32 3, %v3668_v20  ;;  %v1181_v25 = vld [vmem:[#allocation2 + $0xa] sm:$0xff] }
 0x105   : > { %v3096_v31 = vpop.eup %3095  ;;  %v763_v32 = vadd.f32 1.0, %v3094_v26  ;;  %v677_v33 = vsub.f32 0.0, %v3671_v24  ;;  %v3679_v34 = vadd.f32 %v2904_v30, %v3634_v51  ;;  %v575_v35 = vpop.f32.mrb[11].mxu0  ;;  %v1715_v23 = vsub.s32 7, %v3668_v20 }
 0x106   : > { %v3098_v36 = vpop.eup %3097  ;;  %3107 = vrcp.f32 %v765_v27  ;;  %v766_v37 = vadd.f32 1.0, %v3096_v31  ;;  %v675_v38 = vsub.f32 0.0, %v3675_v29  ;;  %v3683_v39 = vadd.f32 %v3634_v51, %v575_v35 }
 0x107   : > { %3109 = vrcp.f32 %v763_v32  ;;  %v764_v40 = vadd.f32 1.0, %v3098_v36  ;;  %v719_v41 = vmul.f32 1.442695, %v677_v33  ;;  %v678_v42 = vsub.f32 0.0, %v3679_v34 }
 0x108   : > { %3111 = vrcp.f32 %v766_v37  ;;  %v715_v44 = vmul.f32 1.442695, %v675_v38  ;;  %v676_v45 = vsub.f32 0.0, %v3683_v39  ;;  %v1148_v30 = vadd.f32 %v1116_v6, %v1016_v4 }
 0x109   : > { %3113 = vrcp.f32 %v764_v40  ;;  %v721_v47 = vmul.f32 1.442695, %v678_v42  ;;  %v1216_v35 = vmul.f32 %v3708_v11, %v1180_v16  ;;  %v1514_v37 = vsub.s32 5, %v3668_v20 }
 0x10a   : > { %v2907_v49 = vpop.f32.mrb[12].mxu0  ;;  %3115 = vpow2.f32 %v719_v41  ;;  %v717_v63 = vmul.f32 1.442695, %v676_v45  ;;  %v1149_v38 = vadd.f32 %v1117_v12, %v1016_v4  ;;  %v1217_v41 = vmul.f32 %v3708_v11, %v1181_v25 }
 0x10b   : > { %v3100_v50 = vpop.eup %3099  ;;  %v588_v56 = vpop.f32.mrb[13].mxu0  ;;  %3117 = vpow2.f32 %v715_v44  ;;  %v3705_v8 = vadd.f32 %v2907_v49, %v3634_v51  ;;  %v3758_v60 = vrot.slane %v3691_v46, %v1615_v22 }
 0x10c   : > { %v3102_v57 = vpop.eup %3101  ;;  %v769_v62 = vadd.f32 1.0, %v3100_v50  ;;  %v2908_v0 = vpop.f32.mrb[14].mxu0  ;;  %3119 = vpow2.f32 %v721_v47  ;;  %v3713_v17 = vadd.f32 %v3634_v51, %v588_v56 }
 0x10d   : > { %v767_v1 = vadd.f32 1.0, %v3102_v57  ;;  %v591_v2 = vpop.f32.mrb[15].mxu0  ;;  %v3104_v3 = vpop.eup %3103  ;;  %5304 = vst [vmem:[#allocation7_spill] sm:$0xff] %v3705_v8  ;;  %v681_v31 = vsub.f32 0.0, %v3705_v8  ;;  %v3724_v32 = vadd.f32 %v2908_v0, %v3634_v51  ;;  %v3755_v57 = vrot.slane %v3691_v46, %v1314_v21 }
 0x10e   : > { %3121 = vrcp.f32 %v769_v62  ;;  %v3106_v9 = vpop.eup %3105  ;;  %5305 = vst [vmem:[#allocation8_spill] sm:$0xff] %v3713_v17  ;;  %v770_v42 = vadd.f32 1.0, %v3104_v3  ;;  %v679_v43 = vsub.f32 0.0, %v3713_v17  ;;  %v3745_v47 = vadd.f32 %v3634_v51, %v591_v2 }
 0x10f   : > { %3123 = vrcp.f32 %v767_v1  ;;  %5306 = vst [vmem:[#allocation9_spill] sm:$0xff] %v3724_v32  ;;  %v727_v52 = vmul.f32 1.442695, %v681_v31  ;;  %v682_v54 = vsub.f32 0.0, %v3724_v32  ;;  %v3761_v62 = vrot.slane %v3691_v46, %v1715_v23 }
 0x110   : > { %v3108_v13 = vpop.eup %3107  ;;  %3125 = vpow2.f32 %v717_v63  ;;  %5307 = vst [vmem:[#allocation10_spill] sm:$0xff] %v3745_v47  ;;  %v1248_v63 = vadd.f32 %v1216_v35, %v1148_v30  ;;  %v3764_v1 = vrot.slane %v3691_v46, %v1514_v37  ;;  %v3766_v2 = vadd.f32 %v1217_v41, %v1149_v38 }
 0x111   : > { %v3110_v18 = vpop.eup %3109  ;;  %v861_v19 = vmul.f32 %v3108_v13, %v3637_v53  ;;  %3127 = vrcp.f32 %v770_v42  ;;  %v723_v3 = vmul.f32 1.442695, %v679_v43 }
 0x112   : > { %v3112_v26 = vpop.eup %3111  ;;  %v3720_v27 = vmul.f32 %v3110_v18, %v3640_v55  ;;  %v3726_v33 = vpop.f32.mrb[16].mxu0 }
 0x113   : > { %v3114_v53 = vpop.eup %3113  ;;  %948 = vst [vmem:[#allocation2 + $0x31] sm:$0xff] %v861_v19  ;;  %v3730_v36 = vmul.f32 %v3112_v26, %v3644_v58  ;;  %v3733_v55 = vpop.f32.mrb[17].mxu0  ;;  %v768_v58 = vadd.f32 1.0, %v3106_v9  ;;  %v1120_v22 = vmul.f32 %v3700_v59, %v861_v19  ;;  %v3784_v23 = vmul.f32 %v3761_v62, %v861_v19 }
 0x114   : > { %946 = vst [vmem:[#allocation2 + $0x19] sm:$0xff] %v3720_v27  ;;  %v3737_v40 = vmul.f32 %v3114_v53, %v3648_v61  ;;  %v3741_v44 = vpop.f32.mrb[18].mxu0  ;;  %v3116_v45 = vpop.eup %3115  ;;  %v3750_v61 = vrot.slane %v3691_v46, %v1414_v15  ;;  %v3775_v46 = vmul.f32 1.442695, %v682_v54 }
 0x115   : > { %949 = vst [vmem:[#allocation2 + $0x39] sm:$0xff] %v3730_v36  ;;  %v3747_v49 = vpop.f32.mrb[19].mxu0  ;;  %v3118_v50 = vpop.eup %3117  ;;  %3129 = vrcp.f32 %v768_v58  ;;  %v773_v9 = vadd.f32 1.0, %v3116_v45 }
 0x116   : > { %947 = vst [vmem:[#allocation2 + $0x21] sm:$0xff] %v3737_v40  ;;  %v3120_v56 = vpop.eup %3119  ;;  %v771_v18 = vadd.f32 1.0, %v3118_v50  ;;  %3131 = vpow2.f32 %v727_v52  ;;  %v1416_v37 = vmul.f32 %v3750_v61, %v3720_v27  ;;  %v3803_v58 = vmul.f32 %v3750_v61, %v3730_v36 }
 0x117   : > { %v774_v26 = vadd.f32 1.0, %v3120_v56  ;;  %3133 = vpow2.f32 %v723_v3  ;;  %v3807_v50 = vmul.f32 %v3761_v62, %v3730_v36 }
 0x118   : > { %v3122_v0 = vpop.eup %3121  ;;  %3135 = vrcp.f32 %v773_v9 }
 0x119   : > { %v3124_v4 = vpop.eup %3123  ;;  %v3769_v6 = vmul.f32 %v3122_v0, %v3653_v5  ;;  %v3781_v5 = vmul.f32 %v3750_v61, %v861_v19  ;;  %v1118_v19 = vmul.f32 %v3700_v59, %v3720_v27  ;;  %3137 = vrcp.f32 %v771_v18 }
 0x11a   : > { %v3126_v13 = vpop.eup %3125  ;;  %v984_v15 = vld [vmem:[#allocation2 + $0x30] sm:$0xff]  ;;  %v3773_v16 = vmul.f32 %v3124_v4, %v3656_v7  ;;  %v3777_v21 = vpop.f32.mrb[20].mxu0  ;;  %v1119_v27 = vmul.f32 %v3700_v59, %v3737_v40  ;;  %v1417_v0 = vmul.f32 %v3750_v61, %v3737_v40  ;;  %3139 = vrcp.f32 %v774_v26 }
 0x11b   : > { %5308 = vst [vmem:[#allocation11_spill] sm:$0xff] %v3777_v21  ;;  %v982_v25 = vld [vmem:[#allocation2 + $0x18] sm:$0xff]  ;;  %952 = vst [vmem:[#allocation2 + $0x61] sm:$0xff] %v3769_v6  ;;  %v3787_v7 = vpop.f32.mrb[21].mxu0  ;;  %v1020_v30 = vmul.f32 %v3696_v48, %v984_v15  ;;  %v772_v42 = vadd.f32 1.0, %v3126_v13 }
 0x11c   : > { %5309 = vst [vmem:[#allocation12_spill] sm:$0xff] %v3787_v7  ;;  %v1018_v31 = vmul.f32 %v3696_v48, %v982_v25  ;;  %v1316_v53 = vmul.f32 %v3755_v57, %v982_v25  ;;  %950 = vst [vmem:[#allocation2 + $0x49] sm:$0xff] %v3773_v16  ;;  %v3793_v35 = vpop.f32.mrb[22].mxu0  ;;  %v1184_v38 = vld [vmem:[#allocation2 + $0x32] sm:$0xff]  ;;  %v1318_v25 = vmul.f32 %v3755_v57, %v984_v15 }
 0x11d   : > { %5310 = vst [vmem:[#allocation13_spill] sm:$0xff] %v3793_v35  ;;  %v983_v41 = vld [vmem:[#allocation2 + $0x20] sm:$0xff]  ;;  %v3799_v43 = vpop.f32.mrb[23].mxu0  ;;  %v985_v4 = vld [vmem:[#allocation2 + $0x38] sm:$0xff]  ;;  %v1220_v9 = vmul.f32 %v3708_v11, %v1184_v38  ;;  %3141 = vrcp.f32 %v772_v42  ;;  %v1518_v20 = vmul.f32 %v3764_v1, %v1184_v38 }
 0x11e   : > { %5311 = vst [vmem:[#allocation14_spill] sm:$0xff] %v3799_v43  ;;  %v1348_v45 = vadd.f32 %v1316_v53, %v1248_v63  ;;  %v1182_v52 = vld [vmem:[#allocation2 + $0x1a] sm:$0xff]  ;;  %v1150_v54 = vadd.f32 %v1118_v19, %v1018_v31  ;;  %v1183_v56 = vld [vmem:[#allocation2 + $0x22] sm:$0xff]  ;;  %v1152_v63 = vadd.f32 %v1120_v22, %v1020_v30  ;;  %v1019_v13 = vmul.f32 %v3696_v48, %v983_v41  ;;  %v3128_v53 = vpop.eup %3127 }
 0x11f   : > { %v1218_v18 = vmul.f32 %v3708_v11, %v1182_v52  ;;  %v1317_v31 = vmul.f32 %v3755_v57, %v983_v41  ;;  %v1617_v19 = vmul.f32 %v3758_v60, %v984_v15  ;;  %v1219_v40 = vmul.f32 %v3708_v11, %v1183_v56  ;;  %v3130_v30 = vpop.eup %3129 }
 0x120   : > { %v1448_v3 = vadd.f32 %v1416_v37, %v1348_v45  ;;  %v1151_v28 = vadd.f32 %v1119_v27, %v1019_v13  ;;  %v1516_v22 = vmul.f32 %v3764_v1, %v1182_v52  ;;  %v3826_v37 = vld [vmem:[%s5249_s3 + $0x8] ss:$0 sm:$0xff]  ;;  %v1021_v45 = vmul.f32 %v3696_v48, %v985_v4  ;;  %v3833_v12 = vpop.eup %3131 }
 0x121   : > { %v1319_v41 = vmul.f32 %v3755_v57, %v985_v4  ;;  %v1250_v42 = vadd.f32 %v1218_v18, %v1150_v54  ;;  %v1349_v15 = vadd.f32 %v1317_v31, %v3766_v2  ;;  %v1252_v52 = vadd.f32 %v1220_v9, %v1152_v63  ;;  %v3842_v2 = vpop.eup %3133 }
 0x122   : > { %v3821_v26 = vpop.f32.mrb[24].mxu0  ;;  %v1548_v32 = vadd.f32 %v1516_v22, %v1448_v3  ;;  %v1517_v7 = vmul.f32 %v3764_v1, %v1183_v56  ;;  %v1618_v31 = vmul.f32 %v3758_v60, %v985_v4  ;;  %v1817_v63 = vmul.f32 %v3826_v37, %v1184_v38  ;;  %v1185_v22 = vld [vmem:[#allocation2 + $0x3a] sm:$0xff] }
 0x123   : > { %5312 = vst [vmem:[#allocation15_spill] sm:$0xff] %v3821_v26  ;;  %v986_v27 = vld [vmem:[#allocation2 + $0x48] sm:$0xff]  ;;  %v3831_v13 = vpop.f32.mrb[25].mxu0  ;;  %v1251_v26 = vadd.f32 %v1219_v40, %v1151_v28  ;;  %v1350_v35 = vadd.f32 %v1318_v25, %v1250_v42  ;;  %v1449_v17 = vadd.f32 %v1417_v0, %v1349_v15  ;;  %v3136_v28 = vpop.eup %3135  ;;  %v1420_v0 = vmul.f32 %v3750_v61, %v3773_v16 }
 0x124   : > { %5313 = vst [vmem:[#allocation16_spill] sm:$0xff] %v3831_v13  ;;  %v3836_v43 = vpop.f32.mrb[26].mxu0  ;;  %v1320_v54 = vmul.f32 %v3755_v57, %v986_v27  ;;  %v1649_v13 = vadd.f32 %v1617_v19, %v1548_v32  ;;  %v3138_v25 = vpop.eup %3137  ;;  %v1619_v15 = vmul.f32 %v3758_v60, %v986_v27  ;;  %v866_v4 = vmul.f32 %v3128_v53, %v3660_v10 }
 0x125   : > { %5314 = vst [vmem:[#allocation17_spill] sm:$0xff] %v3836_v43  ;;  %v3840_v18 = vpop.f32.mrb[27].mxu0  ;;  %v1351_v9 = vadd.f32 %v1319_v41, %v1251_v26  ;;  %v1549_v3 = vadd.f32 %v1517_v7, %v1449_v17  ;;  %v1450_v56 = vadd.f32 %v3781_v5, %v1350_v35  ;;  %v864_v38 = vmul.f32 %v3130_v30, %v3664_v14  ;;  %v3140_v26 = vpop.eup %3139  ;;  %v3856_v17 = vld [vmem:[%s5250_s4] ss:$0 sm:$0xff] }
 0x126   : > { %5315 = vst [vmem:[#allocation18_spill] sm:$0xff] %v3840_v18  ;;  %v1352_v40 = vadd.f32 %v1320_v54, %v1252_v52  ;;  %v1749_v42 = vadd.f32 %v3784_v23, %v1649_v13  ;;  %v988_v7 = vld [vmem:[#allocation2 + $0x60] sm:$0xff]  ;;  %v1121_v23 = vmul.f32 %v3700_v59, %v3730_v36  ;;  %953 = vst [vmem:[#allocation2 + $0x69] sm:$0xff] %v866_v4  ;;  %3143 = vpow2.f32 %v3775_v46 }
 0x127   : > { %v1650_v32 = vadd.f32 %v1618_v31, %v1549_v3  ;;  %v1550_v5 = vadd.f32 %v1518_v20, %v1450_v56  ;;  %v1451_v35 = vadd.f32 %v3803_v58, %v1351_v9  ;;  %951 = vst [vmem:[#allocation2 + $0x51] sm:$0xff] %v864_v38  ;;  %v3866_v10 = vadd.f32 %v3726_v33, %v3634_v51  ;;  %v3142_v14 = vpop.eup %3141 }
 0x128   : > { %v3858_v19 = vadd.f32 %v1420_v0, %v1352_v40  ;;  %v1849_v41 = vadd.f32 %v1817_v63, %v1749_v42  ;;  %v1818_v53 = vmul.f32 %v3826_v37, %v1185_v22  ;;  %v1719_v58 = vmul.f32 %v3761_v62, %v3773_v16 }
 0x129   : > { %v1750_v30 = vadd.f32 %v3807_v50, %v1650_v32  ;;  %v1651_v20 = vadd.f32 %v1619_v15, %v1550_v5  ;;  %v1153_v13 = vadd.f32 %v1121_v23, %v1021_v45  ;;  %v1024_v52 = vmul.f32 %v3696_v48, %v988_v7 }
 0x12a   : > { %v3873_v36 = vadd.f32 %v3856_v17, %v1849_v41  ;;  %v3877_v46 = vmul.f32 %v3136_v28, %v3671_v24  ;;  %v867_v31 = vmul.f32 %v3138_v25, %v3675_v29  ;;  %v3883_v50 = vmul.f32 %v3140_v26, %v3679_v34  ;;  %v3885_v63 = vpop.f32.mrb[28].mxu0 }
 0x12b   : > { %v1850_v33 = vadd.f32 %v1818_v53, %v1750_v30  ;;  %v3879_v54 = vadd.f32 %v1719_v58, %v1651_v20  ;;  %5318 = vst [vmem:[#allocation21_spill] sm:$0xff] %v3885_v63  ;;  %v1221_v45 = vmul.f32 %v3708_v11, %v1185_v22  ;;  %v1022_v3 = vmul.f32 %v3696_v48, %v986_v27 }
 0x12c   : > { %5316 = vst [vmem:[#allocation19_spill] sm:$0xff] %v3873_v36  ;;  %5317 = vst [vmem:[#allocation20_spill] sm:$0xff] %v3877_v46  ;;  %v1920_v9 = vsub.f32 0.0, %v3873_v36  ;;  %v3893_v24 = vadd.f32 %v3634_v51, %v3733_v55  ;;  %v1124_v29 = vmul.f32 %v3700_v59, %v3769_v6  ;;  %v3902_v34 = vmul.f32 %v3750_v61, %v3769_v6 }
 0x12d   : > { %956 = vst [vmem:[#allocation2 + $0x91] sm:$0xff] %v3877_v46  ;;  %v3896_v28 = vadd.f32 %v3856_v17, %v1850_v33  ;;  %v3906_v40 = vmul.f32 %v3761_v62, %v3769_v6  ;;  %954 = vst [vmem:[#allocation2 + $0x79] sm:$0xff] %v867_v31  ;;  %v1253_v27 = vadd.f32 %v1221_v45, %v1153_v13  ;;  %v989_v20 = vld [vmem:[#allocation2 + $0x68] sm:$0xff] }
 0x12e   : > { %5319 = vst [vmem:[#allocation22_spill] sm:$0xff] %v3893_v24  ;;  %957 = vst [vmem:[#allocation2 + $0x99] sm:$0xff] %v3883_v50  ;;  %v1519_v55 = vmul.f32 %v3764_v1, %v1185_v22  ;;  %v1322_v0 = vmul.f32 %v3755_v57, %v988_v7  ;;  %v1122_v56 = vmul.f32 %v3700_v59, %v3773_v16  ;;  %v1952_v6 = vmul.f32 1.442695, %v1920_v9  ;;  %v1186_v23 = vld [vmem:[#allocation2 + $0x4a] sm:$0xff]  ;;  %v1188_v58 = vld [vmem:[#allocation2 + $0x62] sm:$0xff] }
 0x12f   : > { %5320 = vst [vmem:[#allocation23_spill] sm:$0xff] %v3896_v28  ;;  %v1921_v25 = vsub.f32 0.0, %v3896_v28  ;;  %v1156_v42 = vadd.f32 %v1124_v29, %v1024_v52  ;;  %v1621_v15 = vmul.f32 %v3758_v60, %v988_v7  ;;  %v3916_v26 = vmul.f32 %v3142_v14, %v3683_v39  ;;  %v987_v16 = vld [vmem:[#allocation2 + $0x50] sm:$0xff] }
 0x130   : > { %v1154_v32 = vadd.f32 %v1122_v56, %v1022_v3  ;;  %v3919_v5 = vmul.f32 %v3700_v59, %v866_v4  ;;  %v3922_v22 = vmul.f32 %v3750_v61, %v866_v4  ;;  %v3925_v41 = vmul.f32 %v3761_v62, %v866_v4  ;;  %v3930_v39 = vpop.eup %3143  ;;  %v3949_v3 = vpop.f32.mrb[29].mxu0  ;;  %v1187_v18 = vld [vmem:[#allocation2 + $0x52] sm:$0xff] }
 0x131   : > { %v1123_v53 = vmul.f32 %v3700_v59, %v864_v38  ;;  %v1421_v7 = vmul.f32 %v3750_v61, %v864_v38  ;;  %v1551_v30 = vadd.f32 %v1519_v55, %v1451_v35  ;;  %955 = vst [vmem:[#allocation2 + $0x81] sm:$0xff] %v3916_v26  ;;  %v1954_v14 = vmul.f32 1.442695, %v1921_v25  ;;  %5321 = vst [vmem:[#allocation24_spill] sm:$0xff] %v3949_v3  ;;  %v3957_v56 = vpop.f32.mrb[30].mxu0 }
 0x132   : > { %v1720_v13 = vmul.f32 %v3761_v62, %v864_v38  ;;  %v3935_v52 = vmul.f32 %v3750_v61, %v3877_v46  ;;  %v3939_v4 = vmul.f32 %v3761_v62, %v3877_v46  ;;  %v1222_v33 = vmul.f32 %v3708_v11, %v1186_v23  ;;  %5322 = vst [vmem:[#allocation25_spill] sm:$0xff] %v3957_v56  ;;  %v3966_v28 = vpop.f32.mrb[31].mxu0 }
 0x133   : > { %v3943_v35 = vmul.f32 %v3700_v59, %v867_v31  ;;  %v1424_v45 = vmul.f32 %v3750_v61, %v867_v31  ;;  %v3947_v9 = vmul.f32 %v3761_v62, %v867_v31  ;;  %3145 = vpow2.f32 %v1952_v6  ;;  %5323 = vst [vmem:[#allocation26_spill] sm:$0xff] %v3966_v28 }
 0x134   : > { %v1321_v38 = vmul.f32 %v3755_v57, %v987_v16  ;;  %v1520_v29 = vmul.f32 %v3764_v1, %v1186_v23  ;;  %v3955_v55 = vmul.f32 %v3761_v62, %v3883_v50  ;;  %v1025_v25 = vmul.f32 %v3696_v48, %v989_v20 }
 0x135   : > { %v1224_v63 = vmul.f32 %v3708_v11, %v1188_v58  ;;  %v1254_v31 = vadd.f32 %v1222_v33, %v1154_v32  ;;  %v1620_v43 = vmul.f32 %v3758_v60, %v987_v16  ;;  %3147 = vpow2.f32 %v1954_v14  ;;  %v990_v14 = vld [vmem:[#allocation2 + $0x78] sm:$0xff] }
 0x136   : > { %v1353_v6 = vadd.f32 %v1321_v38, %v1253_v27  ;;  %v1552_v3 = vadd.f32 %v1520_v29, %v3858_v19  ;;  %v1819_v8 = vmul.f32 %v3826_v37, %v1186_v23  ;;  %v1522_v21 = vmul.f32 %v3764_v1, %v1188_v58 }
 0x137   : > { %v1023_v36 = vmul.f32 %v3696_v48, %v987_v16  ;;  %v1354_v46 = vadd.f32 %v1322_v0, %v1254_v31  ;;  %v1652_v56 = vadd.f32 %v1620_v43, %v1551_v30  ;;  %v1521_v24 = vmul.f32 %v3764_v1, %v1187_v18 }
 0x138   : > { %v1453_v47 = vadd.f32 %v1421_v7, %v1353_v6  ;;  %v1653_v32 = vadd.f32 %v1621_v15, %v1552_v3  ;;  %v1851_v33 = vadd.f32 %v1819_v8, %v3879_v54  ;;  %v1256_v27 = vadd.f32 %v1224_v63, %v1156_v42  ;;  %v1189_v7 = vld [vmem:[#allocation2 + $0x6a] sm:$0xff] }
 0x139   : > { %v1622_v19 = vmul.f32 %v3758_v60, %v989_v20  ;;  %v1752_v38 = vadd.f32 %v1720_v13, %v1652_v56  ;;  %v1820_v23 = vmul.f32 %v3826_v37, %v1187_v18  ;;  %v1821_v29 = vmul.f32 %v3826_v37, %v1188_v58 }
 0x13a   : > { %v1553_v16 = vadd.f32 %v1521_v24, %v1453_v47  ;;  %v1753_v43 = vadd.f32 %v3906_v40, %v1653_v32  ;;  %v3975_v0 = vadd.f32 %v3856_v17, %v1851_v33  ;;  %v1155_v30 = vadd.f32 %v1123_v53, %v1023_v36 }
 0x13b   : > { %v1852_v15 = vadd.f32 %v1820_v23, %v1752_v38  ;;  %v1324_v8 = vmul.f32 %v3755_v57, %v990_v14  ;;  %v1454_v54 = vadd.f32 %v3902_v34, %v1354_v46  ;;  %v1323_v63 = vmul.f32 %v3755_v57, %v989_v20 }
 0x13c   : > { %v1654_v42 = vadd.f32 %v1622_v19, %v1553_v16  ;;  %v1853_v13 = vadd.f32 %v1821_v29, %v1753_v43  ;;  %v1922_v3 = vsub.f32 0.0, %v3975_v0  ;;  %v1223_v47 = vmul.f32 %v3708_v11, %v1187_v18  ;;  %v3999_v43 = vld [vmem:[#allocation2 + $0x90] sm:$0xff] }
 0x13d   : > { %v3983_v24 = vadd.f32 %v3856_v17, %v1852_v15  ;;  %v1356_v40 = vadd.f32 %v1324_v8, %v1256_v27  ;;  %v1554_v58 = vadd.f32 %v1522_v21, %v1454_v54  ;;  %v3146_v56 = vpop.eup %3145  ;;  %v1822_v36 = vmul.f32 %v3826_v37, %v1189_v7  ;;  %v1190_v8 = vld [vmem:[#allocation2 + $0x7a] sm:$0xff] }
 0x13e   : > { %v1754_v53 = vadd.f32 %v3925_v41, %v1654_v42  ;;  %v3988_v46 = vadd.f32 %v3856_v17, %v1853_v13  ;;  %v1956_v34 = vmul.f32 1.442695, %v1922_v3  ;;  %v1255_v20 = vadd.f32 %v1223_v47, %v1155_v30  ;;  %v991_v30 = vld [vmem:[#allocation2 + $0x80] sm:$0xff] }
 0x13f   : > { %v1923_v31 = vsub.f32 0.0, %v3983_v24  ;;  %v1456_v6 = vadd.f32 %v1424_v45, %v1356_v40  ;;  %v1623_v18 = vmul.f32 %v3758_v60, %v990_v14  ;;  %v3148_v32 = vpop.eup %3147  ;;  %v1157_v33 = vadd.f32 %v3919_v5, %v1025_v25  ;;  %v4012_v40 = vld [vmem:[#allocation2 + $0x98] sm:$0xff] }
 0x140   : > { %v1854_v27 = vadd.f32 %v1822_v36, %v1754_v53  ;;  %v1924_v21 = vsub.f32 0.0, %v3988_v46  ;;  %v1026_v19 = vmul.f32 %v3696_v48, %v990_v14  ;;  %v2016_v38 = vadd.f32 1.0, %v3146_v56 }
 0x141   : > { %3149 = vpow2.f32 %v1956_v34  ;;  %v1958_v41 = vmul.f32 1.442695, %v1923_v31  ;;  %v1655_v23 = vadd.f32 %v1623_v18, %v1554_v58  ;;  %v1225_v29 = vmul.f32 %v3708_v11, %v1189_v7 }
 0x142   : > { %v3997_v16 = vadd.f32 %v3856_v17, %v1854_v27  ;;  %v1960_v45 = vmul.f32 1.442695, %v1924_v21  ;;  %v4002_v5 = vadd.f32 1.0, %v3833_v12  ;;  %v2017_v25 = vadd.f32 1.0, %v3148_v32 }
 0x143   : > { %v1355_v15 = vadd.f32 %v1323_v63, %v1255_v20  ;;  %3151 = vpow2.f32 %v1958_v41  ;;  %v1755_v14 = vadd.f32 %v3947_v9, %v1655_v23  ;;  %v1257_v54 = vadd.f32 %v1225_v29, %v1157_v33  ;;  %v1191_v9 = vld [vmem:[#allocation2 + $0x82] sm:$0xff] }
 0x144   : > { %v1523_v42 = vmul.f32 %v3764_v1, %v1189_v7  ;;  %v1925_v13 = vsub.f32 0.0, %v3997_v16  ;;  %v1158_v3 = vadd.f32 %v3943_v35, %v1026_v19  ;;  %3153 = vrcp.f32 %v2016_v38  ;;  %v4026_v19 = vld [vmem:[#allocation2 + $0x92] sm:$0xff] }
 0x145   : > { %v1326_v47 = vmul.f32 %v3755_v57, %v3999_v43  ;;  %v1625_v12 = vmul.f32 %v3758_v60, %v3999_v43  ;;  %v1027_v63 = vmul.f32 %v3696_v48, %v991_v30  ;;  %3155 = vpow2.f32 %v1960_v45 }
 0x146   : > { %v1962_v58 = vmul.f32 1.442695, %v1925_v13  ;;  %v1127_v7 = vmul.f32 %v3700_v59, %v3916_v26  ;;  %v1226_v56 = vmul.f32 %v3708_v11, %v1190_v8  ;;  %3157 = vrcp.f32 %v2017_v25 }
 0x147   : > { %v1325_v35 = vmul.f32 %v3755_v57, %v991_v30  ;;  %v1455_v36 = vadd.f32 %v3922_v22, %v1355_v15  ;;  %v1524_v53 = vmul.f32 %v3764_v1, %v1190_v8  ;;  %v1327_v34 = vmul.f32 %v3755_v57, %v4012_v40 }
 0x148   : > { %v1159_v20 = vadd.f32 %v1127_v7, %v1027_v63  ;;  %v1227_v31 = vmul.f32 %v3708_v11, %v1191_v9  ;;  %v1258_v18 = vadd.f32 %v1226_v56, %v1158_v3  ;;  %v1425_v33 = vmul.f32 %v3750_v61, %v3916_v26 }
 0x149   : > { %v1357_v32 = vadd.f32 %v1325_v35, %v1257_v54  ;;  %v1555_v27 = vadd.f32 %v1523_v42, %v1455_v36  ;;  %v1556_v21 = vadd.f32 %v1524_v53, %v1456_v6  ;;  %3159 = vpow2.f32 %v1962_v58  ;;  %v4042_v53 = vld [vmem:[#allocation2 + $0x9a] sm:$0xff] }
 0x14a   : > { %v1259_v38 = vadd.f32 %v1227_v31, %v1159_v20  ;;  %v1358_v22 = vadd.f32 %v1326_v47, %v1258_v18  ;;  %v1624_v41 = vmul.f32 %v3758_v60, %v991_v30  ;;  %v1525_v45 = vmul.f32 %v3764_v1, %v1191_v9 }
 0x14b   : > { %v3150_v23 = vpop.eup %3149  ;;  %v1457_v29 = vadd.f32 %v1425_v33, %v1357_v32  ;;  %v1657_v25 = vadd.f32 %v1625_v12, %v1556_v21  ;;  %v1823_v15 = vmul.f32 %v3826_v37, %v1190_v8  ;;  %v1626_v13 = vmul.f32 %v3758_v60, %v4012_v40 }
 0x14c   : > { %v2018_v54 = vadd.f32 1.0, %v3150_v23  ;;  %v1656_v42 = vadd.f32 %v1624_v41, %v1555_v27  ;;  %v1724_v6 = vmul.f32 %v3761_v62, %v3916_v26  ;;  %v1825_v47 = vmul.f32 %v3826_v37, %v4026_v19 }
 0x14d   : > { %v3152_v3 = vpop.eup %3151  ;;  %v1557_v30 = vadd.f32 %v1525_v45, %v1457_v29  ;;  %v1757_v63 = vadd.f32 %v3939_v4, %v1657_v25  ;;  %v1855_v58 = vadd.f32 %v1823_v15, %v1755_v14  ;;  %v1359_v7 = vadd.f32 %v1327_v34, %v1259_v38  ;;  %v5324_v25 = vld [vmem:[#allocation22_spill] sm:$0xff] }
 0x14e   : > { %v1756_v12 = vadd.f32 %v1724_v6, %v1656_v42  ;;  %v1824_v8 = vmul.f32 %v3826_v37, %v1191_v9  ;;  %v4040_v56 = vadd.f32 %v3935_v52, %v1358_v22  ;;  %v3154_v35 = vpop.eup %3153  ;;  %v2019_v36 = vadd.f32 1.0, %v3152_v3 }
 0x14f   : > { %v1658_v26 = vadd.f32 %v1626_v13, %v1557_v30  ;;  %v1857_v20 = vadd.f32 %v1825_v47, %v1757_v63  ;;  %v4045_v31 = vadd.f32 %v3856_v17, %v1855_v58  ;;  %v3156_v18 = vpop.eup %3155  ;;  %3161 = vrcp.f32 %v2018_v54  ;;  %v5325_v54 = vld [vmem:[#allocation10_spill] sm:$0xff]  ;;  %v5327_v58 = vld [vmem:[#allocation23_spill] sm:$0xff] }
 0x150   : > { %v1427_v4 = vmul.f32 %v3750_v61, %v3883_v50  ;;  %v1856_v14 = vadd.f32 %v1824_v8, %v1756_v12  ;;  %v775_v9 = vadd.f32 1.0, %v3842_v2  ;;  %v3158_v34 = vpop.eup %3157  ;;  %v4054_v33 = vadd.f32 %v3741_v44, %v3634_v51  ;;  %v5329_v12 = vld [vmem:[#allocation20_spill] sm:$0xff] }
 0x151   : > { %v1758_v52 = vadd.f32 %v3955_v55, %v1658_v26  ;;  %v1926_v32 = vsub.f32 0.0, %v4045_v31  ;;  %v4058_v27 = vadd.f32 %v3634_v51, %v3747_v49  ;;  %v1826_v21 = vmul.f32 %v3826_v37, %v4042_v53 }
 0x152   : > { %v4063_v38 = vadd.f32 %v3856_v17, %v1856_v14  ;;  %3163 = vrcp.f32 %v4002_v5  ;;  %v4066_v2 = vadd.f32 %v1427_v4, %v1359_v7  ;;  %v2020_v55 = vadd.f32 1.0, %v3156_v18  ;;  %v5330_v14 = vld [vmem:[#allocation19_spill] sm:$0xff] }
 0x153   : > { %3165 = vrcp.f32 %v2019_v36  ;;  %v4069_v22 = vadd.f32 %v3856_v17, %v1857_v20  ;;  %v1964_v44 = vmul.f32 1.442695, %v1926_v32  ;;  %v3160_v41 = vpop.eup %3159  ;;  %v1858_v23 = vadd.f32 %v1826_v21, %v1758_v52 }
 0x154   : > { %v1927_v49 = vsub.f32 0.0, %v4063_v38  ;;  %3167 = vrcp.f32 %v775_v9  ;;  %v685_v29 = vsub.f32 0.0, %v3866_v10  ;;  %v778_v45 = vadd.f32 1.0, %v3930_v39 }
 0x155   : > { %v683_v15 = vsub.f32 0.0, %v5324_v25  ;;  %3169 = vpow2.f32 %v1964_v44  ;;  %v5326_v13 = vsub.f32 0.0, %v5325_v54  ;;  %v686_v6 = vsub.f32 0.0, %v4054_v33 }
 0x156   : > { %v1966_v5 = vmul.f32 1.442695, %v1927_v49  ;;  %v2021_v3 = vadd.f32 1.0, %v3160_v41  ;;  %3171 = vrcp.f32 %v2020_v55  ;;  %v1928_v47 = vsub.f32 0.0, %v4069_v22 }
 0x157   : > { %v725_v42 = vmul.f32 1.442695, %v5326_v13  ;;  %v4080_v30 = vadd.f32 %v3856_v17, %v1858_v23  ;;  %v735_v63 = vmul.f32 1.442695, %v685_v29  ;;  %v684_v39 = vsub.f32 0.0, %v4058_v27  ;;  %v5334_v23 = vld [vmem:[#allocation7_spill] sm:$0xff] }
 0x158   : > { %3173 = vpow2.f32 %v1966_v5  ;;  %v4084_v7 = vmul.f32 %v3158_v34, %v5327_v58  ;;  %v1128_v8 = vmul.f32 %v3700_v59, %v5329_v12  ;;  %v731_v36 = vmul.f32 1.442695, %v683_v15  ;;  %v5335_v5 = vld [vmem:[#allocation12_spill] sm:$0xff] }
 0x159   : > { %3175 = vrcp.f32 %v778_v45  ;;  %v3162_v26 = vpop.eup %3161  ;;  %v1028_v20 = vmul.f32 %v3696_v48, %v3999_v43  ;;  %v1129_v18 = vmul.f32 %v3700_v59, %v3883_v50  ;;  %v737_v4 = vmul.f32 1.442695, %v686_v6  ;;  %v5332_v43 = vld [vmem:[#allocation11_spill] sm:$0xff]  ;;  %v5336_v6 = vld [vmem:[#allocation8_spill] sm:$0xff] }
 0x15a   : > { %5328 = vst [vmem:[#allocation22_spill] sm:$0xff] %v4084_v7  ;;  %3177 = vpow2.f32 %v725_v42  ;;  %v4093_v9 = vmul.f32 %v3154_v35, %v5330_v14  ;;  %v1029_v34 = vmul.f32 %v3696_v48, %v4012_v40  ;;  %v1968_v52 = vmul.f32 1.442695, %v1928_v47 }
 0x15b   : > { %3179 = vrcp.f32 %v2021_v3  ;;  %v1929_v21 = vsub.f32 0.0, %v4080_v30  ;;  %v733_v55 = vmul.f32 1.442695, %v684_v39  ;;  %v4100_v44 = vadd.f32 %v5332_v43, %v3634_v51 }
 0x15c   : > { %5331 = vst [vmem:[#allocation10_spill] sm:$0xff] %v4093_v9  ;;  %v3164_v32 = vpop.eup %3163  ;;  %3181 = vpow2.f32 %v735_v63  ;;  %v4103_v41 = vmul.f32 %v3162_v26, %v3975_v0  ;;  %v2144_v35 = vadd.f32 %v4084_v7, %v4093_v9  ;;  %v1160_v29 = vadd.f32 %v1128_v8, %v1028_v20  ;;  %v4133_v20 = vld [vmem:[%s5248_s2] ss:$0 sm:$0xff] }
 0x15d   : > { %v3166_v50 = vpop.eup %3165  ;;  %v4108_v49 = vmul.f32 %v3164_v32, %v5334_v23  ;;  %3183 = vpow2.f32 %v731_v36  ;;  %v1228_v45 = vmul.f32 %v3708_v11, %v4026_v19  ;;  %v1161_v15 = vadd.f32 %v1129_v18, %v1029_v34  ;;  %5338 = vst [vmem:[#allocation19_spill] sm:$0xff] %v4133_v20  ;;  %v5357_v7 = vld [vmem:[#allocation24_spill] sm:$0xff] }
 0x15e   : > { %5333 = vst [vmem:[#allocation23_spill] sm:$0xff] %v4103_v41  ;;  %v3168_v40 = vpop.eup %3167  ;;  %3185 = vpow2.f32 %v737_v4  ;;  %v4115_v0 = vadd.f32 %v3634_v51, %v5335_v5  ;;  %v1970_v42 = vmul.f32 1.442695, %v1929_v21  ;;  %v689_v47 = vsub.f32 0.0, %v4100_v44 }
 0x15f   : > { %3187 = vpow2.f32 %v1968_v52  ;;  %960 = vst [vmem:[#allocation2 + $0xc1] sm:$0xff] %v4108_v49  ;;  %v3170_v13 = vpop.eup %3169  ;;  %v4118_v3 = vmul.f32 %v3168_v40, %v5336_v6  ;;  %v4122_v39 = vmul.f32 %v3166_v50, %v3983_v24  ;;  %v2145_v58 = vadd.f32 %v2144_v35, %v4103_v41  ;;  %v5339_v24 = vld [vmem:[#allocation13_spill] sm:$0xff]  ;;  %v5341_v52 = vld [vmem:[#allocation14_spill] sm:$0xff]  ;;  %v5344_v35 = vld [vmem:[#allocation15_spill] sm:$0xff] }
 0x160   : > { %3189 = vpow2.f32 %v733_v55  ;;  %v3172_v63 = vpop.eup %3171  ;;  %v1229_v12 = vmul.f32 %v3708_v11, %v4042_v53  ;;  %v1260_v51 = vadd.f32 %v1228_v45, %v1160_v29  ;;  %v1526_v36 = vmul.f32 %v3764_v1, %v4026_v19  ;;  %v5343_v55 = vld [vmem:[#allocation9_spill] sm:$0xff] }
 0x161   : > { %5337 = vst [vmem:[#allocation20_spill] sm:$0xff] %v4122_v39  ;;  %v2022_v26 = vadd.f32 1.0, %v3170_v13  ;;  %958 = vst [vmem:[#allocation2 + $0xa9] sm:$0xff] %v4118_v3  ;;  %v4137_v18 = vadd.f32 %v4133_v20, %v5339_v24  ;;  %v1527_v34 = vmul.f32 %v3764_v1, %v4042_v53  ;;  %v687_v19 = vsub.f32 0.0, %v4115_v0 }
 0x162   : > { %v3174_v8 = vpop.eup %3173  ;;  %v4139_v14 = vadd.f32 %v1229_v12, %v1161_v15  ;;  %v4146_v32 = vadd.f32 %v4133_v20, %v5341_v52  ;;  %3191 = vpow2.f32 %v1970_v42  ;;  %v743_v50 = vmul.f32 1.442695, %v689_v47  ;;  %v5349_v52 = vld [vmem:[#allocation17_spill] sm:$0xff] }
 0x163   : > { %5340 = vst [vmem:[#allocation11_spill] sm:$0xff] %v4137_v18  ;;  %v3176_v4 = vpop.eup %3175  ;;  %v4153_v23 = vadd.f32 %v4133_v20, %v5344_v35  ;;  %v4156_v29 = vmul.f32 %v3172_v63, %v3988_v46  ;;  %v2146_v53 = vadd.f32 %v2145_v58, %v4122_v39  ;;  %v2023_v45 = vadd.f32 1.0, %v3174_v8  ;;  %v5347_v63 = vld [vmem:[#allocation16_spill] sm:$0xff] }
 0x164   : > { %5342 = vst [vmem:[#allocation7_spill] sm:$0xff] %v4146_v32  ;;  %v3178_v21 = vpop.eup %3177  ;;  %v4149_v43 = vmul.f32 %v3176_v4, %v5343_v55  ;;  %3193 = vrcp.f32 %v2022_v26  ;;  %v1558_v13 = vadd.f32 %v1526_v36, %v4040_v56  ;;  %v4162_v42 = vadd.f32 %v1527_v34, %v4066_v2 }
 0x165   : > { %5345 = vst [vmem:[#allocation12_spill] sm:$0xff] %v4153_v23  ;;  %v3180_v40 = vpop.eup %3179  ;;  %5346 = vst [vmem:[#allocation8_spill] sm:$0xff] %v4156_v29  ;;  %v776_v15 = vadd.f32 1.0, %v3178_v21  ;;  %v690_v6 = vsub.f32 0.0, %v4137_v18  ;;  %v739_v12 = vmul.f32 1.442695, %v687_v19  ;;  %v4168_v58 = vadd.f32 %v4133_v20, %v5347_v63 }
 0x166   : > { %v3182_v5 = vpop.eup %3181  ;;  %961 = vst [vmem:[#allocation2 + $0xc9] sm:$0xff] %v4149_v43  ;;  %v688_v46 = vsub.f32 0.0, %v4146_v32  ;;  %v693_v56 = vsub.f32 0.0, %v4153_v23  ;;  %v2147_v2 = vadd.f32 %v2146_v53, %v4156_v29  ;;  %v4174_v19 = vadd.f32 %v4133_v20, %v5349_v52  ;;  %v996_v52 = vld [vmem:[#allocation2 + $0xc0] sm:$0xff] }
 0x167   : > { %v3184_v47 = vpop.eup %3183  ;;  %3195 = vrcp.f32 %v776_v15  ;;  %5348 = vst [vmem:[#allocation13_spill] sm:$0xff] %v4168_v58  ;;  %v781_v26 = vadd.f32 1.0, %v3182_v5  ;;  %v4177_v55 = vmul.f32 %v3180_v40, %v3997_v16  ;;  %v1428_v15 = vmul.f32 %v3750_v61, %v4118_v3 }
 0x168   : > { %v3186_v8 = vpop.eup %3185  ;;  %v779_v24 = vadd.f32 1.0, %v3184_v47  ;;  %3197 = vpow2.f32 %v743_v50  ;;  %v994_v4 = vld [vmem:[#allocation2 + $0xa8] sm:$0xff]  ;;  %5350 = vst [vmem:[#allocation14_spill] sm:$0xff] %v4174_v19  ;;  %v1727_v63 = vmul.f32 %v3761_v62, %v4118_v3  ;;  %v4186_v40 = vmul.f32 1.442695, %v690_v6 }
 0x169   : > { %v3188_v36 = vpop.eup %3187  ;;  %3199 = vrcp.f32 %v2023_v45  ;;  %v782_v34 = vadd.f32 1.0, %v3186_v8  ;;  %5351 = vst [vmem:[#allocation9_spill] sm:$0xff] %v4177_v55  ;;  %v1328_v35 = vmul.f32 %v3755_v57, %v994_v4  ;;  %v1627_v50 = vmul.f32 %v3758_v60, %v994_v4 }
 0x16a   : > { %v3190_v21 = vpop.eup %3189  ;;  %3201 = vrcp.f32 %v781_v26  ;;  %v691_v45 = vsub.f32 0.0, %v4168_v58  ;;  %v2024_v16 = vadd.f32 1.0, %v3188_v36  ;;  %v694_v8 = vsub.f32 0.0, %v4174_v19 }
 0x16b   : > { %3203 = vrcp.f32 %v779_v24  ;;  %v780_v53 = vadd.f32 1.0, %v3190_v21  ;;  %v1360_v5 = vadd.f32 %v1328_v35, %v1260_v51  ;;  %v1659_v47 = vadd.f32 %v1627_v50, %v1558_v13  ;;  %v5352_v51 = vld [vmem:[#allocation18_spill] sm:$0xff] }
 0x16c   : > { %3205 = vrcp.f32 %v782_v34  ;;  %v3192_v26 = vpop.eup %3191  ;;  %v4193_v21 = vmul.f32 1.442695, %v688_v46  ;;  %v4197_v13 = vadd.f32 %v4133_v20, %v5352_v51  ;;  %v1132_v36 = vmul.f32 %v3700_v59, %v4108_v49 }
 0x16d   : > { %3207 = vrcp.f32 %v780_v53  ;;  %v4189_v29 = vadd.f32 %v1428_v15, %v1360_v5  ;;  %v4191_v24 = vadd.f32 %v1727_v63, %v1659_v47  ;;  %v4203_v6 = vmul.f32 %v3750_v61, %v4108_v49  ;;  %v997_v35 = vld [vmem:[#allocation2 + $0xc8] sm:$0xff] }
 0x16e   : > { %5353 = vst [vmem:[#allocation15_spill] sm:$0xff] %v4197_v13  ;;  %v4207_v34 = vmul.f32 %v3761_v62, %v4108_v49  ;;  %3209 = vpow2.f32 %v739_v12  ;;  %v3194_v50 = vpop.eup %3193  ;;  %v2148_v46 = vadd.f32 %v2147_v2, %v4177_v55  ;;  %v1130_v15 = vmul.f32 %v3700_v59, %v4118_v3  ;;  %v1196_v41 = vld [vmem:[#allocation2 + $0xc2] sm:$0xff] }
 0x16f   : > { %v4212_v53 = vmul.f32 1.442695, %v693_v56  ;;  %v4214_v5 = vmul.f32 1.442695, %v691_v45  ;;  %v2025_v63 = vadd.f32 1.0, %v3192_v26  ;;  %3211 = vrcp.f32 %v2024_v16  ;;  %v5355_v3 = vld [vmem:[#allocation21_spill] sm:$0xff] }
 0x170   : > { %v1032_v51 = vmul.f32 %v3696_v48, %v996_v52  ;;  %v4217_v39 = vmul.f32 1.442695, %v694_v8  ;;  %v1033_v12 = vmul.f32 %v3696_v48, %v997_v35  ;;  %v692_v55 = vsub.f32 0.0, %v4197_v13  ;;  %v1197_v13 = vld [vmem:[#allocation2 + $0xca] sm:$0xff] }
 0x171   : > { %v3196_v47 = vpop.eup %3195  ;;  %v4224_v56 = vadd.f32 %v4133_v20, %v5355_v3  ;;  %v1030_v26 = vmul.f32 %v3696_v48, %v994_v4  ;;  %v1133_v16 = vmul.f32 %v3700_v59, %v4149_v43  ;;  %v4231_v8 = vmul.f32 %v3750_v61, %v4149_v43 }
 0x172   : > { %5354 = vst [vmem:[#allocation16_spill] sm:$0xff] %v4217_v39  ;;  %v3198_v49 = vpop.eup %3197  ;;  %v872_v2 = vmul.f32 %v3196_v47, %v5325_v54  ;;  %v4235_v9 = vadd.f32 %v4133_v20, %v5357_v7  ;;  %v4238_v47 = vmul.f32 %v3194_v50, %v4045_v31  ;;  %v4241_v3 = vmul.f32 %v3755_v57, %v996_v52 }
 0x173   : > { %5356 = vst [vmem:[#allocation17_spill] sm:$0xff] %v4224_v56  ;;  %v3200_v45 = vpop.eup %3199  ;;  %v4244_v4 = vmul.f32 %v3758_v60, %v996_v52  ;;  %v4248_v19 = vmul.f32 %v3761_v62, %v4149_v43  ;;  %3213 = vrcp.f32 %v2025_v63  ;;  %v1164_v7 = vadd.f32 %v1132_v36, %v1032_v51  ;;  %v5361_v63 = vld [vmem:[#allocation25_spill] sm:$0xff] }
 0x174   : > { %5358 = vst [vmem:[#allocation18_spill] sm:$0xff] %v4235_v9  ;;  %v3202_v54 = vpop.eup %3201  ;;  %5359 = vst [vmem:[#allocation21_spill] sm:$0xff] %v4238_v47  ;;  %v1232_v23 = vmul.f32 %v3708_v11, %v1196_v41  ;;  %v1165_v32 = vadd.f32 %v1133_v16, %v1033_v12  ;;  %v785_v52 = vadd.f32 1.0, %v3198_v49  ;;  %v4257_v9 = vmul.f32 1.442695, %v692_v55 }
 0x175   : > { %959 = vst [vmem:[#allocation2 + $0xb1] sm:$0xff] %v872_v2  ;;  %v3204_v58 = vpop.eup %3203  ;;  %v4252_v31 = vmul.f32 %v3202_v54, %v3866_v10  ;;  %v1162_v43 = vadd.f32 %v1130_v15, %v1030_v26  ;;  %v1233_v39 = vmul.f32 %v3708_v11, %v1197_v13  ;;  %v4266_v10 = vadd.f32 %v4133_v20, %v5361_v63 }
 0x176   : > { %v3206_v50 = vpop.eup %3205  ;;  %v4255_v18 = vmul.f32 %v3204_v58, %v5324_v25  ;;  %5360 = vst [vmem:[#allocation24_spill] sm:$0xff] %v4257_v9  ;;  %v4269_v51 = vmul.f32 %v3200_v45, %v4063_v38  ;;  %v4272_v25 = vadd.f32 %v2148_v46, %v4238_v47  ;;  %v4275_v58 = vmul.f32 %v3755_v57, %v997_v35  ;;  %v2184_v38 = vld [vmem:[%s5251_s5 + $0x8] sm:$0xff] }
 0x177   : > { %v3208_v56 = vpop.eup %3207  ;;  %964 = vst [vmem:[#allocation2 + $0xf1] sm:$0xff] %v4252_v31  ;;  %v4262_v36 = vmul.f32 %v3206_v50, %v4054_v33  ;;  %5362 = vst [vmem:[#allocation25_spill] sm:$0xff] %v4266_v10  ;;  %v2183_v33 = vld [vmem:[%s5251_s5] sm:$0xff]  ;;  %v4287_v49 = vadd.f32 %v1232_v23, %v1164_v7  ;;  %v4290_v46 = vmul.f32 %v3764_v1, %v1196_v41  ;;  %3215 = vrcp.f32 %v785_v52 }
 0x178   : > { %5363 = vst [vmem:[#allocation27_spill] sm:$0xff] %v4269_v51  ;;  %962 = vst [vmem:[#allocation2 + $0xd9] sm:$0xff] %v4255_v18  ;;  %v4279_v55 = vmul.f32 %v3208_v56, %v4058_v27  ;;  %v3210_v15 = vpop.eup %3209  ;;  %v4293_v12 = vmul.f32 %v3764_v1, %v1197_v13  ;;  %v1630_v27 = vmul.f32 %v3758_v60, %v997_v35  ;;  %v5286_v63 = vmov 0.0|0.0  }
 0x179   : > { %965 = vst [vmem:[#allocation2 + $0xf9] sm:$0xff] %v4262_v36  ;;  %v4297_v56 = vadd.f32 %v1233_v39, %v1165_v32  ;;  %v1829_v45 = vmul.f32 %v3826_v37, %v1196_v41  ;;  %v4301_v26 = vmul.f32 %v3826_v37, %v1197_v13  ;;  %v4304_v23 = vpop.eup %3211  ;;  %v1131_v54 = vmul.f32 %v3700_v59, %v872_v2 }
 0x17a   : > { %963 = vst [vmem:[#allocation2 + $0xe1] sm:$0xff] %v4279_v55  ;;  %v1429_v35 = vmul.f32 %v3750_v61, %v872_v2  ;;  %v3014_v50 = vpack.c.bf16 %v2184_v38, %v2183_v33  ;;  %v1728_v41 = vmul.f32 %v3761_v62, %v872_v2  ;;  %v783_v13 = vadd.f32 1.0, %v3210_v15  ;;  %3013 = vmatprep.subr.bf16.mxu0 %v5286_v63 }
 0x17b   : > { %3217 = vpow2.f32 %v4186_v40  ;;  %v4327_v40 = vmul.f32 %v3750_v61, %v4252_v31 }
 0x17c   : > { %v995_v16 = vld [vmem:[#allocation2 + $0xb0] sm:$0xff]  ;;  %3015 = vmatpush3.bf16.msra.mxu0 %v3014_v50  ;;  %3219 = vpow2.f32 %v4193_v21  ;;  %v4333_v21 = vmul.f32 %v3761_v62, %v4252_v31 }
 0x17d   : > { %v1194_v7 = vld [vmem:[#allocation2 + $0xaa] sm:$0xff]  ;;  %v1329_v32 = vmul.f32 %v3755_v57, %v995_v16  ;;  %v1195_v52 = vld [vmem:[#allocation2 + $0xb2] sm:$0xff]  ;;  %v1628_v10 = vmul.f32 %v3758_v60, %v995_v16  ;;  %v1031_v33 = vmul.f32 %v3696_v48, %v995_v16  ;;  %3016 = vmatprep.subr.bf16.mxu0 %v5286_v63  ;;  %v4320_v2 = vpop.eup %3213  ;;  %3221 = vrcp.f32 %v783_v13 }
 0x17e   : > { %v1230_v39 = vmul.f32 %v3708_v11, %v1194_v7  ;;  %v1528_v47 = vmul.f32 %v3764_v1, %v1194_v7  ;;  %v1827_v9 = vmul.f32 %v3826_v37, %v1194_v7 }
 0x17f   : > { %v1361_v20 = vadd.f32 %v1329_v32, %v4139_v14  ;;  %v1660_v28 = vadd.f32 %v1628_v10, %v4162_v42  ;;  %v1529_v14 = vmul.f32 %v3764_v1, %v1195_v52  ;;  %v998_v50 = vld [vmem:[#allocation2 + $0xd8] sm:$0xff]  ;;  %v1828_v42 = vmul.f32 %v3826_v37, %v1195_v52 }
 0x180   : > { %v1262_v38 = vadd.f32 %v1230_v39, %v1162_v43  ;;  %v1560_v15 = vadd.f32 %v1528_v47, %v4189_v29  ;;  %v1859_v7 = vadd.f32 %v1827_v9, %v4191_v24  ;;  %v1163_v24 = vadd.f32 %v1131_v54, %v1031_v33 }
 0x181   : > { %v1461_v16 = vadd.f32 %v1429_v35, %v1361_v20  ;;  %v1760_v47 = vadd.f32 %v1728_v41, %v1660_v28  ;;  %v1134_v20 = vmul.f32 %v3700_v59, %v4255_v18  ;;  %v1332_v28 = vmul.f32 %v3755_v57, %v998_v50 }
 0x182   : > { %v1362_v43 = vadd.f32 %v4241_v3, %v1262_v38  ;;  %v1661_v29 = vadd.f32 %v4244_v4, %v1560_v15  ;;  %v4338_v9 = vadd.f32 %v3856_v17, %v1859_v7  ;;  %v1432_v3 = vmul.f32 %v3750_v61, %v4255_v18  ;;  %v4347_v4 = vpop.eup %3215 }
 0x183   : > { %v1561_v10 = vadd.f32 %v1529_v14, %v1461_v16  ;;  %v1860_v39 = vadd.f32 %v1828_v42, %v1760_v47  ;;  %v1231_v37 = vmul.f32 %v3708_v11, %v1195_v52 }
 0x184   : > { %v1761_v35 = vadd.f32 %v4207_v34, %v1661_v29  ;;  %v1930_v32 = vsub.f32 0.0, %v4338_v9  ;;  %v1462_v54 = vadd.f32 %v4203_v6, %v1362_v43  ;;  %v1364_v34 = vadd.f32 %v1332_v28, %v4287_v49 }
 0x185   : > { %v1662_v41 = vadd.f32 %v1630_v27, %v1561_v10  ;;  %v4352_v38 = vadd.f32 %v3856_v17, %v1860_v39  ;;  %v1263_v7 = vadd.f32 %v1231_v37, %v1163_v24  ;;  %v1631_v29 = vmul.f32 %v3758_v60, %v998_v50  ;;  %v4358_v47 = vpop.eup %3217  ;;  %v999_v10 = vld [vmem:[#allocation2 + $0xe0] sm:$0xff] }
 0x186   : > { %v1861_v33 = vadd.f32 %v1829_v45, %v1761_v35  ;;  %v1972_v15 = vmul.f32 1.442695, %v1930_v32  ;;  %v1562_v14 = vadd.f32 %v4290_v46, %v1462_v54  ;;  %v1034_v45 = vmul.f32 %v3696_v48, %v998_v50  ;;  %v4365_v52 = vpop.eup %3219  ;;  %v1000_v35 = vld [vmem:[#allocation2 + $0xf0] sm:$0xff]  ;;  %v4386_v54 = vld [vmem:[#allocation2 + $0xf8] sm:$0xff] }
 0x187   : > { %v1762_v16 = vadd.f32 %v4248_v19, %v1662_v41  ;;  %v1931_v6 = vsub.f32 0.0, %v4352_v38  ;;  %v1464_v13 = vadd.f32 %v1432_v3, %v1364_v34  ;;  %v1731_v19 = vmul.f32 %v3761_v62, %v4255_v18  ;;  %v1198_v18 = vld [vmem:[#allocation2 + $0xda] sm:$0xff]  ;;  %v3222_v34 = vpop.eup %3221 }
 0x188   : > { %v4361_v27 = vadd.f32 %v3856_v17, %v1861_v33  ;;  %v1663_v43 = vadd.f32 %v1631_v29, %v1562_v14  ;;  %v4372_v46 = vmul.f32 %v3761_v62, %v4262_v36  ;;  %3223 = vpow2.f32 %v1972_v15  ;;  %v1199_v33 = vld [vmem:[#allocation2 + $0xe2] sm:$0xff] }
 0x189   : > { %v1862_v49 = vadd.f32 %v4301_v26, %v1762_v16  ;;  %v1974_v24 = vmul.f32 1.442695, %v1931_v6  ;;  %v1135_v50 = vmul.f32 %v3700_v59, %v4279_v55  ;;  %v1363_v3 = vadd.f32 %v4275_v58, %v1263_v7 }
 0x18a   : > { %v1932_v42 = vsub.f32 0.0, %v4361_v27  ;;  %v1763_v39 = vadd.f32 %v1731_v19, %v1663_v43  ;;  %3225 = vpow2.f32 %v4212_v53  ;;  %v1166_v28 = vadd.f32 %v1134_v20, %v1034_v45 }
 0x18b   : > { %v4379_v26 = vadd.f32 %v3856_v17, %v1862_v49  ;;  %v1433_v37 = vmul.f32 %v3750_v61, %v4279_v55  ;;  %3227 = vpow2.f32 %v4214_v5  ;;  %v1035_v17 = vmul.f32 %v3696_v48, %v999_v10 }
 0x18c   : > { %v1976_v32 = vmul.f32 1.442695, %v1932_v42  ;;  %3229 = vpow2.f32 %v1974_v24  ;;  %v1732_v58 = vmul.f32 %v3761_v62, %v4279_v55  ;;  %v1334_v53 = vmul.f32 %v3755_v57, %v1000_v35 }
 0x18d   : > { %v1933_v41 = vsub.f32 0.0, %v4379_v26  ;;  %v1234_v20 = vmul.f32 %v3708_v11, %v1198_v18  ;;  %v1333_v15 = vmul.f32 %v3755_v57, %v999_v10  ;;  %v1167_v7 = vadd.f32 %v1135_v50, %v1035_v17 }
 0x18e   : > { %3231 = vpow2.f32 %v1976_v32  ;;  %v1463_v16 = vadd.f32 %v4231_v8, %v1363_v3  ;;  %v1532_v14 = vmul.f32 %v3764_v1, %v1198_v18  ;;  %v1633_v29 = vmul.f32 %v3758_v60, %v1000_v35  ;;  %v4407_v3 = vld [vmem:[%s5249_s3 + $0x8] ss:$0 sm:$0xff] }
 0x18f   : > { %v1978_v5 = vmul.f32 1.442695, %v1933_v41  ;;  %v1634_v55 = vmul.f32 %v3758_v60, %v4386_v54  ;;  %v1266_v6 = vadd.f32 %v1234_v20, %v1166_v28  ;;  %v1365_v45 = vadd.f32 %v1333_v15, %v4297_v56  ;;  %v1200_v56 = vld [vmem:[#allocation2 + $0xf2] sm:$0xff]  ;;  %v4419_v15 = vld [vmem:[#allocation2 + $0xfa] sm:$0xff] }
 0x190   : > { %v1235_v49 = vmul.f32 %v3708_v11, %v1199_v33  ;;  %v1563_v43 = vadd.f32 %v4293_v12, %v1463_v16  ;;  %v1564_v19 = vadd.f32 %v1532_v14, %v1464_v13  ;;  %v1632_v42 = vmul.f32 %v3758_v60, %v999_v10 }
 0x191   : > { %v1366_v24 = vadd.f32 %v1334_v53, %v1266_v6  ;;  %v1465_v50 = vadd.f32 %v1433_v37, %v1365_v45  ;;  %v1533_v8 = vmul.f32 %v3764_v1, %v1199_v33  ;;  %v1831_v32 = vmul.f32 %v4407_v3, %v1198_v18 }
 0x192   : > { %3233 = vpow2.f32 %v1978_v5  ;;  %v1267_v28 = vadd.f32 %v1235_v49, %v1167_v7  ;;  %v1664_v41 = vadd.f32 %v1632_v42, %v1563_v43  ;;  %v1665_v17 = vadd.f32 %v1633_v29, %v1564_v19  ;;  %v3224_v12 = vpop.eup %3223 }
 0x193   : > { %v1565_v13 = vadd.f32 %v1533_v8, %v1465_v50  ;;  %v1863_v20 = vadd.f32 %v1831_v32, %v1763_v39  ;;  %v4412_v10 = vmul.f32 %v4347_v4, %v4100_v44  ;;  %v4415_v37 = vmul.f32 %v3222_v34, %v4115_v0  ;;  %v4431_v0 = vld [vmem:[%s5250_s4] ss:$0 sm:$0xff] }
 0x194   : > { %v4417_v53 = vpop.eup %3225  ;;  %v1764_v18 = vadd.f32 %v1732_v58, %v1664_v41  ;;  %v1765_v5 = vadd.f32 %v4333_v21, %v1665_v17  ;;  %v1832_v7 = vmul.f32 %v4407_v3, %v1199_v33  ;;  %v1466_v16 = vadd.f32 %v4327_v40, %v1366_v24 }
 0x195   : > { %v4424_v14 = vpop.eup %3227  ;;  %v1036_v39 = vmul.f32 %v3696_v48, %v1000_v35  ;;  %v1833_v44 = vmul.f32 %v4407_v3, %v1200_v56  ;;  %v1666_v4 = vadd.f32 %v1634_v55, %v1565_v13  ;;  %v4434_v58 = vadd.f32 %v4431_v0, %v1863_v20  ;;  %968 = vst [vmem:[#allocation2 + $0x121] sm:$0xff] %v4412_v10 }
 0x196   : > { %966 = vst [vmem:[#allocation2 + $0x109] sm:$0xff] %v4415_v37  ;;  %v3230_v40 = vpop.eup %3229  ;;  %v2026_v21 = vadd.f32 1.0, %v3224_v12  ;;  %v1136_v35 = vmul.f32 %v3700_v59, %v4252_v31  ;;  %v1335_v33 = vmul.f32 %v3755_v57, %v4386_v54  ;;  %v1864_v34 = vadd.f32 %v1832_v7, %v1764_v18  ;;  %v5368_v7 = vld [vmem:[#allocation19_spill] sm:$0xff] }
 0x197   : > { %v1834_v55 = vmul.f32 %v4407_v3, %v4419_v15  ;;  %v1766_v6 = vadd.f32 %v4372_v46, %v1666_v4  ;;  %v1865_v45 = vadd.f32 %v1833_v44, %v1765_v5  ;;  %v1934_v49 = vsub.f32 0.0, %v4434_v58 }
 0x198   : > { %v3232_v29 = vpop.eup %3231  ;;  %v4448_v43 = vmul.f32 %v4304_v23, %v4069_v22  ;;  %v1435_v31 = vmul.f32 %v3750_v61, %v4262_v36  ;;  %v1367_v19 = vadd.f32 %v1335_v33, %v1267_v28  ;;  %v4453_v42 = vadd.f32 %v4431_v0, %v1864_v34 }
 0x199   : > { %v2027_v24 = vadd.f32 1.0, %v3230_v40  ;;  %v1168_v50 = vadd.f32 %v1136_v35, %v1036_v39  ;;  %v1236_v8 = vmul.f32 %v3708_v11, %v1200_v56  ;;  %v1866_v32 = vadd.f32 %v1834_v55, %v1766_v6 }
 0x19a   : > { %5364 = vst [vmem:[#allocation28_spill] sm:$0xff] %v4448_v43  ;;  %v2028_v46 = vadd.f32 1.0, %v3232_v29  ;;  %3235 = vrcp.f32 %v2026_v21  ;;  %v1935_v41 = vsub.f32 0.0, %v4453_v42  ;;  %v786_v17 = vadd.f32 1.0, %v4358_v47  ;;  %v2186_v29 = vld [vmem:[%s5251_s5 + $0x18] sm:$0xff] }
 0x19b   : > { %v2150_v22 = vadd.f32 %v4272_v25, %v4269_v51  ;;  %v4462_v23 = vmul.f32 %v4320_v2, %v4080_v30  ;;  %v4465_v28 = vadd.f32 %v4431_v0, %v1865_v45  ;;  %v1980_v12 = vmul.f32 1.442695, %v1934_v49  ;;  %v5367_v2 = vld [vmem:[#allocation26_spill] sm:$0xff] }
 0x19c   : > { %v3234_v13 = vpop.eup %3233  ;;  %v1534_v20 = vmul.f32 %v3764_v1, %v1200_v56  ;;  %3237 = vrcp.f32 %v786_v17  ;;  %v784_v5 = vadd.f32 1.0, %v4365_v52  ;;  %v4471_v47 = vadd.f32 %v1435_v31, %v1367_v19 }
 0x19d   : > { %5365 = vst [vmem:[#allocation29_spill] sm:$0xff] %v4462_v23  ;;  %v4468_v18 = vld [vmem:[#allocation2 + $0x108] sm:$0xff]  ;;  %3239 = vrcp.f32 %v2027_v24  ;;  %v4474_v25 = vadd.f32 %v4431_v0, %v1866_v32  ;;  %v1982_v30 = vmul.f32 1.442695, %v1935_v41  ;;  %v4478_v39 = vadd.f32 %v5368_v7, %v5367_v2  ;;  %v5370_v24 = vld [vmem:[#allocation16_spill] sm:$0xff] }
 0x19e   : > { %3241 = vrcp.f32 %v2028_v46  ;;  %v1268_v44 = vadd.f32 %v1236_v8, %v1168_v50  ;;  %v1336_v56 = vmul.f32 %v3755_v57, %v4468_v18  ;;  %v1566_v4 = vadd.f32 %v1534_v20, %v1466_v16  ;;  %v2185_v16 = vld [vmem:[%s5251_s5 + $0x10] sm:$0xff]  ;;  %v2187_v50 = vld [vmem:[%s5251_s5 + $0x20] sm:$0xff]  ;;  %v2188_v8 = vld [vmem:[%s5251_s5 + $0x28] sm:$0xff] }
 0x19f   : > { %5366 = vst [vmem:[#allocation30_spill] sm:$0xff] %v4474_v25  ;;  %5369 = vst [vmem:[#allocation26_spill] sm:$0xff] %v4478_v39  ;;  %v2151_v40 = vadd.f32 %v2150_v22, %v4448_v43  ;;  %v1936_v52 = vsub.f32 0.0, %v4465_v28  ;;  %3243 = vpow2.f32 %v1980_v12  ;;  %v1436_v21 = vmul.f32 %v3750_v61, %v4415_v37  ;;  %v5371_v46 = vld [vmem:[#allocation17_spill] sm:$0xff]  ;;  %v5372_v12 = vld [vmem:[#allocation18_spill] sm:$0xff] }
 0x1a0   : > { %v1368_v35 = vadd.f32 %v1336_v56, %v1268_v44  ;;  %v1635_v33 = vmul.f32 %v3758_v60, %v4468_v18  ;;  %v1735_v34 = vmul.f32 %v3761_v62, %v4415_v37  ;;  %3245 = vrcp.f32 %v784_v5  ;;  %v5373_v5 = vld [vmem:[#allocation24_spill] sm:$0xff] }
 0x1a1   : > { %v2029_v55 = vadd.f32 1.0, %v3234_v13  ;;  %v1937_v6 = vsub.f32 0.0, %v4474_v25  ;;  %3247 = vpow2.f32 %v1982_v30  ;;  %v789_v45 = vadd.f32 1.0, %v4417_v53  ;;  %v5374_v30 = vld [vmem:[#allocation25_spill] sm:$0xff] }
 0x1a2   : > { %v4498_v49 = vadd.f32 %v1436_v21, %v1368_v35  ;;  %v1667_v31 = vadd.f32 %v1635_v33, %v1566_v4  ;;  %v787_v19 = vadd.f32 1.0, %v4424_v14  ;;  %3249 = vpow2.f32 %v5370_v24  ;;  %v2190_v21 = vld [vmem:[%s5251_s5 + $0x38] sm:$0xff]  ;;  %v1004_v24 = vld [vmem:[#allocation2 + $0x120] sm:$0xff] }
 0x1a3   : > { %v1984_v32 = vmul.f32 1.442695, %v1936_v52  ;;  %3251 = vrcp.f32 %v789_v45  ;;  %v697_v41 = vsub.f32 0.0, %v5371_v46  ;;  %v3017_v53 = vpack.c.bf16 %v2186_v29, %v2185_v16  ;;  %v2189_v52 = vld [vmem:[%s5251_s5 + $0x30] sm:$0xff]  ;;  %v4533_v29 = vld [vmem:[#allocation2] sm:$0xff] }
 0x1a4   : > { %v3236_v17 = vpop.eup %3235  ;;  %v1037_v22 = vmul.f32 %v3696_v48, %v4386_v54  ;;  %v4511_v14 = vadd.f32 %v1735_v34, %v1667_v31  ;;  %3253 = vrcp.f32 %v787_v19  ;;  %v695_v13 = vsub.f32 0.0, %v5372_v12  ;;  %2957 = vmatprep.mubr.msk.f32.mxu0 %vm3458_vm1, %v4533_v29 }
 0x1a5   : > { %v1986_v20 = vmul.f32 1.442695, %v1937_v6  ;;  %3255 = vpow2.f32 %v5373_v5  ;;  %v698_v2 = vsub.f32 0.0, %v5374_v30  ;;  %3018 = vmatpush3.bf16.msra.mxu0 %v3017_v53  ;;  %v3020_v7 = vpack.c.bf16 %v2188_v8, %v2187_v50  ;;  %v2191_v8 = vld [vmem:[%s5251_s5 + $0x40] sm:$0xff] }
 0x1a6   : > { %v3238_v44 = vpop.eup %3237  ;;  %3257 = vrcp.f32 %v2029_v55  ;;  %v2152_v56 = vadd.f32 %v2151_v40, %v4462_v23  ;;  %v1137_v4 = vmul.f32 %v3700_v59, %v4262_v36  ;;  %v696_v54 = vsub.f32 0.0, %v4478_v39  ;;  %3019 = vmatprep.subr.bf16.mxu0 %v5286_v63  ;;  %v5376_v40 = vld [vmem:[#allocation11_spill] sm:$0xff] }
 0x1a7   : > { %v3240_v35 = vpop.eup %3239  ;;  %v4528_v33 = vmul.f32 %v3236_v17, %v4338_v9  ;;  %3259 = vpow2.f32 %v1984_v32  ;;  %v4531_v34 = vmul.f32 %v3238_v44, %v5376_v40  ;;  %v759_v6 = vmul.f32 1.442695, %v697_v41  ;;  %v2192_v32 = vld [vmem:[%s5251_s5 + $0x48] sm:$0xff] }
 0x1a8   : > { %v3242_v36 = vpop.eup %3241  ;;  %v1169_v16 = vadd.f32 %v1137_v4, %v1037_v22  ;;  %3261 = vpow2.f32 %v1986_v20  ;;  %v755_v45 = vmul.f32 1.442695, %v695_v13  ;;  %v3023_v9 = vpack.c.bf16 %v2190_v21, %v2189_v52  ;;  %v5378_v22 = vld [vmem:[#allocation7_spill] sm:$0xff] }
 0x1a9   : > { %5375 = vst [vmem:[#allocation19_spill] sm:$0xff] %v4528_v33  ;;  %v3244_v55 = vpop.eup %3243  ;;  %969 = vst [vmem:[#allocation2 + $0x129] sm:$0xff] %v4531_v34  ;;  %3021 = vmatpush3.bf16.msra.mxu0 %v3020_v7  ;;  %v1237_v19 = vmul.f32 %v3708_v11, %v4419_v15  ;;  %v761_v50 = vmul.f32 1.442695, %v698_v2  ;;  %v4548_v53 = vmul.f32 %v3240_v35, %v4352_v38  ;;  %v4554_v20 = vmul.f32 1.442695, %v696_v54 }
 0x1aa   : > { %v3246_v31 = vpop.eup %3245  ;;  %3022 = vmatprep.subr.bf16.mxu0 %v5286_v63  ;;  %v2153_v17 = vadd.f32 %v2152_v56, %v4528_v33  ;;  %v1535_v7 = vmul.f32 %v3764_v1, %v4419_v15  ;;  %v1140_v44 = vmul.f32 %v3700_v59, %v4412_v10  ;;  %v4564_v38 = vmul.f32 %v3750_v61, %v4412_v10 }
 0x1ab   : > { %v3248_v41 = vpop.eup %3247  ;;  %5377 = vst [vmem:[#allocation16_spill] sm:$0xff] %v4548_v53  ;;  %v4552_v13 = vmul.f32 %v3246_v31, %v5378_v22  ;;  %v4556_v2 = vadd.f32 %v1237_v19, %v1169_v16  ;;  %v1040_v56 = vmul.f32 %v3696_v48, %v1004_v24  ;;  %v4569_v54 = vmul.f32 %v3761_v62, %v4412_v10  ;;  %v5379_v31 = vld [vmem:[#allocation12_spill] sm:$0xff]  ;;  %v2193_v10 = vld [vmem:[%s5251_s5 + $0x50] sm:$0xff] }
 0x1ac   : > { %v3250_v5 = vpop.eup %3249  ;;  %v3026_v21 = vpack.c.bf16 %v2192_v32, %v2191_v8  ;;  %v2030_v35 = vadd.f32 1.0, %v3244_v55  ;;  %v1038_v40 = vmul.f32 %v3696_v48, %v4468_v18  ;;  %v1138_v16 = vmul.f32 %v3700_v59, %v4415_v37  ;;  %v5381_v37 = vld [vmem:[#allocation13_spill] sm:$0xff]  ;;  %v2195_v22 = vld [vmem:[%s5251_s5 + $0x60] sm:$0xff] }
 0x1ad   : > { %v3252_v4 = vpop.eup %3251  ;;  %967 = vst [vmem:[#allocation2 + $0x111] sm:$0xff] %v4552_v13  ;;  %v790_v52 = vadd.f32 1.0, %v3250_v5  ;;  %3024 = vmatpush3.bf16.msra.mxu0 %v3023_v9  ;;  %v2194_v9 = vld [vmem:[%s5251_s5 + $0x58] sm:$0xff]  ;;  %v4587_v8 = vmul.f32 %v3242_v36, %v4361_v27  ;;  %v2154_v18 = vadd.f32 %v2153_v17, %v4548_v53  ;;  %3263 = vpow2.f32 %v759_v6  ;;  %v2196_v5 = vld [vmem:[%s5251_s5 + $0x68] sm:$0xff]  ;;  %v4605_v36 = vld [vmem:[%s5251_s5 + $0x70] sm:$0xff] }
 0x1ae   : > { %v3254_v15 = vpop.eup %3253  ;;  %v4577_v19 = vmul.f32 %v3252_v4, %v5379_v31  ;;  %3025 = vmatprep.subr.bf16.mxu0 %v5286_v63  ;;  %v2031_v31 = vadd.f32 1.0, %v3248_v41  ;;  %v1338_v63 = vmul.f32 %v3755_v57, %v1004_v24  ;;  %v1637_v27 = vmul.f32 %v3758_v60, %v1004_v24  ;;  %v4610_v6 = vld [vmem:[%s5251_s5 + $0x78] sm:$0xff] }
 0x1af   : > { %v3256_v55 = vpop.eup %3255  ;;  %5380 = vst [vmem:[#allocation17_spill] sm:$0xff] %v4587_v8  ;;  %v4591_v32 = vmul.f32 %v3254_v15, %v5381_v37  ;;  %3265 = vpow2.f32 %v755_v45  ;;  %v4612_v15 = vadd.f32 %v1140_v44, %v1040_v56  ;;  %v3029_v41 = vpack.c.bf16 %v2194_v9, %v2193_v10 }
 0x1b0   : > { %v3258_v4 = vpop.eup %3257  ;;  %972 = vst [vmem:[#allocation2 + $0x151] sm:$0xff] %v4577_v19  ;;  %3267 = vrcp.f32 %v790_v52  ;;  %v788_v24 = vadd.f32 1.0, %v3256_v55  ;;  %v1170_v45 = vadd.f32 %v1138_v16, %v1038_v40  ;;  %v1567_v37 = vadd.f32 %v1535_v7, %v4471_v47  ;;  %v4641_v9 = vld [vmem:[#allocation2 + $0x122] sm:$0xff] }
 0x1b1   : > { %v3260_v17 = vpop.eup %3259  ;;  %970 = vst [vmem:[#allocation2 + $0x139] sm:$0xff] %v4591_v32  ;;  %3027 = vmatpush3.bf16.msra.mxu0 %v3026_v21  ;;  %3269 = vrcp.f32 %v2030_v35  ;;  %v5382_v53 = vmov 0.0|0.0   ;;  %v3032_v33 = vpack.c.bf16 %v2196_v5, %v2195_v22  ;;  %v4618_v43 = vadd.f32 %v2154_v18, %v4587_v8 }
 0x1b2   : > { %3028 = vmatprep.subr.bf16.mxu0 %v5382_v53  ;;  %v3262_v23 = vpop.eup %3261  ;;  %v4621_v44 = vmul.f32 %v3258_v4, %v4379_v26  ;;  %3271 = vpow2.f32 %v761_v50  ;;  %v3035_v56 = vpack.c.bf16 %v4610_v6, %v4605_v36  ;;  %v4625_v52 = vadd.f32 1.0, %v3260_v17 }
 0x1b3   : > { %3273 = vrcp.f32 %v2031_v31  ;;  %v4629_v47 = vmul.f32 %v3700_v59, %v4531_v34  ;;  %v4633_v7 = vmul.f32 %v3761_v62, %v4531_v34  ;;  %v1139_v50 = vmul.f32 %v3700_v59, %v4552_v13 }
 0x1b4   : > { %v1003_v21 = vld [vmem:[#allocation2 + $0x110] sm:$0xff]  ;;  %3275 = vrcp.f32 %v788_v24  ;;  %v4639_v10 = vadd.f32 1.0, %v3262_v23  ;;  %v1437_v18 = vmul.f32 %v3750_v61, %v4552_v13  ;;  %v1736_v36 = vmul.f32 %v3761_v62, %v4552_v13  ;;  %v1005_v23 = vld [vmem:[#allocation2 + $0x128] sm:$0xff] }
 0x1b5   : > { %v1202_v35 = vld [vmem:[#allocation2 + $0x10a] sm:$0xff]  ;;  %v1039_v26 = vmul.f32 %v3696_v48, %v1003_v21  ;;  %v1203_v40 = vld [vmem:[#allocation2 + $0x112] sm:$0xff]  ;;  %3030 = vmatpush3.bf16.msra.mxu0 %v3029_v41  ;;  %v1337_v55 = vmul.f32 %v3755_v57, %v1003_v21  ;;  %v1636_v31 = vmul.f32 %v3758_v60, %v1003_v21  ;;  %v1240_v51 = vmul.f32 %v3708_v11, %v4641_v9 }
 0x1b6   : > { %v1238_v16 = vmul.f32 %v3708_v11, %v1202_v35  ;;  %v1536_v22 = vmul.f32 %v3764_v1, %v1202_v35  ;;  %3031 = vmatprep.subr.bf16.mxu0 %v5382_v53  ;;  %v1239_v6 = vmul.f32 %v3708_v11, %v1203_v40  ;;  %v1835_v41 = vmul.f32 %v4407_v3, %v1202_v35 }
 0x1b7   : > { %v1171_v5 = vadd.f32 %v1139_v50, %v1039_v26  ;;  %v1369_v17 = vadd.f32 %v1337_v55, %v4556_v2  ;;  %v3264_v8 = vpop.eup %3263  ;;  %v1668_v21 = vadd.f32 %v1636_v31, %v1567_v37  ;;  %v1339_v35 = vmul.f32 %v3755_v57, %v1005_v23 }
 0x1b8   : > { %v1270_v4 = vadd.f32 %v1238_v16, %v1170_v45  ;;  %v1568_v24 = vadd.f32 %v1536_v22, %v4498_v49  ;;  %v1537_v45 = vmul.f32 %v3764_v1, %v1203_v40  ;;  %v1867_v25 = vadd.f32 %v1835_v41, %v4511_v14  ;;  %v1006_v2 = vld [vmem:[#allocation2 + $0x138] sm:$0xff] }
 0x1b9   : > { %3033 = vmatpush3.bf16.msra.mxu0 %v3032_v33  ;;  %v3266_v50 = vpop.eup %3265  ;;  %v1271_v13 = vadd.f32 %v1239_v6, %v1171_v5  ;;  %v1469_v16 = vadd.f32 %v1437_v18, %v1369_v17  ;;  %v1538_v55 = vmul.f32 %v3764_v1, %v4641_v9  ;;  %v1836_v22 = vmul.f32 %v4407_v3, %v1203_v40 }
 0x1ba   : > { %v1370_v26 = vadd.f32 %v1338_v63, %v1270_v4  ;;  %v1669_v39 = vadd.f32 %v1637_v27, %v1568_v24  ;;  %3034 = vmatprep.subr.bf16.mxu0 %v5382_v53  ;;  %v3268_v49 = vpop.eup %3267  ;;  %v1768_v63 = vadd.f32 %v1736_v36, %v1668_v21  ;;  %v1638_v33 = vmul.f32 %v3758_v60, %v1005_v23 }
 0x1bb   : > { %v3270_v37 = vpop.eup %3269  ;;  %v1569_v5 = vadd.f32 %v1537_v45, %v1469_v16  ;;  %v4669_v14 = vadd.f32 %v4431_v0, %v1867_v25  ;;  %v1272_v18 = vadd.f32 %v1240_v51, %v4612_v15  ;;  %v1340_v31 = vmul.f32 %v3755_v57, %v1006_v2 }
 0x1bc   : > { %v4666_v27 = vadd.f32 %v4569_v54, %v1669_v39  ;;  %v3272_v53 = vpop.eup %3271  ;;  %v1868_v4 = vadd.f32 %v1836_v22, %v1768_v63  ;;  %v1470_v36 = vadd.f32 %v4564_v38, %v1370_v26  ;;  %v1371_v6 = vadd.f32 %v1339_v35, %v1271_v13  ;;  %v5383_v39 = vld [vmem:[#allocation14_spill] sm:$0xff] }
 0x1bd   : > { %3036 = vmatpush3.bf16.msra.mxu0 %v3035_v56  ;;  %v3274_v40 = vpop.eup %3273  ;;  %v1670_v17 = vadd.f32 %v1638_v33, %v1569_v5  ;;  %v1440_v24 = vmul.f32 %v3750_v61, %v4591_v32  ;;  %v4677_v54 = vmul.f32 %v3268_v49, %v5383_v39  ;;  %v1372_v15 = vadd.f32 %v1340_v31, %v1272_v18 }
 0x1be   : > { %2960 = vmatprep.subr.mxu0 %v4533_v29  ;;  %v3276_v25 = vpop.eup %3275  ;;  %v4681_v51 = vadd.f32 %v4431_v0, %v1868_v4  ;;  %v1570_v41 = vadd.f32 %v1538_v55, %v1470_v36  ;;  %v1639_v38 = vmul.f32 %v3758_v60, %v1006_v2  ;;  %v1041_v56 = vmul.f32 %v3696_v48, %v1005_v23  ;;  %v1205_v23 = vld [vmem:[#allocation2 + $0x12a] sm:$0xff]  ;;  %v5384_v55 = vld [vmem:[#allocation15_spill] sm:$0xff] }
 0x1bf   : > { %v1439_v26 = vmul.f32 %v3750_v61, %v4531_v34  ;;  %v4688_v45 = vadd.f32 %v4633_v7, %v1670_v17  ;;  %v1938_v21 = vsub.f32 0.0, %v4669_v14  ;;  %973 = vst [vmem:[#allocation2 + $0x159] sm:$0xff] %v4677_v54  ;;  %v4693_v16 = vadd.f32 %v1440_v24, %v1372_v15 }
 0x1c0   : > { %v1939_v13 = vsub.f32 0.0, %v4681_v51  ;;  %v1671_v49 = vadd.f32 %v1639_v38, %v1570_v41  ;;  %v1739_v35 = vmul.f32 %v3761_v62, %v4591_v32  ;;  %3277 = vrcp.f32 %v4625_v52 }
 0x1c1   : > { %v884_v34 = vmul.f32 %v3276_v25, %v5384_v55  ;;  %v1471_v63 = vadd.f32 %v1439_v26, %v1371_v6  ;;  %v793_v7 = vadd.f32 1.0, %v3264_v8  ;;  %3279 = vrcp.f32 %v4639_v10 }
 0x1c2   : > { %v2156_v22 = vadd.f32 %v4618_v43, %v4621_v44  ;;  %v4702_v33 = vadd.f32 %v1739_v35, %v1671_v49  ;;  %v791_v5 = vadd.f32 1.0, %v3266_v50  ;;  %v4705_v18 = vmul.f32 %v3270_v37, %v4434_v58 }
 0x1c3   : > { %v1173_v4 = vadd.f32 %v4629_v47, %v1041_v56  ;;  %v1988_v31 = vmul.f32 1.442695, %v1938_v21  ;;  %v4710_v52 = vmul.f32 %v3700_v59, %v4577_v19  ;;  %971 = vst [vmem:[#allocation2 + $0x141] sm:$0xff] %v884_v34  ;;  %v1241_v8 = vmul.f32 %v3708_v11, %v1205_v23  ;;  %v1008_v47 = vld [vmem:[#allocation2 + $0x150] sm:$0xff] }
 0x1c4   : > { %5385 = vst [vmem:[#allocation18_spill] sm:$0xff] %v4705_v18  ;;  %v1990_v10 = vmul.f32 1.442695, %v1939_v13  ;;  %v4715_v43 = vmul.f32 %v3750_v61, %v4577_v19  ;;  %v4719_v50 = vmul.f32 %v3761_v62, %v4577_v19  ;;  %v1539_v58 = vmul.f32 %v3764_v1, %v1205_v23 }
 0x1c5   : > { %v1042_v37 = vmul.f32 %v3696_v48, %v1006_v2  ;;  %3281 = vrcp.f32 %v793_v7  ;;  %v794_v36 = vadd.f32 1.0, %v3272_v53  ;;  %v1837_v6 = vmul.f32 %v4407_v3, %v4641_v9 }
 0x1c6   : > { %v1838_v17 = vmul.f32 %v4407_v3, %v1205_v23  ;;  %v1142_v24 = vmul.f32 %v3700_v59, %v4591_v32  ;;  %3283 = vrcp.f32 %v791_v5  ;;  %v4729_v39 = vmul.f32 %v3274_v40, %v4453_v42  ;;  %v4750_v49 = vld [vmem:[#allocation2 + $0x158] sm:$0xff] }
 0x1c7   : > { %v4732_v19 = vadd.f32 %v2156_v22, %v4705_v18  ;;  %v1273_v25 = vadd.f32 %v1241_v8, %v1173_v4  ;;  %3285 = vpow2.f32 %v1988_v31  ;;  %v4735_v2 = vmul.f32 %v3696_v48, %v1008_v47 }
 0x1c8   : > { %5386 = vst [vmem:[#allocation24_spill] sm:$0xff] %v4729_v39  ;;  %3287 = vpow2.f32 %v1990_v10  ;;  %v1342_v9 = vmul.f32 %v3755_v57, %v1008_v47  ;;  %v1641_v53 = vmul.f32 %v3758_v60, %v1008_v47  ;;  %v1174_v15 = vadd.f32 %v1142_v24, %v1042_v37  ;;  %v1208_v24 = vld [vmem:[#allocation2 + $0x152] sm:$0xff] }
 0x1c9   : > { %v1443_v32 = vmul.f32 %v3750_v61, %v4677_v54  ;;  %v4743_v42 = vmul.f32 %v3761_v62, %v4677_v54  ;;  %3289 = vrcp.f32 %v794_v36  ;;  %v1143_v41 = vmul.f32 %v3700_v59, %v884_v34 }
 0x1ca   : > { %v1007_v40 = vld [vmem:[#allocation2 + $0x140] sm:$0xff]  ;;  %v1571_v26 = vadd.f32 %v1539_v58, %v1471_v63  ;;  %3291 = vpow2.f32 %v4554_v20  ;;  %v1869_v21 = vadd.f32 %v1837_v6, %v4666_v27  ;;  %v4748_v13 = vpop.eup %3277  ;;  %v1441_v7 = vmul.f32 %v3750_v61, %v884_v34 }
 0x1cb   : > { %v1206_v38 = vld [vmem:[#allocation2 + $0x13a] sm:$0xff]  ;;  %v1207_v56 = vld [vmem:[#allocation2 + $0x142] sm:$0xff]  ;;  %v1043_v35 = vmul.f32 %v3696_v48, %v1007_v40  ;;  %v1341_v55 = vmul.f32 %v3755_v57, %v1007_v40  ;;  %v4756_v22 = vpop.eup %3279  ;;  %v1640_v20 = vmul.f32 %v3758_v60, %v1007_v40  ;;  %v1740_v27 = vmul.f32 %v3761_v62, %v884_v34 }
 0x1cc   : > { %v1242_v23 = vmul.f32 %v3708_v11, %v1206_v38  ;;  %v1540_v63 = vmul.f32 %v3764_v1, %v1206_v38  ;;  %v1870_v5 = vadd.f32 %v1838_v17, %v4688_v45  ;;  %v1243_v31 = vmul.f32 %v3708_v11, %v1207_v56 }
 0x1cd   : > { %v1175_v4 = vadd.f32 %v1143_v41, %v1043_v35  ;;  %v1373_v10 = vadd.f32 %v1341_v55, %v1273_v25  ;;  %v1343_v58 = vmul.f32 %v3755_v57, %v4750_v49  ;;  %v1672_v37 = vadd.f32 %v1640_v20, %v1571_v26 }
 0x1ce   : > { %v1274_v8 = vadd.f32 %v1242_v23, %v1174_v15  ;;  %v1572_v47 = vadd.f32 %v1540_v63, %v4693_v16  ;;  %v4767_v36 = vadd.f32 %v4431_v0, %v1869_v21  ;;  %v1541_v45 = vmul.f32 %v3764_v1, %v1207_v56 }
 0x1cf   : > { %v3282_v6 = vpop.eup %3281  ;;  %v1275_v40 = vadd.f32 %v1243_v31, %v1175_v4  ;;  %v1473_v18 = vadd.f32 %v1441_v7, %v1373_v10  ;;  %v1772_v41 = vadd.f32 %v1740_v27, %v1672_v37  ;;  %v1839_v25 = vmul.f32 %v4407_v3, %v1206_v38 }
 0x1d0   : > { %v1374_v34 = vadd.f32 %v1342_v9, %v1274_v8  ;;  %v3284_v17 = vpop.eup %3283  ;;  %v4772_v15 = vmul.f32 %v3282_v6, %v5371_v46  ;;  %v4775_v16 = vadd.f32 %v4431_v0, %v1870_v5  ;;  %v1642_v21 = vmul.f32 %v3758_v60, %v4750_v49 }
 0x1d1   : > { %v3286_v26 = vpop.eup %3285  ;;  %v1573_v35 = vadd.f32 %v1541_v45, %v1473_v18  ;;  %v4780_v9 = vmul.f32 %v3284_v17, %v5372_v12  ;;  %v1375_v23 = vadd.f32 %v1343_v58, %v1275_v40  ;;  %v1841_v7 = vmul.f32 %v4407_v3, %v1208_v24 }
 0x1d2   : > { %v3288_v55 = vpop.eup %3287  ;;  %v1871_v38 = vadd.f32 %v1839_v25, %v4702_v33  ;;  %976 = vst [vmem:[#allocation2 + $0x181] sm:$0xff] %v4772_v15  ;;  %v1474_v46 = vadd.f32 %v4715_v43, %v1374_v34  ;;  %v1673_v63 = vadd.f32 %v1641_v53, %v1572_v47  ;;  %v1840_v27 = vmul.f32 %v4407_v3, %v1207_v56  ;;  %v4798_v56 = vld [vmem:[#allocation2 + $0x15a] sm:$0xff] }
 0x1d3   : > { %v3290_v20 = vpop.eup %3289  ;;  %974 = vst [vmem:[#allocation2 + $0x169] sm:$0xff] %v4780_v9  ;;  %v4788_v18 = vadd.f32 %v1443_v32, %v1375_v23  ;;  %v1674_v12 = vadd.f32 %v1642_v21, %v1573_v35  ;;  %v1940_v5 = vsub.f32 0.0, %v4767_v36  ;;  %v2034_v31 = vadd.f32 1.0, %v3286_v26 }
 0x1d4   : > { %v3292_v4 = vpop.eup %3291  ;;  %v4792_v8 = vmul.f32 %v3290_v20, %v5374_v30  ;;  %v1773_v33 = vadd.f32 %v4719_v50, %v1673_v63  ;;  %v1941_v43 = vsub.f32 0.0, %v4775_v16  ;;  %v1176_v53 = vadd.f32 %v4710_v52, %v4735_v2 }
 0x1d5   : > { %v792_v10 = vadd.f32 1.0, %v3292_v4  ;;  %v1774_v32 = vadd.f32 %v4743_v42, %v1674_v12  ;;  %v1872_v58 = vadd.f32 %v1840_v27, %v1772_v41  ;;  %v2035_v47 = vadd.f32 1.0, %v3288_v55 }
 0x1d6   : > { %v1244_v37 = vmul.f32 %v3708_v11, %v1208_v24  ;;  %977 = vst [vmem:[#allocation2 + $0x189] sm:$0xff] %v4792_v8  ;;  %v1873_v30 = vadd.f32 %v1841_v7, %v1773_v33  ;;  %v4804_v6 = vadd.f32 %v4431_v0, %v1871_v38  ;;  %v1542_v50 = vmul.f32 %v3764_v1, %v1208_v24  ;;  %v1811_v33 = vld [vmem:[#allocation2 + $0x19a] sm:$0xff] }
 0x1d7   : > { %3293 = vrcp.f32 %v792_v10  ;;  %v4808_v52 = vadd.f32 %v4431_v0, %v1872_v58  ;;  %v1992_v2 = vmul.f32 1.442695, %v1940_v5  ;;  %v1842_v42 = vmul.f32 %v4407_v3, %v4798_v56 }
 0x1d8   : > { %3295 = vrcp.f32 %v2034_v31  ;;  %v1942_v40 = vsub.f32 0.0, %v4804_v6  ;;  %v1994_v34 = vmul.f32 1.442695, %v1941_v43  ;;  %v1574_v45 = vadd.f32 %v1542_v50, %v1474_v46  ;;  %v1712_v31 = vld [vmem:[#allocation2 + $0x1a1] sm:$0xff]  ;;  %v5388_v43 = vld [vmem:[#allocation30_spill] sm:$0xff] }
 0x1d9   : > { %3297 = vpow2.f32 %v1992_v2  ;;  %v1276_v17 = vadd.f32 %v1244_v37, %v1176_v53  ;;  %v1874_v25 = vadd.f32 %v1842_v42, %v1774_v32  ;;  %v4814_v24 = vadd.f32 %v4431_v0, %v1873_v30  ;;  %v5390_v30 = vld [vmem:[#allocation26_spill] sm:$0xff] }
 0x1da   : > { %3299 = vrcp.f32 %v2035_v47  ;;  %v1010_v41 = vld [vmem:[#allocation2 + $0x168] sm:$0xff]  ;;  %v1943_v35 = vsub.f32 0.0, %v4808_v52  ;;  %v2158_v23 = vadd.f32 %v4732_v19, %v4729_v39  ;;  %v1045_v55 = vmul.f32 %v3696_v48, %v4750_v49 }
 0x1db   : > { %v1344_v26 = vmul.f32 %v3755_v57, %v1010_v41  ;;  %v1643_v21 = vmul.f32 %v3758_v60, %v1010_v41  ;;  %3301 = vpow2.f32 %v1994_v34  ;;  %v1996_v7 = vmul.f32 1.442695, %v1942_v40  ;;  %v1812_v47 = vld [vmem:[#allocation2 + $0x1a2] sm:$0xff] }
 0x1dc   : > { %v4825_v38 = vmul.f32 %v4748_v13, %v4465_v28  ;;  %v1444_v46 = vmul.f32 %v3750_v61, %v4780_v9  ;;  %v1743_v27 = vmul.f32 %v3761_v62, %v4780_v9  ;;  %v4832_v12 = vadd.f32 %v4431_v0, %v1874_v25  ;;  %v1711_v28 = vld [vmem:[#allocation2 + $0x199] sm:$0xff] }
 0x1dd   : > { %v1376_v63 = vadd.f32 %v1344_v26, %v1276_v17  ;;  %v1675_v20 = vadd.f32 %v1643_v21, %v1574_v45  ;;  %v1944_v19 = vsub.f32 0.0, %v4814_v24  ;;  %v1145_v49 = vmul.f32 %v3700_v59, %v4677_v54  ;;  %v1310_v21 = vld [vmem:[#allocation2 + $0x180] sm:$0xff] }
 0x1de   : > { %5387 = vst [vmem:[#allocation25_spill] sm:$0xff] %v4825_v38  ;;  %v1998_v4 = vmul.f32 1.442695, %v1943_v35  ;;  %3303 = vpow2.f32 %v1996_v7  ;;  %v4843_v53 = vmul.f32 %v4756_v22, %v5388_v43  ;;  %v2159_v10 = vadd.f32 %v2158_v23, %v4825_v38 }
 0x1df   : > { %v4837_v5 = vadd.f32 %v1444_v46, %v1376_v63  ;;  %v4839_v13 = vadd.f32 %v1743_v27, %v1675_v20  ;;  %v1177_v58 = vadd.f32 %v1145_v49, %v1045_v55  ;;  %v4848_v54 = vmul.f32 %v4533_v29, %v3758_v60  ;;  %v1511_v49 = vld [vmem:[#allocation2 + $0x18a] sm:$0xff] }
 0x1e0   : > { %5389 = vst [vmem:[#allocation11_spill] sm:$0xff] %v4843_v53  ;;  %v4852_v2 = vmul.f32 %v3761_v62, %v1711_v28  ;;  %v1945_v42 = vsub.f32 0.0, %v4832_v12  ;;  %v2000_v40 = vmul.f32 1.442695, %v1944_v19  ;;  %v1245_v34 = vmul.f32 %v3708_v11, %v4798_v56  ;;  %v1510_v19 = vld [vmem:[#allocation2 + $0x182] sm:$0xff] }
 0x1e1   : > { %v3294_v32 = vpop.eup %3293  ;;  %v4858_v45 = vmul.f32 %v3761_v62, %v1712_v31  ;;  %v4861_v17 = vmul.f32 %v4407_v3, %v1811_v33  ;;  %3305 = vpow2.f32 %v1998_v4  ;;  %v1543_v26 = vmul.f32 %v3764_v1, %v4798_v56 }
 0x1e2   : > { %v3296_v37 = vpop.eup %3295  ;;  %v888_v50 = vmul.f32 %v3294_v32, %v5390_v30  ;;  %v1046_v35 = vmul.f32 %v3696_v48, %v1010_v41  ;;  %v4867_v23 = vmul.f32 %v4407_v3, %v1812_v47  ;;  %v2160_v55 = vadd.f32 %v2159_v10, %v4843_v53  ;;  %v1311_v41 = vld [vmem:[#allocation2 + $0x188] sm:$0xff] }
 0x1e3   : > { %v3298_v22 = vpop.eup %3297  ;;  %v1277_v46 = vadd.f32 %v1245_v34, %v1177_v58  ;;  %v1446_v63 = vmul.f32 %v3750_v61, %v4772_v15  ;;  %v4874_v20 = vmul.f32 %v3761_v62, %v4772_v15  ;;  %v1146_v56 = vmul.f32 %v3700_v59, %v4780_v9 }
 0x1e4   : > { %v3300_v25 = vpop.eup %3299  ;;  %975 = vst [vmem:[#allocation2 + $0x171] sm:$0xff] %v888_v50  ;;  %v2036_v27 = vadd.f32 1.0, %v3298_v22  ;;  %v1575_v28 = vadd.f32 %v1543_v26, %v4788_v18  ;;  %3307 = vpow2.f32 %v2000_v40  ;;  %v2002_v4 = vmul.f32 1.442695, %v1945_v42 }
 0x1e5   : > { %v3302_v7 = vpop.eup %3301  ;;  %v4880_v31 = vmul.f32 %v3296_v37, %v4669_v14  ;;  %v1346_v33 = vmul.f32 %v3755_v57, %v1310_v21  ;;  %v1447_v15 = vmul.f32 %v3750_v61, %v4792_v8  ;;  %v4887_v43 = vmul.f32 %v3761_v62, %v4792_v8 }
 0x1e6   : > { %v1178_v9 = vadd.f32 %v1146_v56, %v1046_v35  ;;  %v1645_v10 = vmul.f32 %v3758_v60, %v1310_v21  ;;  %v2037_v32 = vadd.f32 1.0, %v3302_v7  ;;  %v4891_v18 = vmul.f32 %v3300_v25, %v4681_v51 }
 0x1e7   : > { %5391 = vst [vmem:[#allocation7_spill] sm:$0xff] %v4880_v31  ;;  %v1347_v58 = vmul.f32 %v3755_v57, %v1311_v41  ;;  %v1546_v14 = vmul.f32 %v3764_v1, %v1510_v19  ;;  %v1547_v47 = vmul.f32 %v3764_v1, %v1511_v49  ;;  %3309 = vrcp.f32 %v2036_v27 }
 0x1e8   : > { %v3304_v37 = vpop.eup %3303  ;;  %v1646_v30 = vmul.f32 %v3758_v60, %v1311_v41  ;;  %v1845_v8 = vmul.f32 %v4407_v3, %v1510_v19  ;;  %v4899_v42 = vmul.f32 %v4407_v3, %v1511_v49  ;;  %3311 = vpow2.f32 %v2002_v4 }
 0x1e9   : > { %v1147_v51 = vmul.f32 %v3700_v59, %v888_v50  ;;  %v1445_v25 = vmul.f32 %v3750_v61, %v888_v50  ;;  %v1744_v26 = vmul.f32 %v3761_v62, %v888_v50  ;;  %v2161_v21 = vadd.f32 %v2160_v55, %v4880_v31 }
 0x1ea   : > { %3313 = vrcp.f32 %v2037_v32  ;;  %v2038_v49 = vadd.f32 1.0, %v3304_v37 }
 0x1eb   : > { %v1011_v40 = vld [vmem:[#allocation2 + $0x170] sm:$0xff]  ;;  %v3306_v56 = vpop.eup %3305 }
 0x1ec   : > { %v1210_v22 = vld [vmem:[#allocation2 + $0x16a] sm:$0xff]  ;;  %v1211_v34 = vld [vmem:[#allocation2 + $0x172] sm:$0xff]  ;;  %v1047_v35 = vmul.f32 %v3696_v48, %v1011_v40  ;;  %v1345_v27 = vmul.f32 %v3755_v57, %v1011_v40  ;;  %v1644_v59 = vmul.f32 %v3758_v60, %v1011_v40  ;;  %v2039_v60 = vadd.f32 1.0, %v3306_v56 }
 0x1ed   : > { %v1246_v7 = vmul.f32 %v3708_v11, %v1210_v22  ;;  %v1544_v41 = vmul.f32 %v3764_v1, %v1210_v22  ;;  %v1843_v19 = vmul.f32 %v4407_v3, %v1210_v22  ;;  %v1247_v62 = vmul.f32 %v3708_v11, %v1211_v34 }
 0x1ee   : > { %v1179_v61 = vadd.f32 %v1147_v51, %v1047_v35  ;;  %v1377_v55 = vadd.f32 %v1345_v27, %v1277_v46  ;;  %v1545_v48 = vmul.f32 %v3764_v1, %v1211_v34  ;;  %v1676_v31 = vadd.f32 %v1644_v59, %v1575_v28  ;;  %v3308_v32 = vpop.eup %3307 }
 0x1ef   : > { %v1278_v50 = vadd.f32 %v1246_v7, %v1178_v9  ;;  %v1576_v4 = vadd.f32 %v1544_v41, %v4837_v5  ;;  %v1875_v57 = vadd.f32 %v1843_v19, %v4839_v13  ;;  %v1844_v37 = vmul.f32 %v4407_v3, %v1211_v34  ;;  %v3359_v19 = vld [vmem:[%s5250_s4] ss:$0 sm:$0xff] }
 0x1f0   : > { %v1279_v53 = vadd.f32 %v1247_v62, %v1179_v61  ;;  %v1477_v39 = vadd.f32 %v1445_v25, %v1377_v55  ;;  %v1776_v22 = vadd.f32 %v1744_v26, %v1676_v31  ;;  %3315 = vrcp.f32 %v2038_v49 }
 0x1f1   : > { %v1378_v38 = vadd.f32 %v1346_v33, %v1278_v50  ;;  %v1677_v40 = vadd.f32 %v1645_v10, %v1576_v4  ;;  %v4917_v11 = vadd.f32 %v4431_v0, %v1875_v57  ;;  %v3310_v5 = vpop.eup %3309  ;;  %v2040_v33 = vadd.f32 1.0, %v3308_v32 }
 0x1f2   : > { %v1379_v46 = vadd.f32 %v1347_v58, %v1279_v53  ;;  %v1577_v1 = vadd.f32 %v1545_v48, %v1477_v39  ;;  %v1876_v13 = vadd.f32 %v1844_v37, %v1776_v22  ;;  %v3312_v25 = vpop.eup %3311  ;;  %3317 = vrcp.f32 %v2039_v60 }
 0x1f3   : > { %v1478_v9 = vadd.f32 %v1446_v63, %v1378_v38  ;;  %v1777_v28 = vadd.f32 %v4874_v20, %v1677_v40  ;;  %v1946_v51 = vsub.f32 0.0, %v4917_v11  ;;  %v2162_v39 = vadd.f32 %v2161_v21, %v4891_v18 }
 0x1f4   : > { %v1479_v35 = vadd.f32 %v1447_v15, %v1379_v46  ;;  %v1678_v31 = vadd.f32 %v1646_v30, %v1577_v1  ;;  %v4922_v34 = vadd.f32 %v4431_v0, %v1876_v13  ;;  %v3314_v38 = vpop.eup %3313  ;;  %v4928_v26 = vmul.f32 %v3310_v5, %v4767_v36 }
 0x1f5   : > { %v1578_v10 = vadd.f32 %v1546_v14, %v1478_v9  ;;  %v1877_v3 = vadd.f32 %v1845_v8, %v1777_v28  ;;  %v2004_v53 = vmul.f32 1.442695, %v1946_v51  ;;  %v2041_v30 = vadd.f32 1.0, %v3312_v25 }
 0x1f6   : > { %v1579_v63 = vadd.f32 %v1547_v47, %v1479_v35  ;;  %v1778_v58 = vadd.f32 %v4887_v43, %v1678_v31  ;;  %v1947_v14 = vsub.f32 0.0, %v4922_v34  ;;  %v4939_v36 = vmul.f32 %v3314_v38, %v4775_v16 }
 0x1f7   : > { %v1679_v20 = vadd.f32 %v4848_v54, %v1578_v10  ;;  %v4931_v15 = vadd.f32 %v4431_v0, %v1877_v3  ;;  %3319 = vpow2.f32 %v2004_v53  ;;  %v2163_v27 = vadd.f32 %v2162_v39, %v4928_v26 }
 0x1f8   : > { %v1680_v8 = vadd.f32 %v4848_v54, %v1579_v63  ;;  %v1878_v47 = vadd.f32 %v4899_v42, %v1778_v58  ;;  %3321 = vrcp.f32 %v2040_v33  ;;  %v2006_v43 = vmul.f32 1.442695, %v1947_v14 }
 0x1f9   : > { %v1779_v21 = vadd.f32 %v4852_v2, %v1679_v20  ;;  %v1948_v7 = vsub.f32 0.0, %v4931_v15  ;;  %v2164_v61 = vadd.f32 %v2163_v27, %v4939_v36 }
 0x1fa   : > { %v1780_v56 = vadd.f32 %v4858_v45, %v1680_v8  ;;  %v1917_v59 = vadd.f32 %v4431_v0, %v1878_v47  ;;  %3323 = vpow2.f32 %v2006_v43  ;;  %v3316_v2 = vpop.eup %3315 }
 0x1fb   : > { %v1879_v41 = vadd.f32 %v4861_v17, %v1779_v21  ;;  %v2008_v54 = vmul.f32 1.442695, %v1948_v7  ;;  %3325 = vrcp.f32 %v2041_v30  ;;  %v4951_v0 = vmul.f32 %v3316_v2, %v4804_v6 }
 0x1fc   : > { %v1880_v42 = vadd.f32 %v4867_v23, %v1780_v56  ;;  %v1949_v16 = vsub.f32 0.0, %v1917_v59  ;;  %v3318_v45 = vpop.eup %3317 }
 0x1fd   : > { %v1918_v49 = vadd.f32 %v3359_v19, %v1879_v41  ;;  %3327 = vpow2.f32 %v2008_v54  ;;  %v4954_v4 = vmul.f32 %v3318_v45, %v4808_v52  ;;  %v2165_v40 = vadd.f32 %v2164_v61, %v4951_v0 }
 0x1fe   : > { %v1919_v62 = vadd.f32 %v3359_v19, %v1880_v42  ;;  %v2010_v50 = vmul.f32 1.442695, %v1949_v16  ;;  %v2277_v42 = vld [vmem:[%s5253_s7] sm:$0xff] }
 0x1ff   : > { %v1950_v17 = vsub.f32 0.0, %v1918_v49  ;;  %v2166_v9 = vadd.f32 %v2165_v40, %v4954_v4  ;;  %v2199_v19 = vld [vmem:[%s5252_s6] sm:$0x1]  ;;  %v3088_v40 = vld [vmem:[%s5255_s9 + $0x28] sm:$0xff]  }
 0x200   : > { %v1951_v55 = vsub.f32 0.0, %v1919_v62  ;;  %3329 = vpow2.f32 %v2010_v50 }
 0x201   : > { %v2012_v23 = vmul.f32 1.442695, %v1950_v17  ;;  %v3320_v48 = vpop.eup %3319 }
 0x202   : > { %v3322_v57 = vpop.eup %3321  ;;  %v2014_v32 = vmul.f32 1.442695, %v1951_v55  ;;  %v2042_v60 = vadd.f32 1.0, %v3320_v48  ;;  %v3084_v48 = vld [vmem:[%s5255_s9 + $0x8] sm:$0xff]  }
 0x203   : > { %3331 = vpow2.f32 %v2012_v23  ;;  %v4958_v6 = vmul.f32 %v3322_v57, %v4814_v24  ;;  %v3083_v23 = vld [vmem:[%s5255_s9] sm:$0xff]   ;;  %v3085_v57 = vld [vmem:[%s5255_s9 + $0x10] sm:$0xff]  }
 0x204   : > { %3333 = vpow2.f32 %v2014_v32  ;;  %v3324_v22 = vpop.eup %3323  ;;  %2965 = vmatprep.subr.bf16.mxu1 %v3083_v23  ;;  %v3086_v32 = vld [vmem:[%s5255_s9 + $0x18] sm:$0xff]  }
 0x205   : > { %3335 = vrcp.f32 %v2042_v60  ;;  %v3326_v37 = vpop.eup %3325  ;;  %v2043_v46 = vadd.f32 1.0, %v3324_v22  ;;  %v2167_v13 = vadd.f32 %v2166_v9, %v4958_v6  ;;  %2966 = vmatpush3.bf16.msra.mxu1 %v3083_v23  ;;  %v3087_v60 = vld [vmem:[%s5255_s9 + $0x20] sm:$0xff]   ;;  %v3089_v22 = vld [vmem:[%s5255_s9 + $0x30] sm:$0xff]  }
 0x206   : > { %v4962_v28 = vmul.f32 %v3326_v37, %v4832_v12  ;;  %2967 = vmatprep.subr.bf16.mxu1 %v3084_v48  ;;  %v3090_v37 = vld [vmem:[%s5255_s9 + $0x38] sm:$0xff]  }
 0x207   : > { %v3328_v1 = vpop.eup %3327  ;;  %3337 = vrcp.f32 %v2043_v46  ;;  %v2278_v46 = vld [vmem:[%s5254_s8] sm:$0x1] }
 0x208   : > { %v2044_v5 = vadd.f32 1.0, %v3328_v1  ;;  %v2168_v24 = vadd.f32 %v2167_v13, %v4962_v28 }
 0x209   : > { %2968 = vmatpush3.bf16.msra.mxu1 %v3084_v48 }
 0x20a   : > { %v3330_v52 = vpop.eup %3329  ;;  %3339 = vrcp.f32 %v2044_v5  ;;  %2969 = vmatprep.subr.bf16.mxu1 %v3085_v57 }
 0x20b   : > { %v2045_v51 = vadd.f32 1.0, %v3330_v52 }
 0x20d   : > { %v3332_v33 = vpop.eup %3331  ;;  %3341 = vrcp.f32 %v2045_v51  ;;  %2970 = vmatpush3.bf16.msra.mxu1 %v3085_v57 }
 0x20e   : > { %v2046_v25 = vadd.f32 1.0, %v3332_v33  ;;  %v3334_v35 = vpop.eup %3333  ;;  %2971 = vmatprep.subr.bf16.mxu1 %v3086_v32 }
 0x20f   : > { %v3336_v10 = vpop.eup %3335  ;;  %v2047_v31 = vadd.f32 1.0, %v3334_v35  ;;  %v5392_v35 = vld [vmem:[#allocation6_spill] sm:$0xff] }
 0x210   : > { %3343 = vrcp.f32 %v2046_v25  ;;  %v4967_v3 = vmul.f32 %v3336_v10, %v4917_v11 }
 0x211   : > { %3345 = vrcp.f32 %v2047_v31  ;;  %v3338_v53 = vpop.eup %3337  ;;  %2972 = vmatpush3.bf16.msra.mxu1 %v3086_v32  ;;  %v5394_v31 = vld [vmem:[#allocation10_spill] sm:$0xff] }
 0x212   : > { %v2169_v12 = vadd.f32 %v2168_v24, %v4967_v3  ;;  %v4971_v39 = vmul.f32 %v3338_v53, %v4922_v34  ;;  %2973 = vmatprep.subr.bf16.mxu1 %v3087_v60  ;;  %v5393_v24 = vsub.s32 0, %v5392_v35 }
 0x214   : > { %v3340_v38 = vpop.eup %3339  ;;  %v2170_v20 = vadd.f32 %v2169_v12, %v4971_v39  ;;  %v5395_v12 = vld [vmem:[#allocation22_spill] sm:$0xff] }
 0x215   : > { %v4974_v63 = vmul.f32 %v3340_v38, %v4931_v15  ;;  %2974 = vmatpush3.bf16.msra.mxu1 %v3087_v60  ;;  %v5407_v60 = vld [vmem:[#allocation18_spill] sm:$0xff] }
 0x216   : > { %2975 = vmatprep.subr.bf16.mxu1 %v3088_v40 }
 0x217   : > { %v3342_v58 = vpop.eup %3341  ;;  %v2171_v14 = vadd.f32 %v2170_v20, %v4974_v63  ;;  %v5396_v20 = vld [vmem:[#allocation23_spill] sm:$0xff] }
 0x218   : > { %v4978_v30 = vmul.f32 %v3342_v58, %v1917_v59 }
 0x219   : > { %2976 = vmatpush3.bf16.msra.mxu1 %v3088_v40 }
 0x21a   : > { %v3344_v11 = vpop.eup %3343  ;;  %v2172_v21 = vadd.f32 %v2171_v14, %v4978_v30  ;;  %2977 = vmatprep.subr.bf16.mxu1 %v3089_v22  ;;  %v5397_v14 = vld [vmem:[#allocation20_spill] sm:$0xff] }
 0x21b   : > { %v4980_v8 = vmul.f32 %v3344_v11, %v1918_v49  ;;  %v3346_v47 = vpop.eup %3345 }
 0x21c   : > { %v4983_v7 = vmul.f32 %v3346_v47, %v1919_v62 }
 0x21d   : > { %v2173_v34 = vadd.f32 %v2172_v21, %v4980_v8  ;;  %2978 = vmatpush3.bf16.msra.mxu1 %v3089_v22  ;;  %v5398_v21 = vld [vmem:[#allocation8_spill] sm:$0xff] }
 0x21e   : > { %2979 = vmatprep.subr.bf16.mxu1 %v3090_v37  ;;  %v5408_v22 = vld [vmem:[#allocation24_spill] sm:$0xff] }
 0x21f   : > { %v2174_v15 = vadd.f32 %v2173_v34, %v4983_v7  ;;  %v5399_v34 = vld [vmem:[#allocation9_spill] sm:$0xff] }
 0x221   : > { %v2175_v43 = vrot.slane %v2174_v15, 4  ;;  %2980 = vmatpush3.bf16.msra.mxu1 %v3090_v37 }
 0x223   : > { %v2176_v27 = vadd.f32 %v2175_v43, %v2174_v15 }
 0x225   : > { %v2177_v56 = vrot.slane %v2176_v27, 2 }
 0x227   : > { %v2178_v41 = vadd.f32 %v2177_v56, %v2176_v27 }
 0x229   : > { %v2179_v54 = vrot.slane %v2178_v41, 1 }
 0x22b   : > { %v2180_v2 = vadd.f32 %v2179_v54, %v2178_v41  ;;  %v5400_v41 = vld [vmem:[#allocation21_spill] sm:$0xff] }
 0x22d   : > { %v2182_v59 = vmul.f32 0.00390625, %v2180_v2  ;;  %v5401_v2 = vld [vmem:[#allocation27_spill] sm:$0xff] }
 0x22f   : > { %2958 = vmatmul.mubr.f32.vlgmr.msra.gmra.mrb[32].mxu0 %v2182_v59 }
 0x230   : > { %2962 = vmatprep.mubr.msk.f32.mxu0 %vm3458_vm1, %v4533_v29  ;;  %2961 = vmatpush3.msra.mxu0 %v2277_v42  ;;  %v5402_v42 = vld [vmem:[#allocation28_spill] sm:$0xff] }
 0x302   : > { %v2266_v49 = vpop.f32.mrb[32].mxu0 }
 0x303   : > { %v2267_v16 = vadd.f32 %v2266_v49, %v2199_v19  ;;  %v2959_v61 = vpop.f32.mrb[33].mxu0  ;;  %v5403_v49 = vld [vmem:[#allocation29_spill] sm:$0xff] }
 0x305   : > { %v2270_v45 = vsub.f32 0.0, %v2267_v16 }
 0x307   : > { %v2271_v62 = vmul.f32 1.442695, %v2270_v45 }
 0x309   : > { %3347 = vpow2.f32 %v2271_v62  ;;  %v5404_v62 = vld [vmem:[#allocation19_spill] sm:$0xff] }
 0x313   : > { %v3348_v17 = vpop.eup %3347 }
 0x314   : > { %v2273_v50 = vadd.f32 1.0, %v3348_v17 }
 0x316   : > { %3349 = vrcp.f32 %v2273_v50  ;;  %v5405_v50 = vld [vmem:[#allocation16_spill] sm:$0xff] }
 0x320   : > { %v3350_v55 = vpop.eup %3349 }
 0x321   : > { %v2276_v29 = vmul.f32 %v3350_v55, %v2267_v16 }
 0x323   : > { %2963 = vmatmul.mubr.msk.f32.vlgmr.msra.gmra.mrb[34].mxu0 %vm2279_vm2, %v2276_v29  ;;  %v5406_v29 = vld [vmem:[#allocation17_spill] sm:$0xff] }
 0x3f6   : > { %v2349_v9 = vpop.f32.mrb[34].mxu0 }
 0x3f7   : > { %v2350_v1 = vadd.f32 %v2349_v9, %v2278_v46  ;;  %v2964_v5 = vpop.f32.mrb[35].mxu0  ;;  %v5409_v46 = vld [vmem:[#allocation25_spill] sm:$0xff] }
 0x3f9   : > { %v2353_v52 = vsub.f32 0.0, %v2350_v1  ;;  %v5410_v1 = vld [vmem:[#allocation11_spill] sm:$0xff] }
 0x3fb   : > { %v2354_v13 = vmul.f32 1.442695, %v2353_v52 }
 0x3fd   : > { %3351 = vpow2.f32 %v2354_v13 }
 0x407   : > { %v3352_v51 = vpop.eup %3351 }
 0x408   : > { %v2356_v33 = vadd.f32 1.0, %v3352_v51  ;;  %v5411_v51 = vld [vmem:[#allocation7_spill] sm:$0xff] }
 0x40a   : > { %3353 = vrcp.f32 %v2356_v33 }
 0x414   : > { %v3354_v25 = vpop.eup %3353 }
 0x415   : > { %v2362_v10 = vrot.slane %v3354_v25, %v5393_v24 }
 0x417   : > { %v2363_v53 = vmul.f32 %v2362_v10, %v5394_v31  ;;  %v2364_v38 = vmul.f32 %v2362_v10, %v5395_v12  ;;  %v2365_v58 = vmul.f32 %v2362_v10, %v5396_v20  ;;  %v2366_v11 = vmul.f32 %v2362_v10, %v5397_v14 }
 0x418   : > { %v2367_v47 = vmul.f32 %v2362_v10, %v5398_v21  ;;  %v2368_v15 = vmul.f32 %v2362_v10, %v5399_v34  ;;  %v2369_v54 = vmul.f32 %v2362_v10, %v5400_v41  ;;  %v2370_v59 = vmul.f32 %v2362_v10, %v5401_v2  ;;  %v3362_v41 = vld [vmem:[%s3581_s24 + $0x18] sm:$0xff]  ;;  %v3363_v2 = vld [vmem:[%s3581_s24 + $0x8] sm:$0xff] }
 0x419   : > { %v2395_v43 = vpack.c.bf16 %v2364_v38, %v2363_v53  ;;  %v2396_v27 = vpack.c.bf16 %v2366_v11, %v2365_v58  ;;  %v2371_v19 = vmul.f32 %v2362_v10, %v5402_v42  ;;  %v2372_v16 = vmul.f32 %v2362_v10, %v5403_v49 }
 0x41a   : > { %v2397_v56 = vpack.c.bf16 %v2368_v15, %v2367_v47  ;;  %v2398_v61 = vpack.c.bf16 %v2370_v59, %v2369_v54  ;;  %v2373_v17 = vmul.f32 %v2362_v10, %v5404_v62  ;;  %v2374_v55 = vmul.f32 %v2362_v10, %v5405_v50 }
 0x41b   : > { %2981 = vmatprep.mubr.bf16.mxu1 %v2395_v43  ;;  %v2399_v45 = vpack.c.bf16 %v2372_v16, %v2371_v19  ;;  %v2375_v23 = vmul.f32 %v2362_v10, %v5406_v29  ;;  %v2376_v48 = vmul.f32 %v2362_v10, %v4621_v44  ;;  %v2377_v40 = vmul.f32 %v2362_v10, %v5407_v60  ;;  %v3361_v43 = vld [vmem:[%s3581_s24] sm:$0xff] }
 0x41c   : > { %2982 = vmatmul.mubr.bf16.vlgmr.msra.gmra.mrb[0].mxu1 %v2396_v27  ;;  %v2400_v57 = vpack.c.bf16 %v2374_v55, %v2373_v17  ;;  %v2378_v37 = vmul.f32 %v2362_v10, %v5408_v22  ;;  %v2379_v9 = vmul.f32 %v2362_v10, %v5409_v46  ;;  %v2380_v5 = vmul.f32 %v2362_v10, %v5410_v1  ;;  %v3365_v55 = vld [vmem:[%s3581_s24 + $0x20] sm:$0xff]  ;;  %v3368_v1 = vld [vmem:[%s3581_s24 + $0x50] sm:$0xff] }
 0x41d   : > { %2985 = vmatprep.mubr.bf16.mxu1 %v2397_v56  ;;  %v2401_v32 = vpack.c.bf16 %v2376_v48, %v2375_v23  ;;  %v2381_v33 = vmul.f32 %v2362_v10, %v5411_v51  ;;  %v2382_v44 = vmul.f32 %v2362_v10, %v4891_v18  ;;  %v2383_v25 = vmul.f32 %v2362_v10, %v4928_v26  ;;  %v3366_v48 = vld [vmem:[%s3581_s24 + $0x38] sm:$0xff]  ;;  %v3369_v51 = vld [vmem:[%s3581_s24 + $0x40] sm:$0xff] }
 0x41e   : > { %v2402_v52 = vpack.c.bf16 %v2378_v37, %v2377_v40  ;;  %v2403_v13 = vpack.c.bf16 %v2380_v5, %v2379_v9  ;;  %v2384_v35 = vmul.f32 %v2362_v10, %v4939_v36  ;;  %v2385_v53 = vmul.f32 %v2362_v10, %v4951_v0 }
 0x41f   : > { %v2404_v24 = vpack.c.bf16 %v2382_v44, %v2381_v33  ;;  %v2386_v12 = vmul.f32 %v2362_v10, %v4954_v4  ;;  %v2387_v38 = vmul.f32 %v2362_v10, %v4958_v6  ;;  %v2388_v20 = vmul.f32 %v2362_v10, %v4962_v28 }
 0x420   : > { %v2405_v31 = vpack.c.bf16 %v2384_v35, %v2383_v25  ;;  %v2389_v18 = vmul.f32 %v2362_v10, %v4967_v3  ;;  %v2390_v26 = vmul.f32 %v2362_v10, %v4971_v39  ;;  %v2391_v36 = vmul.f32 %v2362_v10, %v4974_v63  ;;  %v5060_v3 = vld [vmem:[%s5256_s10] ss:$0 sm:$0xff]  ;;  %v3370_v25 = vld [vmem:[%s3581_s24 + $0x58] sm:$0xff] }
 0x421   : > { %v2406_v58 = vpack.c.bf16 %v2386_v12, %v2385_v53  ;;  %v2407_v14 = vpack.c.bf16 %v2388_v20, %v2387_v38  ;;  %v2392_v0 = vmul.f32 %v2362_v10, %v4978_v30  ;;  %v2393_v6 = vmul.f32 %v2362_v10, %v4980_v8 }
 0x422   : > { %v2408_v11 = vpack.c.bf16 %v2390_v26, %v2389_v18  ;;  %v2394_v28 = vmul.f32 %v2362_v10, %v4983_v7  ;;  %v3360_v7 = vld [vmem:[%s3581_s24 + $0x10] sm:$0xff] }
 0x423   : > { %v2409_v4 = vpack.c.bf16 %v2392_v0, %v2391_v36  ;;  %v3373_v0 = vld [vmem:[%s3581_s24 + $0x60] sm:$0xff] }
 0x424   : > { %2986 = vmatmul.mubr.bf16.gmra.mrb[4].mxu1 %v2398_v61  ;;  %v2410_v21 = vpack.c.bf16 %v2394_v28, %v2393_v6  ;;  %v3374_v6 = vld [vmem:[%s3581_s24 + $0x78] sm:$0xff] }
 0x425   : > { %2989 = vmatprep.mubr.bf16.mxu1 %v2399_v45  ;;  %v3364_v45 = vld [vmem:[%s3581_s24 + $0x30] sm:$0xff] }
 0x42c   : > { %2990 = vmatmul.mubr.bf16.gmra.mrb[8].mxu1 %v2400_v57 }
 0x42d   : > { %2993 = vmatprep.mubr.bf16.mxu1 %v2401_v32  ;;  %v3367_v32 = vld [vmem:[%s3581_s24 + $0x28] sm:$0xff] }
 0x434   : > { %2994 = vmatmul.mubr.bf16.gmra.mrb[12].mxu1 %v2402_v52 }
 0x435   : > { %2997 = vmatprep.mubr.bf16.mxu1 %v2403_v13 }
 0x43c   : > { %2998 = vmatmul.mubr.bf16.gmra.mrb[16].mxu1 %v2404_v24  ;;  %v3371_v24 = vld [vmem:[%s3581_s24 + $0x48] sm:$0xff] }
 0x43d   : > { %3001 = vmatprep.mubr.bf16.mxu1 %v2405_v31 }
 0x444   : > { %3002 = vmatmul.mubr.bf16.gmra.mrb[20].mxu1 %v2406_v58 }
 0x445   : > { %3005 = vmatprep.mubr.bf16.mxu1 %v2407_v14  ;;  %v3372_v14 = vld [vmem:[%s3581_s24 + $0x70] sm:$0xff] }
 0x44c   : > { %3006 = vmatmul.mubr.bf16.gmra.mrb[24].mxu1 %v2408_v11 }
 0x44d   : > { %3009 = vmatprep.mubr.bf16.mxu1 %v2409_v4 }
 0x454   : > { %3010 = vmatmul.mubr.bf16.gmra.mrb[28].mxu1 %v2410_v21  ;;  %v3375_v21 = vld [vmem:[%s3581_s24 + $0x68] sm:$0xff] }
 0x4ef   : > { %v2983_v39 = vpop.f32.mrb[0].mxu1 }
 0x4f0   : > { %v2525_v63 = vadd.f32 %v2983_v39, %v5060_v3  ;;  %v2516_v30 = vpop.f32.mrb[1].mxu1 }
 0x4f1   : > { %v2517_v8 = vadd.f32 %v5060_v3, %v2516_v30  ;;  %v2984_v47 = vpop.f32.mrb[2].mxu1 }
 0x4f2   : > { %v2645_v10 = vadd.f32 %v3360_v7, %v2525_v63  ;;  %v2528_v34 = vadd.f32 %v2984_v47, %v5060_v3  ;;  %v2519_v15 = vpop.f32.mrb[3].mxu1 }
 0x4f3   : > { %v2643_v27 = vadd.f32 %v3361_v43, %v2517_v8  ;;  %v2520_v56 = vadd.f32 %v5060_v3, %v2519_v15 }
 0x4f4   : > { %2677 = vst.msk [vmem:[%s5070_s30 + $0x10] sm:$0xff] %vm457_vm0, %v2645_v10  ;;  %v2646_v54 = vadd.f32 %v3362_v41, %v2528_v34  ;;  %v3376_v10 = vld [vmem:[%s3581_s24 + $0x90] sm:$0xff] }
 0x4f5   : > { %2675 = vst.msk [vmem:[%s5070_s30] sm:$0xff] %vm457_vm0, %v2643_v27  ;;  %v2644_v59 = vadd.f32 %v3363_v2, %v2520_v56  ;;  %v3377_v27 = vld [vmem:[%s3581_s24 + $0x80] sm:$0xff] }
 0x4f6   : > { %2678 = vst.msk [vmem:[%s5070_s30 + $0x18] sm:$0xff] %vm457_vm0, %v2646_v54  ;;  %v3378_v54 = vld [vmem:[%s3581_s24 + $0x98] sm:$0xff] }
 0x4f7   : > { %2676 = vst.msk [vmem:[%s5070_s30 + $0x8] sm:$0xff] %vm457_vm0, %v2644_v59  ;;  %v2987_v42 = vpop.f32.mrb[4].mxu1  ;;  %v3379_v59 = vld [vmem:[%s3581_s24 + $0x88] sm:$0xff] }
 0x4f8   : > { %v2541_v19 = vadd.f32 %v2987_v42, %v5060_v3  ;;  %v2532_v49 = vpop.f32.mrb[5].mxu1 }
 0x4f9   : > { %v2533_v16 = vadd.f32 %v5060_v3, %v2532_v49  ;;  %v2988_v61 = vpop.f32.mrb[6].mxu1 }
 0x4fa   : > { %v2649_v62 = vadd.f32 %v3364_v45, %v2541_v19  ;;  %v2544_v17 = vadd.f32 %v2988_v61, %v5060_v3  ;;  %v2535_v50 = vpop.f32.mrb[7].mxu1 }
 0x4fb   : > { %v2647_v29 = vadd.f32 %v3365_v55, %v2533_v16  ;;  %v2536_v23 = vadd.f32 %v5060_v3, %v2535_v50 }
 0x4fc   : > { %2681 = vst.msk [vmem:[%s5070_s30 + $0x30] sm:$0xff] %vm457_vm0, %v2649_v62  ;;  %v2650_v57 = vadd.f32 %v3366_v48, %v2544_v17  ;;  %v3380_v62 = vld [vmem:[%s3581_s24 + $0xb0] sm:$0xff] }
 0x4fd   : > { %2679 = vst.msk [vmem:[%s5070_s30 + $0x20] sm:$0xff] %vm457_vm0, %v2647_v29  ;;  %v2648_v60 = vadd.f32 %v3367_v32, %v2536_v23  ;;  %v3381_v29 = vld [vmem:[%s3581_s24 + $0xa0] sm:$0xff] }
 0x4fe   : > { %2682 = vst.msk [vmem:[%s5070_s30 + $0x38] sm:$0xff] %vm457_vm0, %v2650_v57  ;;  %v3382_v57 = vld [vmem:[%s3581_s24 + $0xb8] sm:$0xff] }
 0x4ff   : > { %2680 = vst.msk [vmem:[%s5070_s30 + $0x28] sm:$0xff] %vm457_vm0, %v2648_v60  ;;  %v2991_v40 = vpop.f32.mrb[8].mxu1  ;;  %v3383_v60 = vld [vmem:[%s3581_s24 + $0xa8] sm:$0xff] }
 0x500   : > { %v2557_v22 = vadd.f32 %v2991_v40, %v5060_v3  ;;  %v2548_v37 = vpop.f32.mrb[9].mxu1 }
 0x501   : > { %v2549_v46 = vadd.f32 %v5060_v3, %v2548_v37  ;;  %v2992_v9 = vpop.f32.mrb[10].mxu1 }
 0x502   : > { %v2653_v5 = vadd.f32 %v3368_v1, %v2557_v22  ;;  %v2560_v52 = vadd.f32 %v2992_v9, %v5060_v3  ;;  %v2551_v13 = vpop.f32.mrb[11].mxu1 }
 0x503   : > { %v2651_v33 = vadd.f32 %v3369_v51, %v2549_v46  ;;  %v2552_v44 = vadd.f32 %v5060_v3, %v2551_v13 }
 0x504   : > { %2685 = vst.msk [vmem:[%s5070_s30 + $0x50] sm:$0xff] %vm457_vm0, %v2653_v5  ;;  %v2654_v35 = vadd.f32 %v3370_v25, %v2560_v52  ;;  %v3384_v5 = vld [vmem:[%s3581_s24 + $0xd0] sm:$0xff] }
 0x505   : > { %2683 = vst.msk [vmem:[%s5070_s30 + $0x40] sm:$0xff] %vm457_vm0, %v2651_v33  ;;  %v2652_v31 = vadd.f32 %v3371_v24, %v2552_v44  ;;  %v3385_v33 = vld [vmem:[%s3581_s24 + $0xc0] sm:$0xff] }
 0x506   : > { %2686 = vst.msk [vmem:[%s5070_s30 + $0x58] sm:$0xff] %vm457_vm0, %v2654_v35  ;;  %v3386_v35 = vld [vmem:[%s3581_s24 + $0xd8] sm:$0xff] }
 0x507   : > { %2684 = vst.msk [vmem:[%s5070_s30 + $0x48] sm:$0xff] %vm457_vm0, %v2652_v31  ;;  %v2995_v53 = vpop.f32.mrb[12].mxu1  ;;  %v3387_v31 = vld [vmem:[%s3581_s24 + $0xc8] sm:$0xff] }
 0x508   : > { %v2573_v12 = vadd.f32 %v2995_v53, %v5060_v3  ;;  %v2564_v38 = vpop.f32.mrb[13].mxu1 }
 0x509   : > { %v2565_v20 = vadd.f32 %v5060_v3, %v2564_v38  ;;  %v2996_v58 = vpop.f32.mrb[14].mxu1 }
 0x50a   : > { %v2657_v18 = vadd.f32 %v3372_v14, %v2573_v12  ;;  %v2576_v26 = vadd.f32 %v2996_v58, %v5060_v3  ;;  %v2567_v36 = vpop.f32.mrb[15].mxu1 }
 0x50b   : > { %v2655_v11 = vadd.f32 %v3373_v0, %v2565_v20  ;;  %v2568_v4 = vadd.f32 %v5060_v3, %v2567_v36 }
 0x50c   : > { %2689 = vst.msk [vmem:[%s5070_s30 + $0x70] sm:$0xff] %vm457_vm0, %v2657_v18  ;;  %v2658_v28 = vadd.f32 %v3374_v6, %v2576_v26  ;;  %v3388_v18 = vld [vmem:[%s3581_s24 + $0xf0] sm:$0xff] }
 0x50d   : > { %2687 = vst.msk [vmem:[%s5070_s30 + $0x60] sm:$0xff] %vm457_vm0, %v2655_v11  ;;  %v2656_v39 = vadd.f32 %v3375_v21, %v2568_v4  ;;  %v3389_v11 = vld [vmem:[%s3581_s24 + $0xe0] sm:$0xff] }
 0x50e   : > { %2690 = vst.msk [vmem:[%s5070_s30 + $0x78] sm:$0xff] %vm457_vm0, %v2658_v28  ;;  %v3390_v28 = vld [vmem:[%s3581_s24 + $0xf8] sm:$0xff] }
 0x50f   : > { %2688 = vst.msk [vmem:[%s5070_s30 + $0x68] sm:$0xff] %vm457_vm0, %v2656_v39  ;;  %v2999_v63 = vpop.f32.mrb[16].mxu1  ;;  %v3391_v39 = vld [vmem:[%s3581_s24 + $0xe8] sm:$0xff] }
 0x510   : > { %v2589_v30 = vadd.f32 %v2999_v63, %v5060_v3  ;;  %v2580_v8 = vpop.f32.mrb[17].mxu1 }
 0x511   : > { %v2581_v47 = vadd.f32 %v5060_v3, %v2580_v8  ;;  %v3000_v7 = vpop.f32.mrb[18].mxu1 }
 0x512   : > { %v2661_v34 = vadd.f32 %v3376_v10, %v2589_v30  ;;  %v2592_v15 = vadd.f32 %v3000_v7, %v5060_v3  ;;  %v2583_v43 = vpop.f32.mrb[19].mxu1 }
 0x513   : > { %v2659_v56 = vadd.f32 %v3377_v27, %v2581_v47  ;;  %v2584_v41 = vadd.f32 %v5060_v3, %v2583_v43 }
 0x514   : > { %2693 = vst.msk [vmem:[%s5070_s30 + $0x90] sm:$0xff] %vm457_vm0, %v2661_v34  ;;  %v2662_v2 = vadd.f32 %v3378_v54, %v2592_v15 }
 0x515   : > { %2691 = vst.msk [vmem:[%s5070_s30 + $0x80] sm:$0xff] %vm457_vm0, %v2659_v56  ;;  %v2660_v42 = vadd.f32 %v3379_v59, %v2584_v41 }
 0x516   : > { %2694 = vst.msk [vmem:[%s5070_s30 + $0x98] sm:$0xff] %vm457_vm0, %v2662_v2 }
 0x517   : > { %2692 = vst.msk [vmem:[%s5070_s30 + $0x88] sm:$0xff] %vm457_vm0, %v2660_v42  ;;  %v3003_v19 = vpop.f32.mrb[20].mxu1 }
 0x518   : > { %v2605_v49 = vadd.f32 %v3003_v19, %v5060_v3  ;;  %v2596_v16 = vpop.f32.mrb[21].mxu1 }
 0x519   : > { %v2597_v61 = vadd.f32 %v5060_v3, %v2596_v16  ;;  %v3004_v45 = vpop.f32.mrb[22].mxu1 }
 0x51a   : > { %v2665_v17 = vadd.f32 %v3380_v62, %v2605_v49  ;;  %v2608_v50 = vadd.f32 %v3004_v45, %v5060_v3  ;;  %v2599_v55 = vpop.f32.mrb[23].mxu1 }
 0x51b   : > { %v2663_v23 = vadd.f32 %v3381_v29, %v2597_v61  ;;  %v2600_v48 = vadd.f32 %v5060_v3, %v2599_v55 }
 0x51c   : > { %2697 = vst.msk [vmem:[%s5070_s30 + $0xb0] sm:$0xff] %vm457_vm0, %v2665_v17  ;;  %v2666_v32 = vadd.f32 %v3382_v57, %v2608_v50 }
 0x51d   : > { %2695 = vst.msk [vmem:[%s5070_s30 + $0xa0] sm:$0xff] %vm457_vm0, %v2663_v23  ;;  %v2664_v40 = vadd.f32 %v3383_v60, %v2600_v48 }
 0x51e   : > { %2698 = vst.msk [vmem:[%s5070_s30 + $0xb8] sm:$0xff] %vm457_vm0, %v2666_v32 }
 0x51f   : > { %2696 = vst.msk [vmem:[%s5070_s30 + $0xa8] sm:$0xff] %vm457_vm0, %v2664_v40  ;;  %v3007_v22 = vpop.f32.mrb[24].mxu1 }
 0x520   : > { %v2621_v37 = vadd.f32 %v3007_v22, %v5060_v3  ;;  %v2612_v46 = vpop.f32.mrb[25].mxu1 }
 0x521   : > { %v2613_v9 = vadd.f32 %v5060_v3, %v2612_v46  ;;  %v3008_v1 = vpop.f32.mrb[26].mxu1 }
 0x522   : > { %v2669_v52 = vadd.f32 %v3384_v5, %v2621_v37  ;;  %v2624_v13 = vadd.f32 %v3008_v1, %v5060_v3  ;;  %v2615_v51 = vpop.f32.mrb[27].mxu1 }
 0x523   : > { %v2667_v44 = vadd.f32 %v3385_v33, %v2613_v9  ;;  %v2616_v25 = vadd.f32 %v5060_v3, %v2615_v51 }
 0x524   : > { %2701 = vst.msk [vmem:[%s5070_s30 + $0xd0] sm:$0xff] %vm457_vm0, %v2669_v52  ;;  %v2670_v24 = vadd.f32 %v3386_v35, %v2624_v13 }
 0x525   : > { %2699 = vst.msk [vmem:[%s5070_s30 + $0xc0] sm:$0xff] %vm457_vm0, %v2667_v44  ;;  %v2668_v53 = vadd.f32 %v3387_v31, %v2616_v25 }
 0x526   : > { %2702 = vst.msk [vmem:[%s5070_s30 + $0xd8] sm:$0xff] %vm457_vm0, %v2670_v24 }
 0x527   : > { %2700 = vst.msk [vmem:[%s5070_s30 + $0xc8] sm:$0xff] %vm457_vm0, %v2668_v53  ;;  %v3011_v12 = vpop.f32.mrb[28].mxu1 }
 0x528   : > { %v2637_v38 = vadd.f32 %v3011_v12, %v5060_v3  ;;  %v2628_v20 = vpop.f32.mrb[29].mxu1 }
 0x529   : > { %v2629_v58 = vadd.f32 %v5060_v3, %v2628_v20  ;;  %v3012_v14 = vpop.f32.mrb[30].mxu1 }
 0x52a   : > { %v2673_v26 = vadd.f32 %v3388_v18, %v2637_v38  ;;  %v2640_v36 = vadd.f32 %v3012_v14, %v5060_v3  ;;  %v2631_v0 = vpop.f32.mrb[31].mxu1 }
 0x52b   : > { %v2671_v4 = vadd.f32 %v3389_v11, %v2629_v58  ;;  %v2632_v6 = vadd.f32 %v5060_v3, %v2631_v0 }
 0x52c   : > { %2705 = vst.msk [vmem:[%s5070_s30 + $0xf0] sm:$0xff] %vm457_vm0, %v2673_v26  ;;  %v2674_v21 = vadd.f32 %v3390_v28, %v2640_v36 }
 0x52d   : > { %2703 = vst.msk [vmem:[%s5070_s30 + $0xe0] sm:$0xff] %vm457_vm0, %v2671_v4  ;;  %v2672_v63 = vadd.f32 %v3391_v39, %v2632_v6 }
 0x52e   : > { %2706 = vst.msk [vmem:[%s5070_s30 + $0xf8] sm:$0xff] %vm457_vm0, %v2674_v21 }
 0x52f   : > { %2704 = vst.msk [vmem:[%s5070_s30 + $0xe8] sm:$0xff] %vm457_vm0, %v2672_v63 }
 0x530   : > { %3405 = shalt.err (!%p3402_p3)
}
 0x531   : > { %s3406_s24 = scalar_lea.hbm %s5192_s15, 4096  ;;  %s3410_s21 = scalar_lea.hbm %s5257_s11, 8192 }
 0x532   : > { %p3407_p4 = scmp.ne.s32.totalorder %s5192_s15, %s3406_s24  ;;  %p3411_p9 = scmp.lt.u32.totalorder %s5192_s15, %s5257_s11 }
 0x533   : > { %p3412_p10 = scmp.lt.u32.totalorder %s3410_s21, %s3406_s24  ;;  %p3414_p12 = scmp.lt.u32.totalorder %s3406_s24, %s5192_s15 }
 0x534   : > { %p3408_p7 = pnand %p3407_p4, %p3560_p5 }
 0x535   : > { %p3413_p11 = por %p3412_p10, %p3411_p9 }
 0x536   : > { %p3409_p8 = pneg %p3408_p7 }
 0x537   : > { %p3415_p13 = por %p3414_p12, %p3413_p11 }
 0x539   : > { %p3416_p0 = pnand %p3415_p13, %p3409_p8 }
 0x53b   : > { %3419 = shalt.err (!%p3416_p0)
}
 0x53c   : > { %s3460_s25 = smov 128   ;;  %s3461_s14 = smov 8  }
 0x53d   : > { %3037 = dma.vmem_to_hbm [thread:$0]  (%p3560_p5), %s5194_s13, 4096, %s5192_s15, %s5205_s22, %s3460_s25, %s3460_s25, %s3461_s14  }
 0x53e PF: > { %p3043_p1 = scmp.ge.s32.totalorder %s3454_s20, 2  ;;  %s2736_s16 = sand.u32 1, %s3442_s17  }
 0x53f   : > { %s2737_s24 = scalar_lea.sflag [#allocation4], %s2736_s16 }
 0x540   : > { %p3040_p2 = pnand %p3043_p1, %p3564_p6 }
 0x542   : > { %3437 = dma.done.wait (!%p3040_p2), %s2737_s24, 4096  }
 0x543   : > { %3439 = vsyncadd (!%p3040_p2), %s2737_s24, 4294963200  ;;  %p21_p3 = scmp.ge.s32.totalorder %s3547_s23, 4   ;;  %s5412_s17 = smov %s3446_s18 }
 0x544   : > { %s5413_s18 = smov %s3450_s19  ;;  %s5414_s19 = smov %s3558_s26 }
 0x545   : > { %s5415_s20 = smov %s3547_s23  ;;  %23 = sbr.rel (!%p21_p3) target bundleno = 3 (0x3), region = 101 }
 0x54c   :  { %2742 = vsyncpa [#allocation4], 1 }
 0x54d   :  { %2744 = vsyncpa [#allocation4 + $0x1], 1 }

</bundles_post_ra>
